<compile_context>
chip_gen: v7x
topology: tpu7x:2x2x1
jax: 0.10.0
libtpu: 0.0.40
codegen_flags: <defaults>
</compile_context>

<pallas_src>
import functools

import jax
import jax.numpy as jnp
from jax import lax
from jax.experimental import pallas as pl
from jax.experimental.pallas import tpu as pltpu  # noqa: F401  (kept for TPU-specific tuning hooks)


def _full_spec(shape):
    n = len(shape)
    return pl.BlockSpec(shape, lambda *_: (0,) * n)


def _layernorm(x, g, b, eps=1e-5):
    mu = jnp.mean(x, axis=-1, keepdims=True)
    var = jnp.mean((x - mu) ** 2, axis=-1, keepdims=True)
    return (x - mu) * lax.rsqrt(var + eps) * g + b


# --------------------------- fused forward kernel ----------------------------
def fused_forward_kernel(
        pts_ref, heat_ref,
        wp1_ref, bp1_ref, wp2_ref, bp2_ref,
        wh1_ref, bh1_ref, wh2_ref, bh2_ref,
        wi1_ref, bi1_ref, wi2_ref, bi2_ref,
        wqh_ref, bqh_ref, wkh_ref, bkh_ref, wvh_ref, bvh_ref,
        woh_ref, bo_ref,
        ln1g_ref, ln1b_ref, ln2g_ref, ln2b_ref,
        w1_ref, b1_ref, w2_ref, b2_ref,
        wo1_ref, bo1_ref, wo2_ref, bo2_ref,
        out_ref,
        *, num_heads, depth, batch, seq):
    pts = pts_ref[...]           # (T, 3)
    heat = heat_ref[...]         # (T, 1)
    wp1 = wp1_ref[...]           # (3, P/2)

    # ---- embeddings (all tokens folded; tiny-K (K=3 / K=1) layers stay on VPU) ----
    pe = (pts[:, 0:1] * wp1[0:1, :]
          + pts[:, 1:2] * wp1[1:2, :]
          + pts[:, 2:3] * wp1[2:3, :]) + bp1_ref[...]
    pe = jnp.maximum(pe, 0.0)
    pe = jnp.dot(pe, wp2_ref[...], preferred_element_type=jnp.float32) + bp2_ref[...]
    pe = jnp.maximum(pe, 0.0)

    he = heat * wh1_ref[...] + bh1_ref[...]          # (T,1)*(1,H/2) broadcast
    he = jnp.maximum(he, 0.0)
    he = jnp.dot(he, wh2_ref[...], preferred_element_type=jnp.float32) + bh2_ref[...]
    he = jnp.maximum(he, 0.0)

    x = jnp.concatenate([pe, he], axis=-1)           # torch.cat([ptse, he], -1)
    x = jnp.dot(x, wi1_ref[...], preferred_element_type=jnp.float32) + bi1_ref[...]
    x = jnp.maximum(x, 0.0)
    x = jnp.dot(x, wi2_ref[...], preferred_element_type=jnp.float32) + bi2_ref[...]
    x = jnp.maximum(x, 0.0)                          # (T, D)

    d = x.shape[-1]
    dh = d // num_heads
    scale = 1.0 / (dh ** 0.5)

    # ---- transformer blocks: x stays resident, weights indexed by static layer id ----
    for l in range(depth):
        # Per-head projections on the full folded token axis.  Using head-split
        # weights avoids lane sub-extracts of activations entirely.
        q_heads, k_heads, v_heads = [], [], []
        for h in range(num_heads):
            idx = l * num_heads + h
            q_heads.append(jnp.dot(x, wqh_ref[idx],
                                   preferred_element_type=jnp.float32) + bqh_ref[idx])
            k_heads.append(jnp.dot(x, wkh_ref[idx],
                                   preferred_element_type=jnp.float32) + bkh_ref[idx])
            v_heads.append(jnp.dot(x, wvh_ref[idx],
                                   preferred_element_type=jnp.float32) + bvh_ref[idx])

        # Attention is the only part that needs per-(batch, head) structure.
        attn_parts = []
        for bi in range(batch):
            rows = slice(bi * seq, (bi + 1) * seq)       # aligned sublane row-slice
            attn_b = None
            for h in range(num_heads):
                idx = l * num_heads + h
                qh = q_heads[h][rows]                    # (N, dh)
                kh = k_heads[h][rows]
                vh = v_heads[h][rows]
                s = lax.dot_general(qh, kh, (((1,), (1,)), ((), ())),
                                    preferred_element_type=jnp.float32) * scale
                s = s - jnp.max(s, axis=-1, keepdims=True)
                e = jnp.exp(s)
                p = e * pl.reciprocal(jnp.sum(e, axis=-1, keepdims=True), approx=True)
                ctx = jnp.dot(p, vh, preferred_element_type=jnp.float32)     # (N, dh)
                # concat(heads) @ Wo  ==  sum_h head_h @ Wo_rowblock_h : no lane concat.
                contrib = jnp.dot(ctx, woh_ref[idx],
                                  preferred_element_type=jnp.float32)        # (N, D)
                attn_b = contrib if attn_b is None else attn_b + contrib
            attn_parts.append(attn_b)
        attn = jnp.concatenate(attn_parts, axis=0) + bo_ref[l]               # (T, D)

        # TODO(synk): exact Attention / FeedForward class bodies are not in the
        # provided source; post-norm self-attention LN(MHA(x)+x) and a pre-norm
        # GELU MLP (hidden = D) are assumed, as in the previous version.
        y = _layernorm(attn + x, ln1g_ref[l], ln1b_ref[l])

        z = _layernorm(y, ln2g_ref[l], ln2b_ref[l])
        z = jnp.dot(z, w1_ref[l], preferred_element_type=jnp.float32) + b1_ref[l]
        z = jax.nn.gelu(z)   # TODO(synk): PyTorch nn.GELU defaults to exact erf; tanh approx used here.
        z = jnp.dot(z, w2_ref[l], preferred_element_type=jnp.float32) + b2_ref[l]

        x = z + y            # module.forward: x = FeedForward(x) + x

    # ---- output head, fused (single tiny (T,1) store at the very end) ----
    hh = jnp.dot(x, wo1_ref[...], preferred_element_type=jnp.float32) + bo1_ref[...]
    hh = jnp.maximum(hh, 0.0)
    out_ref[...] = jnp.dot(hh, wo2_ref[...], preferred_element_type=jnp.float32) + bo2_ref[...]


# ----------------------- weight re-layout helpers (host side) ----------------
def _head_split_w(w, num_heads):
    # (D_in, D_out) -> (num_heads, D_in, dh): per-head column block of W.
    d_in, d_out = w.shape
    dh = d_out // num_heads
    return jnp.transpose(w.reshape(d_in, num_heads, dh), (1, 0, 2))


def _head_split_b(b, num_heads):
    # (1, D_out) -> (num_heads, 1, dh)
    d_out = b.shape[-1]
    dh = d_out // num_heads
    return jnp.transpose(b.reshape(1, num_heads, dh), (1, 0, 2))


def _head_split_wo(w, num_heads):
    # (D, D) -> (num_heads, dh, D): per-head row block of Wo.
    d_in, d_out = w.shape
    dh = d_in // num_heads
    return w.reshape(num_heads, dh, d_out)


# --------------------------------- wrapper ------------------------------------
def point_predictor_forward(params, pts, heat, *, num_heads):
    b, n, _ = pts.shape
    t = b * n
    layers = params['layers']
    depth = len(layers)

    # Stack per-layer (and per-head) weights on a leading axis so a single
    # pallas_call DMAs everything once and the kernel indexes statically.
    wqh = jnp.concatenate([_head_split_w(lp['wq'], num_heads) for lp in layers], axis=0)
    bqh = jnp.concatenate([_head_split_b(lp['bq'], num_heads) for lp in layers], axis=0)
    wkh = jnp.concatenate([_head_split_w(lp['wk'], num_heads) for lp in layers], axis=0)
    bkh = jnp.concatenate([_head_split_b(lp['bk'], num_heads) for lp in layers], axis=0)
    wvh = jnp.concatenate([_head_split_w(lp['wv'], num_heads) for lp in layers], axis=0)
    bvh = jnp.concatenate([_head_split_b(lp['bv'], num_heads) for lp in layers], axis=0)
    woh = jnp.concatenate([_head_split_wo(lp['wo'], num_heads) for lp in layers], axis=0)
    bo = jnp.stack([lp['bo'] for lp in layers], axis=0)
    ln1g = jnp.stack([lp['ln1g'] for lp in layers], axis=0)
    ln1b = jnp.stack([lp['ln1b'] for lp in layers], axis=0)
    ln2g = jnp.stack([lp['ln2g'] for lp in layers], axis=0)
    ln2b = jnp.stack([lp['ln2b'] for lp in layers], axis=0)
    w1 = jnp.stack([lp['w1'] for lp in layers], axis=0)
    b1 = jnp.stack([lp['b1'] for lp in layers], axis=0)
    w2 = jnp.stack([lp['w2'] for lp in layers], axis=0)
    b2 = jnp.stack([lp['b2'] for lp in layers], axis=0)

    args = [
        pts.reshape(t, 3).astype(jnp.float32),
        heat.reshape(t, 1).astype(jnp.float32),
        params['point'][0][0], params['point'][0][1],
        params['point'][1][0], params['point'][1][1],
        params['heat'][0][0], params['heat'][0][1],
        params['heat'][1][0], params['heat'][1][1],
        params['input'][0][0], params['input'][0][1],
        params['input'][1][0], params['input'][1][1],
        wqh, bqh, wkh, bkh, wvh, bvh, woh, bo,
        ln1g, ln1b, ln2g, ln2b,
        w1, b1, w2, b2,
        params['out'][0][0], params['out'][0][1],
        params['out'][1][0], params['out'][1][1],
    ]

    kernel = functools.partial(fused_forward_kernel, num_heads=num_heads,
                               depth=depth, batch=b, seq=n)
    p = pl.pallas_call(
        kernel,
        out_shape=jax.ShapeDtypeStruct((t, 1), jnp.float32),
        in_specs=[_full_spec(a.shape) for a in args],
        out_specs=_full_spec((t, 1)),
    )(*args)
    return p.reshape(b, n, 1)


# ---------------------- deterministic parameter init -------------------------
def init_params(key, *, input_embedding_dim, heat_embedding_dim,
                point_embedding_dim, depth):
    d, h, p = input_embedding_dim, heat_embedding_dim, point_embedding_dim
    keys = iter(jax.random.split(key, 64))

    def lin(fin, fout):
        w = jax.random.normal(next(keys), (fin, fout), jnp.float32) * 0.05
        b = jnp.zeros((1, fout), jnp.float32)
        return w, b

    params = {
        'point': [lin(3, p // 2), lin(p // 2, p)],
        'heat': [lin(1, h // 2), lin(h // 2, h)],
        'input': [lin(h + p, d // 2), lin(d // 2, d)],
        'layers': [],
        'out': [lin(d, d // 2), lin(d // 2, 1)],
    }
    for _ in range(depth):
        wq, bq = lin(d, d)
        wk, bk = lin(d, d)
        wv, bv = lin(d, d)
        wo, bo = lin(d, d)
        w1, b1 = lin(d, d)
        w2, b2 = lin(d, d)
        params['layers'].append(dict(
            wq=wq, bq=bq, wk=wk, bk=bk, wv=wv, bv=bv, wo=wo, bo=bo,
            ln1g=jnp.ones((1, d), jnp.float32), ln1b=jnp.zeros((1, d), jnp.float32),
            ln2g=jnp.ones((1, d), jnp.float32), ln2b=jnp.zeros((1, d), jnp.float32),
            w1=w1, b1=b1, w2=w2, b2=b2))
    return params


if __name__ == "__main__":
    B, N = 2, 8                               # batch, number of points
    D, H, P = 32, 16, 16                      # input / heat / point embedding dims
    HEADS, DEPTH = 4, 2

    key = jax.random.PRNGKey(0)
    k_pts, k_heat, k_params = jax.random.split(key, 3)
    pts = jax.random.normal(k_pts, (B, N, 3), jnp.float32)
    heat = jax.random.normal(k_heat, (B, N), jnp.float32)   # reshaped to (B,N,1) inside

    params = init_params(k_params, input_embedding_dim=D, heat_embedding_dim=H,
                         point_embedding_dim=P, depth=DEPTH)

    out = point_predictor_forward(params, pts, heat, num_heads=HEADS)
    out = jax.block_until_ready(out)
    assert out.shape == (B, N, 1), out.shape
    assert out.dtype == jnp.float32
    print("KERNEL_OK")
</pallas_src>

<mosaic_0001>
module attributes {stable_mosaic.version = 11 : i64} {
  func.func @fused_forward_kernel(%arg0: memref<16x3xf32, #tpu.memory_space<vmem>>, %arg1: memref<16x1xf32, #tpu.memory_space<vmem>>, %arg2: memref<3x8xf32, #tpu.memory_space<vmem>>, %arg3: memref<1x8xf32, #tpu.memory_space<vmem>>, %arg4: memref<8x16xf32, #tpu.memory_space<vmem>>, %arg5: memref<1x16xf32, #tpu.memory_space<vmem>>, %arg6: memref<1x8xf32, #tpu.memory_space<vmem>>, %arg7: memref<1x8xf32, #tpu.memory_space<vmem>>, %arg8: memref<8x16xf32, #tpu.memory_space<vmem>>, %arg9: memref<1x16xf32, #tpu.memory_space<vmem>>, %arg10: memref<32x16xf32, #tpu.memory_space<vmem>>, %arg11: memref<1x16xf32, #tpu.memory_space<vmem>>, %arg12: memref<16x32xf32, #tpu.memory_space<vmem>>, %arg13: memref<1x32xf32, #tpu.memory_space<vmem>>, %arg14: memref<8x32x8xf32, #tpu.memory_space<vmem>>, %arg15: memref<8x1x8xf32, #tpu.memory_space<vmem>>, %arg16: memref<8x32x8xf32, #tpu.memory_space<vmem>>, %arg17: memref<8x1x8xf32, #tpu.memory_space<vmem>>, %arg18: memref<8x32x8xf32, #tpu.memory_space<vmem>>, %arg19: memref<8x1x8xf32, #tpu.memory_space<vmem>>, %arg20: memref<8x8x32xf32, #tpu.memory_space<vmem>>, %arg21: memref<2x1x32xf32, #tpu.memory_space<vmem>>, %arg22: memref<2x1x32xf32, #tpu.memory_space<vmem>>, %arg23: memref<2x1x32xf32, #tpu.memory_space<vmem>>, %arg24: memref<2x1x32xf32, #tpu.memory_space<vmem>>, %arg25: memref<2x1x32xf32, #tpu.memory_space<vmem>>, %arg26: memref<2x32x32xf32, #tpu.memory_space<vmem>>, %arg27: memref<2x1x32xf32, #tpu.memory_space<vmem>>, %arg28: memref<2x32x32xf32, #tpu.memory_space<vmem>>, %arg29: memref<2x1x32xf32, #tpu.memory_space<vmem>>, %arg30: memref<32x16xf32, #tpu.memory_space<vmem>>, %arg31: memref<1x16xf32, #tpu.memory_space<vmem>>, %arg32: memref<16x1xf32, #tpu.memory_space<vmem>>, %arg33: memref<1x1xf32, #tpu.memory_space<vmem>>, %arg34: memref<16x1xf32, #tpu.memory_space<vmem>>) attributes {dimension_semantics = [], scalar_prefetch = 0 : i64, scratch_operands = 0 : i64, tpu.core_type = #tpu.core_type<tc>} {
    %c0 = arith.constant 0 : index
    %c0_0 = arith.constant 0 : index
    %0 = vector.load %arg0[%c0, %c0_0] : memref<16x3xf32, #tpu.memory_space<vmem>>, vector<16x3xf32>
    %c0_1 = arith.constant 0 : index
    %c0_2 = arith.constant 0 : index
    %1 = vector.load %arg1[%c0_1, %c0_2] : memref<16x1xf32, #tpu.memory_space<vmem>>, vector<16x1xf32>
    %c0_3 = arith.constant 0 : index
    %c0_4 = arith.constant 0 : index
    %2 = vector.load %arg2[%c0_3, %c0_4] : memref<3x8xf32, #tpu.memory_space<vmem>>, vector<3x8xf32>
    %3 = vector.extract_strided_slice %0 {offsets = [0, 0], sizes = [16, 1], strides = [1, 1]} : vector<16x3xf32> to vector<16x1xf32>
    %4 = vector.extract_strided_slice %2 {offsets = [0, 0], sizes = [1, 8], strides = [1, 1]} : vector<3x8xf32> to vector<1x8xf32>
    %5 = vector.broadcast %3 : vector<16x1xf32> to vector<16x8xf32>
    %6 = vector.broadcast %4 : vector<1x8xf32> to vector<16x8xf32>
    %7 = arith.mulf %5, %6 : vector<16x8xf32>
    %8 = vector.extract_strided_slice %0 {offsets = [0, 1], sizes = [16, 1], strides = [1, 1]} : vector<16x3xf32> to vector<16x1xf32>
    %9 = vector.extract_strided_slice %2 {offsets = [1, 0], sizes = [1, 8], strides = [1, 1]} : vector<3x8xf32> to vector<1x8xf32>
    %10 = vector.broadcast %8 : vector<16x1xf32> to vector<16x8xf32>
    %11 = vector.broadcast %9 : vector<1x8xf32> to vector<16x8xf32>
    %12 = arith.mulf %10, %11 : vector<16x8xf32>
    %13 = arith.addf %7, %12 : vector<16x8xf32>
    %14 = vector.extract_strided_slice %0 {offsets = [0, 2], sizes = [16, 1], strides = [1, 1]} : vector<16x3xf32> to vector<16x1xf32>
    %15 = vector.extract_strided_slice %2 {offsets = [2, 0], sizes = [1, 8], strides = [1, 1]} : vector<3x8xf32> to vector<1x8xf32>
    %16 = vector.broadcast %14 : vector<16x1xf32> to vector<16x8xf32>
    %17 = vector.broadcast %15 : vector<1x8xf32> to vector<16x8xf32>
    %18 = arith.mulf %16, %17 : vector<16x8xf32>
    %19 = arith.addf %13, %18 : vector<16x8xf32>
    %c0_5 = arith.constant 0 : index
    %c0_6 = arith.constant 0 : index
    %20 = vector.load %arg3[%c0_5, %c0_6] : memref<1x8xf32, #tpu.memory_space<vmem>>, vector<1x8xf32>
    %21 = vector.broadcast %20 : vector<1x8xf32> to vector<16x8xf32>
    %22 = arith.addf %19, %21 : vector<16x8xf32>
    %cst = arith.constant 0.000000e+00 : f32
    %23 = vector.broadcast %cst : f32 to vector<16x8xf32>
    %24 = arith.maximumf %22, %23 : vector<16x8xf32>
    %c0_7 = arith.constant 0 : index
    %c0_8 = arith.constant 0 : index
    %25 = vector.load %arg4[%c0_7, %c0_8] : memref<8x16xf32, #tpu.memory_space<vmem>>, vector<8x16xf32>
    %cst_9 = arith.constant dense<0.000000e+00> : vector<16x16xf32>
    %26 = tpu.matmul %24, %25, %cst_9 {dimension_numbers = #tpu.dot_dimension_numbers<[1], [0], [0], [1], [0, 0, 1, 1], [], []>} : vector<16x8xf32>, vector<8x16xf32>, vector<16x16xf32> -> vector<16x16xf32>
    %c0_10 = arith.constant 0 : index
    %c0_11 = arith.constant 0 : index
    %27 = vector.load %arg5[%c0_10, %c0_11] : memref<1x16xf32, #tpu.memory_space<vmem>>, vector<1x16xf32>
    %28 = vector.broadcast %27 : vector<1x16xf32> to vector<16x16xf32>
    %29 = arith.addf %26, %28 : vector<16x16xf32>
    %cst_12 = arith.constant 0.000000e+00 : f32
    %30 = vector.broadcast %cst_12 : f32 to vector<16x16xf32>
    %31 = arith.maximumf %29, %30 : vector<16x16xf32>
    %c0_13 = arith.constant 0 : index
    %c0_14 = arith.constant 0 : index
    %32 = vector.load %arg6[%c0_13, %c0_14] : memref<1x8xf32, #tpu.memory_space<vmem>>, vector<1x8xf32>
    %33 = vector.broadcast %1 : vector<16x1xf32> to vector<16x8xf32>
    %34 = vector.broadcast %32 : vector<1x8xf32> to vector<16x8xf32>
    %35 = arith.mulf %33, %34 : vector<16x8xf32>
    %c0_15 = arith.constant 0 : index
    %c0_16 = arith.constant 0 : index
    %36 = vector.load %arg7[%c0_15, %c0_16] : memref<1x8xf32, #tpu.memory_space<vmem>>, vector<1x8xf32>
    %37 = vector.broadcast %36 : vector<1x8xf32> to vector<16x8xf32>
    %38 = arith.addf %35, %37 : vector<16x8xf32>
    %cst_17 = arith.constant 0.000000e+00 : f32
    %39 = vector.broadcast %cst_17 : f32 to vector<16x8xf32>
    %40 = arith.maximumf %38, %39 : vector<16x8xf32>
    %c0_18 = arith.constant 0 : index
    %c0_19 = arith.constant 0 : index
    %41 = vector.load %arg8[%c0_18, %c0_19] : memref<8x16xf32, #tpu.memory_space<vmem>>, vector<8x16xf32>
    %cst_20 = arith.constant dense<0.000000e+00> : vector<16x16xf32>
    %42 = tpu.matmul %40, %41, %cst_20 {dimension_numbers = #tpu.dot_dimension_numbers<[1], [0], [0], [1], [0, 0, 1, 1], [], []>} : vector<16x8xf32>, vector<8x16xf32>, vector<16x16xf32> -> vector<16x16xf32>
    %c0_21 = arith.constant 0 : index
    %c0_22 = arith.constant 0 : index
    %43 = vector.load %arg9[%c0_21, %c0_22] : memref<1x16xf32, #tpu.memory_space<vmem>>, vector<1x16xf32>
    %44 = vector.broadcast %43 : vector<1x16xf32> to vector<16x16xf32>
    %45 = arith.addf %42, %44 : vector<16x16xf32>
    %cst_23 = arith.constant 0.000000e+00 : f32
    %46 = vector.broadcast %cst_23 : f32 to vector<16x16xf32>
    %47 = arith.maximumf %45, %46 : vector<16x16xf32>
    %48 = tpu.concatenate %31, %47 in 1 : vector<16x16xf32>, vector<16x16xf32> -> vector<16x32xf32>
    %c0_24 = arith.constant 0 : index
    %c0_25 = arith.constant 0 : index
    %49 = vector.load %arg10[%c0_24, %c0_25] : memref<32x16xf32, #tpu.memory_space<vmem>>, vector<32x16xf32>
    %cst_26 = arith.constant dense<0.000000e+00> : vector<16x16xf32>
    %50 = tpu.matmul %48, %49, %cst_26 {dimension_numbers = #tpu.dot_dimension_numbers<[1], [0], [0], [1], [0, 0, 1, 1], [], []>} : vector<16x32xf32>, vector<32x16xf32>, vector<16x16xf32> -> vector<16x16xf32>
    %c0_27 = arith.constant 0 : index
    %c0_28 = arith.constant 0 : index
    %51 = vector.load %arg11[%c0_27, %c0_28] : memref<1x16xf32, #tpu.memory_space<vmem>>, vector<1x16xf32>
    %52 = vector.broadcast %51 : vector<1x16xf32> to vector<16x16xf32>
    %53 = arith.addf %50, %52 : vector<16x16xf32>
    %cst_29 = arith.constant 0.000000e+00 : f32
    %54 = vector.broadcast %cst_29 : f32 to vector<16x16xf32>
    %55 = arith.maximumf %53, %54 : vector<16x16xf32>
    %c0_30 = arith.constant 0 : index
    %c0_31 = arith.constant 0 : index
    %56 = vector.load %arg12[%c0_30, %c0_31] : memref<16x32xf32, #tpu.memory_space<vmem>>, vector<16x32xf32>
    %cst_32 = arith.constant dense<0.000000e+00> : vector<16x32xf32>
    %57 = tpu.matmul %55, %56, %cst_32 {dimension_numbers = #tpu.dot_dimension_numbers<[1], [0], [0], [1], [0, 0, 1, 1], [], []>} : vector<16x16xf32>, vector<16x32xf32>, vector<16x32xf32> -> vector<16x32xf32>
    %c0_33 = arith.constant 0 : index
    %c0_34 = arith.constant 0 : index
    %58 = vector.load %arg13[%c0_33, %c0_34] : memref<1x32xf32, #tpu.memory_space<vmem>>, vector<1x32xf32>
    %59 = vector.broadcast %58 : vector<1x32xf32> to vector<16x32xf32>
    %60 = arith.addf %57, %59 : vector<16x32xf32>
    %cst_35 = arith.constant 0.000000e+00 : f32
    %61 = vector.broadcast %cst_35 : f32 to vector<16x32xf32>
    %62 = arith.maximumf %60, %61 : vector<16x32xf32>
    %c0_36 = arith.constant 0 : index
    %c0_37 = arith.constant 0 : index
    %c0_38 = arith.constant 0 : index
    %63 = vector.load %arg14[%c0_36, %c0_37, %c0_38] : memref<8x32x8xf32, #tpu.memory_space<vmem>>, vector<1x32x8xf32>
    %64 = vector.shape_cast %63 : vector<1x32x8xf32> to vector<32x8xf32>
    %cst_39 = arith.constant dense<0.000000e+00> : vector<16x8xf32>
    %65 = tpu.matmul %62, %64, %cst_39 {dimension_numbers = #tpu.dot_dimension_numbers<[1], [0], [0], [1], [0, 0, 1, 1], [], []>} : vector<16x32xf32>, vector<32x8xf32>, vector<16x8xf32> -> vector<16x8xf32>
    %c0_40 = arith.constant 0 : index
    %c0_41 = arith.constant 0 : index
    %c0_42 = arith.constant 0 : index
    %66 = vector.load %arg15[%c0_40, %c0_41, %c0_42] : memref<8x1x8xf32, #tpu.memory_space<vmem>>, vector<1x1x8xf32>
    %67 = vector.shape_cast %66 : vector<1x1x8xf32> to vector<1x8xf32>
    %68 = vector.broadcast %67 : vector<1x8xf32> to vector<16x8xf32>
    %69 = arith.addf %65, %68 : vector<16x8xf32>
    %c0_43 = arith.constant 0 : index
    %c0_44 = arith.constant 0 : index
    %c0_45 = arith.constant 0 : index
    %70 = vector.load %arg16[%c0_43, %c0_44, %c0_45] : memref<8x32x8xf32, #tpu.memory_space<vmem>>, vector<1x32x8xf32>
    %71 = vector.shape_cast %70 : vector<1x32x8xf32> to vector<32x8xf32>
    %cst_46 = arith.constant dense<0.000000e+00> : vector<16x8xf32>
    %72 = tpu.matmul %62, %71, %cst_46 {dimension_numbers = #tpu.dot_dimension_numbers<[1], [0], [0], [1], [0, 0, 1, 1], [], []>} : vector<16x32xf32>, vector<32x8xf32>, vector<16x8xf32> -> vector<16x8xf32>
    %c0_47 = arith.constant 0 : index
    %c0_48 = arith.constant 0 : index
    %c0_49 = arith.constant 0 : index
    %73 = vector.load %arg17[%c0_47, %c0_48, %c0_49] : memref<8x1x8xf32, #tpu.memory_space<vmem>>, vector<1x1x8xf32>
    %74 = vector.shape_cast %73 : vector<1x1x8xf32> to vector<1x8xf32>
    %75 = vector.broadcast %74 : vector<1x8xf32> to vector<16x8xf32>
    %76 = arith.addf %72, %75 : vector<16x8xf32>
    %c0_50 = arith.constant 0 : index
    %c0_51 = arith.constant 0 : index
    %c0_52 = arith.constant 0 : index
    %77 = vector.load %arg18[%c0_50, %c0_51, %c0_52] : memref<8x32x8xf32, #tpu.memory_space<vmem>>, vector<1x32x8xf32>
    %78 = vector.shape_cast %77 : vector<1x32x8xf32> to vector<32x8xf32>
    %cst_53 = arith.constant dense<0.000000e+00> : vector<16x8xf32>
    %79 = tpu.matmul %62, %78, %cst_53 {dimension_numbers = #tpu.dot_dimension_numbers<[1], [0], [0], [1], [0, 0, 1, 1], [], []>} : vector<16x32xf32>, vector<32x8xf32>, vector<16x8xf32> -> vector<16x8xf32>
    %c0_54 = arith.constant 0 : index
    %c0_55 = arith.constant 0 : index
    %c0_56 = arith.constant 0 : index
    %80 = vector.load %arg19[%c0_54, %c0_55, %c0_56] : memref<8x1x8xf32, #tpu.memory_space<vmem>>, vector<1x1x8xf32>
    %81 = vector.shape_cast %80 : vector<1x1x8xf32> to vector<1x8xf32>
    %82 = vector.broadcast %81 : vector<1x8xf32> to vector<16x8xf32>
    %83 = arith.addf %79, %82 : vector<16x8xf32>
    %c1 = arith.constant 1 : index
    %c0_57 = arith.constant 0 : index
    %c0_58 = arith.constant 0 : index
    %84 = vector.load %arg14[%c1, %c0_57, %c0_58] : memref<8x32x8xf32, #tpu.memory_space<vmem>>, vector<1x32x8xf32>
    %85 = vector.shape_cast %84 : vector<1x32x8xf32> to vector<32x8xf32>
    %cst_59 = arith.constant dense<0.000000e+00> : vector<16x8xf32>
    %86 = tpu.matmul %62, %85, %cst_59 {dimension_numbers = #tpu.dot_dimension_numbers<[1], [0], [0], [1], [0, 0, 1, 1], [], []>} : vector<16x32xf32>, vector<32x8xf32>, vector<16x8xf32> -> vector<16x8xf32>
    %c1_60 = arith.constant 1 : index
    %c0_61 = arith.constant 0 : index
    %c0_62 = arith.constant 0 : index
    %87 = vector.load %arg15[%c1_60, %c0_61, %c0_62] : memref<8x1x8xf32, #tpu.memory_space<vmem>>, vector<1x1x8xf32>
    %88 = vector.shape_cast %87 : vector<1x1x8xf32> to vector<1x8xf32>
    %89 = vector.broadcast %88 : vector<1x8xf32> to vector<16x8xf32>
    %90 = arith.addf %86, %89 : vector<16x8xf32>
    %c1_63 = arith.constant 1 : index
    %c0_64 = arith.constant 0 : index
    %c0_65 = arith.constant 0 : index
    %91 = vector.load %arg16[%c1_63, %c0_64, %c0_65] : memref<8x32x8xf32, #tpu.memory_space<vmem>>, vector<1x32x8xf32>
    %92 = vector.shape_cast %91 : vector<1x32x8xf32> to vector<32x8xf32>
    %cst_66 = arith.constant dense<0.000000e+00> : vector<16x8xf32>
    %93 = tpu.matmul %62, %92, %cst_66 {dimension_numbers = #tpu.dot_dimension_numbers<[1], [0], [0], [1], [0, 0, 1, 1], [], []>} : vector<16x32xf32>, vector<32x8xf32>, vector<16x8xf32> -> vector<16x8xf32>
    %c1_67 = arith.constant 1 : index
    %c0_68 = arith.constant 0 : index
    %c0_69 = arith.constant 0 : index
    %94 = vector.load %arg17[%c1_67, %c0_68, %c0_69] : memref<8x1x8xf32, #tpu.memory_space<vmem>>, vector<1x1x8xf32>
    %95 = vector.shape_cast %94 : vector<1x1x8xf32> to vector<1x8xf32>
    %96 = vector.broadcast %95 : vector<1x8xf32> to vector<16x8xf32>
    %97 = arith.addf %93, %96 : vector<16x8xf32>
    %c1_70 = arith.constant 1 : index
    %c0_71 = arith.constant 0 : index
    %c0_72 = arith.constant 0 : index
    %98 = vector.load %arg18[%c1_70, %c0_71, %c0_72] : memref<8x32x8xf32, #tpu.memory_space<vmem>>, vector<1x32x8xf32>
    %99 = vector.shape_cast %98 : vector<1x32x8xf32> to vector<32x8xf32>
    %cst_73 = arith.constant dense<0.000000e+00> : vector<16x8xf32>
    %100 = tpu.matmul %62, %99, %cst_73 {dimension_numbers = #tpu.dot_dimension_numbers<[1], [0], [0], [1], [0, 0, 1, 1], [], []>} : vector<16x32xf32>, vector<32x8xf32>, vector<16x8xf32> -> vector<16x8xf32>
    %c1_74 = arith.constant 1 : index
    %c0_75 = arith.constant 0 : index
    %c0_76 = arith.constant 0 : index
    %101 = vector.load %arg19[%c1_74, %c0_75, %c0_76] : memref<8x1x8xf32, #tpu.memory_space<vmem>>, vector<1x1x8xf32>
    %102 = vector.shape_cast %101 : vector<1x1x8xf32> to vector<1x8xf32>
    %103 = vector.broadcast %102 : vector<1x8xf32> to vector<16x8xf32>
    %104 = arith.addf %100, %103 : vector<16x8xf32>
    %c2 = arith.constant 2 : index
    %c0_77 = arith.constant 0 : index
    %c0_78 = arith.constant 0 : index
    %105 = vector.load %arg14[%c2, %c0_77, %c0_78] : memref<8x32x8xf32, #tpu.memory_space<vmem>>, vector<1x32x8xf32>
    %106 = vector.shape_cast %105 : vector<1x32x8xf32> to vector<32x8xf32>
    %cst_79 = arith.constant dense<0.000000e+00> : vector<16x8xf32>
    %107 = tpu.matmul %62, %106, %cst_79 {dimension_numbers = #tpu.dot_dimension_numbers<[1], [0], [0], [1], [0, 0, 1, 1], [], []>} : vector<16x32xf32>, vector<32x8xf32>, vector<16x8xf32> -> vector<16x8xf32>
    %c2_80 = arith.constant 2 : index
    %c0_81 = arith.constant 0 : index
    %c0_82 = arith.constant 0 : index
    %108 = vector.load %arg15[%c2_80, %c0_81, %c0_82] : memref<8x1x8xf32, #tpu.memory_space<vmem>>, vector<1x1x8xf32>
    %109 = vector.shape_cast %108 : vector<1x1x8xf32> to vector<1x8xf32>
    %110 = vector.broadcast %109 : vector<1x8xf32> to vector<16x8xf32>
    %111 = arith.addf %107, %110 : vector<16x8xf32>
    %c2_83 = arith.constant 2 : index
    %c0_84 = arith.constant 0 : index
    %c0_85 = arith.constant 0 : index
    %112 = vector.load %arg16[%c2_83, %c0_84, %c0_85] : memref<8x32x8xf32, #tpu.memory_space<vmem>>, vector<1x32x8xf32>
    %113 = vector.shape_cast %112 : vector<1x32x8xf32> to vector<32x8xf32>
    %cst_86 = arith.constant dense<0.000000e+00> : vector<16x8xf32>
    %114 = tpu.matmul %62, %113, %cst_86 {dimension_numbers = #tpu.dot_dimension_numbers<[1], [0], [0], [1], [0, 0, 1, 1], [], []>} : vector<16x32xf32>, vector<32x8xf32>, vector<16x8xf32> -> vector<16x8xf32>
    %c2_87 = arith.constant 2 : index
    %c0_88 = arith.constant 0 : index
    %c0_89 = arith.constant 0 : index
    %115 = vector.load %arg17[%c2_87, %c0_88, %c0_89] : memref<8x1x8xf32, #tpu.memory_space<vmem>>, vector<1x1x8xf32>
    %116 = vector.shape_cast %115 : vector<1x1x8xf32> to vector<1x8xf32>
    %117 = vector.broadcast %116 : vector<1x8xf32> to vector<16x8xf32>
    %118 = arith.addf %114, %117 : vector<16x8xf32>
    %c2_90 = arith.constant 2 : index
    %c0_91 = arith.constant 0 : index
    %c0_92 = arith.constant 0 : index
    %119 = vector.load %arg18[%c2_90, %c0_91, %c0_92] : memref<8x32x8xf32, #tpu.memory_space<vmem>>, vector<1x32x8xf32>
    %120 = vector.shape_cast %119 : vector<1x32x8xf32> to vector<32x8xf32>
    %cst_93 = arith.constant dense<0.000000e+00> : vector<16x8xf32>
    %121 = tpu.matmul %62, %120, %cst_93 {dimension_numbers = #tpu.dot_dimension_numbers<[1], [0], [0], [1], [0, 0, 1, 1], [], []>} : vector<16x32xf32>, vector<32x8xf32>, vector<16x8xf32> -> vector<16x8xf32>
    %c2_94 = arith.constant 2 : index
    %c0_95 = arith.constant 0 : index
    %c0_96 = arith.constant 0 : index
    %122 = vector.load %arg19[%c2_94, %c0_95, %c0_96] : memref<8x1x8xf32, #tpu.memory_space<vmem>>, vector<1x1x8xf32>
    %123 = vector.shape_cast %122 : vector<1x1x8xf32> to vector<1x8xf32>
    %124 = vector.broadcast %123 : vector<1x8xf32> to vector<16x8xf32>
    %125 = arith.addf %121, %124 : vector<16x8xf32>
    %c3 = arith.constant 3 : index
    %c0_97 = arith.constant 0 : index
    %c0_98 = arith.constant 0 : index
    %126 = vector.load %arg14[%c3, %c0_97, %c0_98] : memref<8x32x8xf32, #tpu.memory_space<vmem>>, vector<1x32x8xf32>
    %127 = vector.shape_cast %126 : vector<1x32x8xf32> to vector<32x8xf32>
    %cst_99 = arith.constant dense<0.000000e+00> : vector<16x8xf32>
    %128 = tpu.matmul %62, %127, %cst_99 {dimension_numbers = #tpu.dot_dimension_numbers<[1], [0], [0], [1], [0, 0, 1, 1], [], []>} : vector<16x32xf32>, vector<32x8xf32>, vector<16x8xf32> -> vector<16x8xf32>
    %c3_100 = arith.constant 3 : index
    %c0_101 = arith.constant 0 : index
    %c0_102 = arith.constant 0 : index
    %129 = vector.load %arg15[%c3_100, %c0_101, %c0_102] : memref<8x1x8xf32, #tpu.memory_space<vmem>>, vector<1x1x8xf32>
    %130 = vector.shape_cast %129 : vector<1x1x8xf32> to vector<1x8xf32>
    %131 = vector.broadcast %130 : vector<1x8xf32> to vector<16x8xf32>
    %132 = arith.addf %128, %131 : vector<16x8xf32>
    %c3_103 = arith.constant 3 : index
    %c0_104 = arith.constant 0 : index
    %c0_105 = arith.constant 0 : index
    %133 = vector.load %arg16[%c3_103, %c0_104, %c0_105] : memref<8x32x8xf32, #tpu.memory_space<vmem>>, vector<1x32x8xf32>
    %134 = vector.shape_cast %133 : vector<1x32x8xf32> to vector<32x8xf32>
    %cst_106 = arith.constant dense<0.000000e+00> : vector<16x8xf32>
    %135 = tpu.matmul %62, %134, %cst_106 {dimension_numbers = #tpu.dot_dimension_numbers<[1], [0], [0], [1], [0, 0, 1, 1], [], []>} : vector<16x32xf32>, vector<32x8xf32>, vector<16x8xf32> -> vector<16x8xf32>
    %c3_107 = arith.constant 3 : index
    %c0_108 = arith.constant 0 : index
    %c0_109 = arith.constant 0 : index
    %136 = vector.load %arg17[%c3_107, %c0_108, %c0_109] : memref<8x1x8xf32, #tpu.memory_space<vmem>>, vector<1x1x8xf32>
    %137 = vector.shape_cast %136 : vector<1x1x8xf32> to vector<1x8xf32>
    %138 = vector.broadcast %137 : vector<1x8xf32> to vector<16x8xf32>
    %139 = arith.addf %135, %138 : vector<16x8xf32>
    %c3_110 = arith.constant 3 : index
    %c0_111 = arith.constant 0 : index
    %c0_112 = arith.constant 0 : index
    %140 = vector.load %arg18[%c3_110, %c0_111, %c0_112] : memref<8x32x8xf32, #tpu.memory_space<vmem>>, vector<1x32x8xf32>
    %141 = vector.shape_cast %140 : vector<1x32x8xf32> to vector<32x8xf32>
    %cst_113 = arith.constant dense<0.000000e+00> : vector<16x8xf32>
    %142 = tpu.matmul %62, %141, %cst_113 {dimension_numbers = #tpu.dot_dimension_numbers<[1], [0], [0], [1], [0, 0, 1, 1], [], []>} : vector<16x32xf32>, vector<32x8xf32>, vector<16x8xf32> -> vector<16x8xf32>
    %c3_114 = arith.constant 3 : index
    %c0_115 = arith.constant 0 : index
    %c0_116 = arith.constant 0 : index
    %143 = vector.load %arg19[%c3_114, %c0_115, %c0_116] : memref<8x1x8xf32, #tpu.memory_space<vmem>>, vector<1x1x8xf32>
    %144 = vector.shape_cast %143 : vector<1x1x8xf32> to vector<1x8xf32>
    %145 = vector.broadcast %144 : vector<1x8xf32> to vector<16x8xf32>
    %146 = arith.addf %142, %145 : vector<16x8xf32>
    %147 = vector.extract_strided_slice %69 {offsets = [0, 0], sizes = [8, 8], strides = [1, 1]} : vector<16x8xf32> to vector<8x8xf32>
    %148 = vector.extract_strided_slice %76 {offsets = [0, 0], sizes = [8, 8], strides = [1, 1]} : vector<16x8xf32> to vector<8x8xf32>
    %149 = vector.extract_strided_slice %83 {offsets = [0, 0], sizes = [8, 8], strides = [1, 1]} : vector<16x8xf32> to vector<8x8xf32>
    %cst_117 = arith.constant dense<0.000000e+00> : vector<8x8xf32>
    %150 = tpu.matmul %147, %148, %cst_117 {dimension_numbers = #tpu.dot_dimension_numbers<[1], [1], [0], [0], [0, 0, 1, 0], [], []>} : vector<8x8xf32>, vector<8x8xf32>, vector<8x8xf32> -> vector<8x8xf32>
    %cst_118 = arith.constant 0.353553385 : f32
    %151 = vector.broadcast %cst_118 : f32 to vector<8x8xf32>
    %152 = arith.mulf %150, %151 : vector<8x8xf32>
    %cst_119 = arith.constant dense<0xFF800000> : vector<8xf32>
    %153 = vector.multi_reduction <maximumf>, %152, %cst_119 [1] : vector<8x8xf32> to vector<8xf32>
    %154 = vector.shape_cast %153 : vector<8xf32> to vector<8x1xf32>
    %155 = vector.broadcast %154 : vector<8x1xf32> to vector<8x8xf32>
    %156 = arith.subf %152, %155 : vector<8x8xf32>
    %157 = math.exp %156 : vector<8x8xf32>
    %cst_120 = arith.constant dense<0.000000e+00> : vector<8xf32>
    %158 = vector.multi_reduction <add>, %157, %cst_120 [1] : vector<8x8xf32> to vector<8xf32>
    %159 = vector.shape_cast %158 : vector<8xf32> to vector<8x1xf32>
    %160 = tpu.reciprocal %159 {approx = true} : vector<8x1xf32> -> vector<8x1xf32>
    %161 = vector.broadcast %160 : vector<8x1xf32> to vector<8x8xf32>
    %162 = arith.mulf %157, %161 : vector<8x8xf32>
    %cst_121 = arith.constant dense<0.000000e+00> : vector<8x8xf32>
    %163 = tpu.matmul %162, %149, %cst_121 {dimension_numbers = #tpu.dot_dimension_numbers<[1], [0], [0], [1], [0, 0, 1, 1], [], []>} : vector<8x8xf32>, vector<8x8xf32>, vector<8x8xf32> -> vector<8x8xf32>
    %c0_122 = arith.constant 0 : index
    %c0_123 = arith.constant 0 : index
    %c0_124 = arith.constant 0 : index
    %164 = vector.load %arg20[%c0_122, %c0_123, %c0_124] : memref<8x8x32xf32, #tpu.memory_space<vmem>>, vector<1x8x32xf32>
    %165 = vector.shape_cast %164 : vector<1x8x32xf32> to vector<8x32xf32>
    %cst_125 = arith.constant dense<0.000000e+00> : vector<8x32xf32>
    %166 = tpu.matmul %163, %165, %cst_125 {dimension_numbers = #tpu.dot_dimension_numbers<[1], [0], [0], [1], [0, 0, 1, 1], [], []>} : vector<8x8xf32>, vector<8x32xf32>, vector<8x32xf32> -> vector<8x32xf32>
    %167 = vector.extract_strided_slice %90 {offsets = [0, 0], sizes = [8, 8], strides = [1, 1]} : vector<16x8xf32> to vector<8x8xf32>
    %168 = vector.extract_strided_slice %97 {offsets = [0, 0], sizes = [8, 8], strides = [1, 1]} : vector<16x8xf32> to vector<8x8xf32>
    %169 = vector.extract_strided_slice %104 {offsets = [0, 0], sizes = [8, 8], strides = [1, 1]} : vector<16x8xf32> to vector<8x8xf32>
    %cst_126 = arith.constant dense<0.000000e+00> : vector<8x8xf32>
    %170 = tpu.matmul %167, %168, %cst_126 {dimension_numbers = #tpu.dot_dimension_numbers<[1], [1], [0], [0], [0, 0, 1, 0], [], []>} : vector<8x8xf32>, vector<8x8xf32>, vector<8x8xf32> -> vector<8x8xf32>
    %cst_127 = arith.constant 0.353553385 : f32
    %171 = vector.broadcast %cst_127 : f32 to vector<8x8xf32>
    %172 = arith.mulf %170, %171 : vector<8x8xf32>
    %cst_128 = arith.constant dense<0xFF800000> : vector<8xf32>
    %173 = vector.multi_reduction <maximumf>, %172, %cst_128 [1] : vector<8x8xf32> to vector<8xf32>
    %174 = vector.shape_cast %173 : vector<8xf32> to vector<8x1xf32>
    %175 = vector.broadcast %174 : vector<8x1xf32> to vector<8x8xf32>
    %176 = arith.subf %172, %175 : vector<8x8xf32>
    %177 = math.exp %176 : vector<8x8xf32>
    %cst_129 = arith.constant dense<0.000000e+00> : vector<8xf32>
    %178 = vector.multi_reduction <add>, %177, %cst_129 [1] : vector<8x8xf32> to vector<8xf32>
    %179 = vector.shape_cast %178 : vector<8xf32> to vector<8x1xf32>
    %180 = tpu.reciprocal %179 {approx = true} : vector<8x1xf32> -> vector<8x1xf32>
    %181 = vector.broadcast %180 : vector<8x1xf32> to vector<8x8xf32>
    %182 = arith.mulf %177, %181 : vector<8x8xf32>
    %cst_130 = arith.constant dense<0.000000e+00> : vector<8x8xf32>
    %183 = tpu.matmul %182, %169, %cst_130 {dimension_numbers = #tpu.dot_dimension_numbers<[1], [0], [0], [1], [0, 0, 1, 1], [], []>} : vector<8x8xf32>, vector<8x8xf32>, vector<8x8xf32> -> vector<8x8xf32>
    %c1_131 = arith.constant 1 : index
    %c0_132 = arith.constant 0 : index
    %c0_133 = arith.constant 0 : index
    %184 = vector.load %arg20[%c1_131, %c0_132, %c0_133] : memref<8x8x32xf32, #tpu.memory_space<vmem>>, vector<1x8x32xf32>
    %185 = vector.shape_cast %184 : vector<1x8x32xf32> to vector<8x32xf32>
    %cst_134 = arith.constant dense<0.000000e+00> : vector<8x32xf32>
    %186 = tpu.matmul %183, %185, %cst_134 {dimension_numbers = #tpu.dot_dimension_numbers<[1], [0], [0], [1], [0, 0, 1, 1], [], []>} : vector<8x8xf32>, vector<8x32xf32>, vector<8x32xf32> -> vector<8x32xf32>
    %187 = arith.addf %166, %186 : vector<8x32xf32>
    %188 = vector.extract_strided_slice %111 {offsets = [0, 0], sizes = [8, 8], strides = [1, 1]} : vector<16x8xf32> to vector<8x8xf32>
    %189 = vector.extract_strided_slice %118 {offsets = [0, 0], sizes = [8, 8], strides = [1, 1]} : vector<16x8xf32> to vector<8x8xf32>
    %190 = vector.extract_strided_slice %125 {offsets = [0, 0], sizes = [8, 8], strides = [1, 1]} : vector<16x8xf32> to vector<8x8xf32>
    %cst_135 = arith.constant dense<0.000000e+00> : vector<8x8xf32>
    %191 = tpu.matmul %188, %189, %cst_135 {dimension_numbers = #tpu.dot_dimension_numbers<[1], [1], [0], [0], [0, 0, 1, 0], [], []>} : vector<8x8xf32>, vector<8x8xf32>, vector<8x8xf32> -> vector<8x8xf32>
    %cst_136 = arith.constant 0.353553385 : f32
    %192 = vector.broadcast %cst_136 : f32 to vector<8x8xf32>
    %193 = arith.mulf %191, %192 : vector<8x8xf32>
    %cst_137 = arith.constant dense<0xFF800000> : vector<8xf32>
    %194 = vector.multi_reduction <maximumf>, %193, %cst_137 [1] : vector<8x8xf32> to vector<8xf32>
    %195 = vector.shape_cast %194 : vector<8xf32> to vector<8x1xf32>
    %196 = vector.broadcast %195 : vector<8x1xf32> to vector<8x8xf32>
    %197 = arith.subf %193, %196 : vector<8x8xf32>
    %198 = math.exp %197 : vector<8x8xf32>
    %cst_138 = arith.constant dense<0.000000e+00> : vector<8xf32>
    %199 = vector.multi_reduction <add>, %198, %cst_138 [1] : vector<8x8xf32> to vector<8xf32>
    %200 = vector.shape_cast %199 : vector<8xf32> to vector<8x1xf32>
    %201 = tpu.reciprocal %200 {approx = true} : vector<8x1xf32> -> vector<8x1xf32>
    %202 = vector.broadcast %201 : vector<8x1xf32> to vector<8x8xf32>
    %203 = arith.mulf %198, %202 : vector<8x8xf32>
    %cst_139 = arith.constant dense<0.000000e+00> : vector<8x8xf32>
    %204 = tpu.matmul %203, %190, %cst_139 {dimension_numbers = #tpu.dot_dimension_numbers<[1], [0], [0], [1], [0, 0, 1, 1], [], []>} : vector<8x8xf32>, vector<8x8xf32>, vector<8x8xf32> -> vector<8x8xf32>
    %c2_140 = arith.constant 2 : index
    %c0_141 = arith.constant 0 : index
    %c0_142 = arith.constant 0 : index
    %205 = vector.load %arg20[%c2_140, %c0_141, %c0_142] : memref<8x8x32xf32, #tpu.memory_space<vmem>>, vector<1x8x32xf32>
    %206 = vector.shape_cast %205 : vector<1x8x32xf32> to vector<8x32xf32>
    %cst_143 = arith.constant dense<0.000000e+00> : vector<8x32xf32>
    %207 = tpu.matmul %204, %206, %cst_143 {dimension_numbers = #tpu.dot_dimension_numbers<[1], [0], [0], [1], [0, 0, 1, 1], [], []>} : vector<8x8xf32>, vector<8x32xf32>, vector<8x32xf32> -> vector<8x32xf32>
    %208 = arith.addf %187, %207 : vector<8x32xf32>
    %209 = vector.extract_strided_slice %132 {offsets = [0, 0], sizes = [8, 8], strides = [1, 1]} : vector<16x8xf32> to vector<8x8xf32>
    %210 = vector.extract_strided_slice %139 {offsets = [0, 0], sizes = [8, 8], strides = [1, 1]} : vector<16x8xf32> to vector<8x8xf32>
    %211 = vector.extract_strided_slice %146 {offsets = [0, 0], sizes = [8, 8], strides = [1, 1]} : vector<16x8xf32> to vector<8x8xf32>
    %cst_144 = arith.constant dense<0.000000e+00> : vector<8x8xf32>
    %212 = tpu.matmul %209, %210, %cst_144 {dimension_numbers = #tpu.dot_dimension_numbers<[1], [1], [0], [0], [0, 0, 1, 0], [], []>} : vector<8x8xf32>, vector<8x8xf32>, vector<8x8xf32> -> vector<8x8xf32>
    %cst_145 = arith.constant 0.353553385 : f32
    %213 = vector.broadcast %cst_145 : f32 to vector<8x8xf32>
    %214 = arith.mulf %212, %213 : vector<8x8xf32>
    %cst_146 = arith.constant dense<0xFF800000> : vector<8xf32>
    %215 = vector.multi_reduction <maximumf>, %214, %cst_146 [1] : vector<8x8xf32> to vector<8xf32>
    %216 = vector.shape_cast %215 : vector<8xf32> to vector<8x1xf32>
    %217 = vector.broadcast %216 : vector<8x1xf32> to vector<8x8xf32>
    %218 = arith.subf %214, %217 : vector<8x8xf32>
    %219 = math.exp %218 : vector<8x8xf32>
    %cst_147 = arith.constant dense<0.000000e+00> : vector<8xf32>
    %220 = vector.multi_reduction <add>, %219, %cst_147 [1] : vector<8x8xf32> to vector<8xf32>
    %221 = vector.shape_cast %220 : vector<8xf32> to vector<8x1xf32>
    %222 = tpu.reciprocal %221 {approx = true} : vector<8x1xf32> -> vector<8x1xf32>
    %223 = vector.broadcast %222 : vector<8x1xf32> to vector<8x8xf32>
    %224 = arith.mulf %219, %223 : vector<8x8xf32>
    %cst_148 = arith.constant dense<0.000000e+00> : vector<8x8xf32>
    %225 = tpu.matmul %224, %211, %cst_148 {dimension_numbers = #tpu.dot_dimension_numbers<[1], [0], [0], [1], [0, 0, 1, 1], [], []>} : vector<8x8xf32>, vector<8x8xf32>, vector<8x8xf32> -> vector<8x8xf32>
    %c3_149 = arith.constant 3 : index
    %c0_150 = arith.constant 0 : index
    %c0_151 = arith.constant 0 : index
    %226 = vector.load %arg20[%c3_149, %c0_150, %c0_151] : memref<8x8x32xf32, #tpu.memory_space<vmem>>, vector<1x8x32xf32>
    %227 = vector.shape_cast %226 : vector<1x8x32xf32> to vector<8x32xf32>
    %cst_152 = arith.constant dense<0.000000e+00> : vector<8x32xf32>
    %228 = tpu.matmul %225, %227, %cst_152 {dimension_numbers = #tpu.dot_dimension_numbers<[1], [0], [0], [1], [0, 0, 1, 1], [], []>} : vector<8x8xf32>, vector<8x32xf32>, vector<8x32xf32> -> vector<8x32xf32>
    %229 = arith.addf %208, %228 : vector<8x32xf32>
    %230 = vector.extract_strided_slice %69 {offsets = [8, 0], sizes = [8, 8], strides = [1, 1]} : vector<16x8xf32> to vector<8x8xf32>
    %231 = vector.extract_strided_slice %76 {offsets = [8, 0], sizes = [8, 8], strides = [1, 1]} : vector<16x8xf32> to vector<8x8xf32>
    %232 = vector.extract_strided_slice %83 {offsets = [8, 0], sizes = [8, 8], strides = [1, 1]} : vector<16x8xf32> to vector<8x8xf32>
    %cst_153 = arith.constant dense<0.000000e+00> : vector<8x8xf32>
    %233 = tpu.matmul %230, %231, %cst_153 {dimension_numbers = #tpu.dot_dimension_numbers<[1], [1], [0], [0], [0, 0, 1, 0], [], []>} : vector<8x8xf32>, vector<8x8xf32>, vector<8x8xf32> -> vector<8x8xf32>
    %cst_154 = arith.constant 0.353553385 : f32
    %234 = vector.broadcast %cst_154 : f32 to vector<8x8xf32>
    %235 = arith.mulf %233, %234 : vector<8x8xf32>
    %cst_155 = arith.constant dense<0xFF800000> : vector<8xf32>
    %236 = vector.multi_reduction <maximumf>, %235, %cst_155 [1] : vector<8x8xf32> to vector<8xf32>
    %237 = vector.shape_cast %236 : vector<8xf32> to vector<8x1xf32>
    %238 = vector.broadcast %237 : vector<8x1xf32> to vector<8x8xf32>
    %239 = arith.subf %235, %238 : vector<8x8xf32>
    %240 = math.exp %239 : vector<8x8xf32>
    %cst_156 = arith.constant dense<0.000000e+00> : vector<8xf32>
    %241 = vector.multi_reduction <add>, %240, %cst_156 [1] : vector<8x8xf32> to vector<8xf32>
    %242 = vector.shape_cast %241 : vector<8xf32> to vector<8x1xf32>
    %243 = tpu.reciprocal %242 {approx = true} : vector<8x1xf32> -> vector<8x1xf32>
    %244 = vector.broadcast %243 : vector<8x1xf32> to vector<8x8xf32>
    %245 = arith.mulf %240, %244 : vector<8x8xf32>
    %cst_157 = arith.constant dense<0.000000e+00> : vector<8x8xf32>
    %246 = tpu.matmul %245, %232, %cst_157 {dimension_numbers = #tpu.dot_dimension_numbers<[1], [0], [0], [1], [0, 0, 1, 1], [], []>} : vector<8x8xf32>, vector<8x8xf32>, vector<8x8xf32> -> vector<8x8xf32>
    %c0_158 = arith.constant 0 : index
    %c0_159 = arith.constant 0 : index
    %c0_160 = arith.constant 0 : index
    %247 = vector.load %arg20[%c0_158, %c0_159, %c0_160] : memref<8x8x32xf32, #tpu.memory_space<vmem>>, vector<1x8x32xf32>
    %248 = vector.shape_cast %247 : vector<1x8x32xf32> to vector<8x32xf32>
    %cst_161 = arith.constant dense<0.000000e+00> : vector<8x32xf32>
    %249 = tpu.matmul %246, %248, %cst_161 {dimension_numbers = #tpu.dot_dimension_numbers<[1], [0], [0], [1], [0, 0, 1, 1], [], []>} : vector<8x8xf32>, vector<8x32xf32>, vector<8x32xf32> -> vector<8x32xf32>
    %250 = vector.extract_strided_slice %90 {offsets = [8, 0], sizes = [8, 8], strides = [1, 1]} : vector<16x8xf32> to vector<8x8xf32>
    %251 = vector.extract_strided_slice %97 {offsets = [8, 0], sizes = [8, 8], strides = [1, 1]} : vector<16x8xf32> to vector<8x8xf32>
    %252 = vector.extract_strided_slice %104 {offsets = [8, 0], sizes = [8, 8], strides = [1, 1]} : vector<16x8xf32> to vector<8x8xf32>
    %cst_162 = arith.constant dense<0.000000e+00> : vector<8x8xf32>
    %253 = tpu.matmul %250, %251, %cst_162 {dimension_numbers = #tpu.dot_dimension_numbers<[1], [1], [0], [0], [0, 0, 1, 0], [], []>} : vector<8x8xf32>, vector<8x8xf32>, vector<8x8xf32> -> vector<8x8xf32>
    %cst_163 = arith.constant 0.353553385 : f32
    %254 = vector.broadcast %cst_163 : f32 to vector<8x8xf32>
    %255 = arith.mulf %253, %254 : vector<8x8xf32>
    %cst_164 = arith.constant dense<0xFF800000> : vector<8xf32>
    %256 = vector.multi_reduction <maximumf>, %255, %cst_164 [1] : vector<8x8xf32> to vector<8xf32>
    %257 = vector.shape_cast %256 : vector<8xf32> to vector<8x1xf32>
    %258 = vector.broadcast %257 : vector<8x1xf32> to vector<8x8xf32>
    %259 = arith.subf %255, %258 : vector<8x8xf32>
    %260 = math.exp %259 : vector<8x8xf32>
    %cst_165 = arith.constant dense<0.000000e+00> : vector<8xf32>
    %261 = vector.multi_reduction <add>, %260, %cst_165 [1] : vector<8x8xf32> to vector<8xf32>
    %262 = vector.shape_cast %261 : vector<8xf32> to vector<8x1xf32>
    %263 = tpu.reciprocal %262 {approx = true} : vector<8x1xf32> -> vector<8x1xf32>
    %264 = vector.broadcast %263 : vector<8x1xf32> to vector<8x8xf32>
    %265 = arith.mulf %260, %264 : vector<8x8xf32>
    %cst_166 = arith.constant dense<0.000000e+00> : vector<8x8xf32>
    %266 = tpu.matmul %265, %252, %cst_166 {dimension_numbers = #tpu.dot_dimension_numbers<[1], [0], [0], [1], [0, 0, 1, 1], [], []>} : vector<8x8xf32>, vector<8x8xf32>, vector<8x8xf32> -> vector<8x8xf32>
    %c1_167 = arith.constant 1 : index
    %c0_168 = arith.constant 0 : index
    %c0_169 = arith.constant 0 : index
    %267 = vector.load %arg20[%c1_167, %c0_168, %c0_169] : memref<8x8x32xf32, #tpu.memory_space<vmem>>, vector<1x8x32xf32>
    %268 = vector.shape_cast %267 : vector<1x8x32xf32> to vector<8x32xf32>
    %cst_170 = arith.constant dense<0.000000e+00> : vector<8x32xf32>
    %269 = tpu.matmul %266, %268, %cst_170 {dimension_numbers = #tpu.dot_dimension_numbers<[1], [0], [0], [1], [0, 0, 1, 1], [], []>} : vector<8x8xf32>, vector<8x32xf32>, vector<8x32xf32> -> vector<8x32xf32>
    %270 = arith.addf %249, %269 : vector<8x32xf32>
    %271 = vector.extract_strided_slice %111 {offsets = [8, 0], sizes = [8, 8], strides = [1, 1]} : vector<16x8xf32> to vector<8x8xf32>
    %272 = vector.extract_strided_slice %118 {offsets = [8, 0], sizes = [8, 8], strides = [1, 1]} : vector<16x8xf32> to vector<8x8xf32>
    %273 = vector.extract_strided_slice %125 {offsets = [8, 0], sizes = [8, 8], strides = [1, 1]} : vector<16x8xf32> to vector<8x8xf32>
    %cst_171 = arith.constant dense<0.000000e+00> : vector<8x8xf32>
    %274 = tpu.matmul %271, %272, %cst_171 {dimension_numbers = #tpu.dot_dimension_numbers<[1], [1], [0], [0], [0, 0, 1, 0], [], []>} : vector<8x8xf32>, vector<8x8xf32>, vector<8x8xf32> -> vector<8x8xf32>
    %cst_172 = arith.constant 0.353553385 : f32
    %275 = vector.broadcast %cst_172 : f32 to vector<8x8xf32>
    %276 = arith.mulf %274, %275 : vector<8x8xf32>
    %cst_173 = arith.constant dense<0xFF800000> : vector<8xf32>
    %277 = vector.multi_reduction <maximumf>, %276, %cst_173 [1] : vector<8x8xf32> to vector<8xf32>
    %278 = vector.shape_cast %277 : vector<8xf32> to vector<8x1xf32>
    %279 = vector.broadcast %278 : vector<8x1xf32> to vector<8x8xf32>
    %280 = arith.subf %276, %279 : vector<8x8xf32>
    %281 = math.exp %280 : vector<8x8xf32>
    %cst_174 = arith.constant dense<0.000000e+00> : vector<8xf32>
    %282 = vector.multi_reduction <add>, %281, %cst_174 [1] : vector<8x8xf32> to vector<8xf32>
    %283 = vector.shape_cast %282 : vector<8xf32> to vector<8x1xf32>
    %284 = tpu.reciprocal %283 {approx = true} : vector<8x1xf32> -> vector<8x1xf32>
    %285 = vector.broadcast %284 : vector<8x1xf32> to vector<8x8xf32>
    %286 = arith.mulf %281, %285 : vector<8x8xf32>
    %cst_175 = arith.constant dense<0.000000e+00> : vector<8x8xf32>
    %287 = tpu.matmul %286, %273, %cst_175 {dimension_numbers = #tpu.dot_dimension_numbers<[1], [0], [0], [1], [0, 0, 1, 1], [], []>} : vector<8x8xf32>, vector<8x8xf32>, vector<8x8xf32> -> vector<8x8xf32>
    %c2_176 = arith.constant 2 : index
    %c0_177 = arith.constant 0 : index
    %c0_178 = arith.constant 0 : index
    %288 = vector.load %arg20[%c2_176, %c0_177, %c0_178] : memref<8x8x32xf32, #tpu.memory_space<vmem>>, vector<1x8x32xf32>
    %289 = vector.shape_cast %288 : vector<1x8x32xf32> to vector<8x32xf32>
    %cst_179 = arith.constant dense<0.000000e+00> : vector<8x32xf32>
    %290 = tpu.matmul %287, %289, %cst_179 {dimension_numbers = #tpu.dot_dimension_numbers<[1], [0], [0], [1], [0, 0, 1, 1], [], []>} : vector<8x8xf32>, vector<8x32xf32>, vector<8x32xf32> -> vector<8x32xf32>
    %291 = arith.addf %270, %290 : vector<8x32xf32>
    %292 = vector.extract_strided_slice %132 {offsets = [8, 0], sizes = [8, 8], strides = [1, 1]} : vector<16x8xf32> to vector<8x8xf32>
    %293 = vector.extract_strided_slice %139 {offsets = [8, 0], sizes = [8, 8], strides = [1, 1]} : vector<16x8xf32> to vector<8x8xf32>
    %294 = vector.extract_strided_slice %146 {offsets = [8, 0], sizes = [8, 8], strides = [1, 1]} : vector<16x8xf32> to vector<8x8xf32>
    %cst_180 = arith.constant dense<0.000000e+00> : vector<8x8xf32>
    %295 = tpu.matmul %292, %293, %cst_180 {dimension_numbers = #tpu.dot_dimension_numbers<[1], [1], [0], [0], [0, 0, 1, 0], [], []>} : vector<8x8xf32>, vector<8x8xf32>, vector<8x8xf32> -> vector<8x8xf32>
    %cst_181 = arith.constant 0.353553385 : f32
    %296 = vector.broadcast %cst_181 : f32 to vector<8x8xf32>
    %297 = arith.mulf %295, %296 : vector<8x8xf32>
    %cst_182 = arith.constant dense<0xFF800000> : vector<8xf32>
    %298 = vector.multi_reduction <maximumf>, %297, %cst_182 [1] : vector<8x8xf32> to vector<8xf32>
    %299 = vector.shape_cast %298 : vector<8xf32> to vector<8x1xf32>
    %300 = vector.broadcast %299 : vector<8x1xf32> to vector<8x8xf32>
    %301 = arith.subf %297, %300 : vector<8x8xf32>
    %302 = math.exp %301 : vector<8x8xf32>
    %cst_183 = arith.constant dense<0.000000e+00> : vector<8xf32>
    %303 = vector.multi_reduction <add>, %302, %cst_183 [1] : vector<8x8xf32> to vector<8xf32>
    %304 = vector.shape_cast %303 : vector<8xf32> to vector<8x1xf32>
    %305 = tpu.reciprocal %304 {approx = true} : vector<8x1xf32> -> vector<8x1xf32>
    %306 = vector.broadcast %305 : vector<8x1xf32> to vector<8x8xf32>
    %307 = arith.mulf %302, %306 : vector<8x8xf32>
    %cst_184 = arith.constant dense<0.000000e+00> : vector<8x8xf32>
    %308 = tpu.matmul %307, %294, %cst_184 {dimension_numbers = #tpu.dot_dimension_numbers<[1], [0], [0], [1], [0, 0, 1, 1], [], []>} : vector<8x8xf32>, vector<8x8xf32>, vector<8x8xf32> -> vector<8x8xf32>
    %c3_185 = arith.constant 3 : index
    %c0_186 = arith.constant 0 : index
    %c0_187 = arith.constant 0 : index
    %309 = vector.load %arg20[%c3_185, %c0_186, %c0_187] : memref<8x8x32xf32, #tpu.memory_space<vmem>>, vector<1x8x32xf32>
    %310 = vector.shape_cast %309 : vector<1x8x32xf32> to vector<8x32xf32>
    %cst_188 = arith.constant dense<0.000000e+00> : vector<8x32xf32>
    %311 = tpu.matmul %308, %310, %cst_188 {dimension_numbers = #tpu.dot_dimension_numbers<[1], [0], [0], [1], [0, 0, 1, 1], [], []>} : vector<8x8xf32>, vector<8x32xf32>, vector<8x32xf32> -> vector<8x32xf32>
    %312 = arith.addf %291, %311 : vector<8x32xf32>
    %313 = tpu.concatenate %229, %312 in 0 : vector<8x32xf32>, vector<8x32xf32> -> vector<16x32xf32>
    %c0_189 = arith.constant 0 : index
    %c0_190 = arith.constant 0 : index
    %c0_191 = arith.constant 0 : index
    %314 = vector.load %arg21[%c0_189, %c0_190, %c0_191] : memref<2x1x32xf32, #tpu.memory_space<vmem>>, vector<1x1x32xf32>
    %315 = vector.shape_cast %314 : vector<1x1x32xf32> to vector<1x32xf32>
    %316 = vector.broadcast %315 : vector<1x32xf32> to vector<16x32xf32>
    %317 = arith.addf %313, %316 : vector<16x32xf32>
    %318 = arith.addf %317, %62 : vector<16x32xf32>
    %c0_192 = arith.constant 0 : index
    %c0_193 = arith.constant 0 : index
    %c0_194 = arith.constant 0 : index
    %319 = vector.load %arg22[%c0_192, %c0_193, %c0_194] : memref<2x1x32xf32, #tpu.memory_space<vmem>>, vector<1x1x32xf32>
    %320 = vector.shape_cast %319 : vector<1x1x32xf32> to vector<1x32xf32>
    %c0_195 = arith.constant 0 : index
    %c0_196 = arith.constant 0 : index
    %c0_197 = arith.constant 0 : index
    %321 = vector.load %arg23[%c0_195, %c0_196, %c0_197] : memref<2x1x32xf32, #tpu.memory_space<vmem>>, vector<1x1x32xf32>
    %322 = vector.shape_cast %321 : vector<1x1x32xf32> to vector<1x32xf32>
    %cst_198 = arith.constant dense<0.000000e+00> : vector<16xf32>
    %323 = vector.multi_reduction <add>, %318, %cst_198 [1] : vector<16x32xf32> to vector<16xf32>
    %324 = vector.shape_cast %323 : vector<16xf32> to vector<16x1xf32>
    %cst_199 = arith.constant 3.200000e+01 : f32
    %325 = vector.broadcast %cst_199 : f32 to vector<16x1xf32>
    %326 = arith.divf %324, %325 : vector<16x1xf32>
    %327 = vector.broadcast %326 : vector<16x1xf32> to vector<16x32xf32>
    %328 = arith.subf %318, %327 : vector<16x32xf32>
    %329 = arith.mulf %328, %328 : vector<16x32xf32>
    %cst_200 = arith.constant dense<0.000000e+00> : vector<16xf32>
    %330 = vector.multi_reduction <add>, %329, %cst_200 [1] : vector<16x32xf32> to vector<16xf32>
    %331 = vector.shape_cast %330 : vector<16xf32> to vector<16x1xf32>
    %cst_201 = arith.constant 3.200000e+01 : f32
    %332 = vector.broadcast %cst_201 : f32 to vector<16x1xf32>
    %333 = arith.divf %331, %332 : vector<16x1xf32>
    %334 = vector.broadcast %326 : vector<16x1xf32> to vector<16x32xf32>
    %335 = arith.subf %318, %334 : vector<16x32xf32>
    %cst_202 = arith.constant 9.99999974E-6 : f32
    %336 = vector.broadcast %cst_202 : f32 to vector<16x1xf32>
    %337 = arith.addf %333, %336 : vector<16x1xf32>
    %338 = math.rsqrt %337 : vector<16x1xf32>
    %339 = vector.broadcast %338 : vector<16x1xf32> to vector<16x32xf32>
    %340 = arith.mulf %335, %339 : vector<16x32xf32>
    %341 = vector.broadcast %320 : vector<1x32xf32> to vector<16x32xf32>
    %342 = arith.mulf %340, %341 : vector<16x32xf32>
    %343 = vector.broadcast %322 : vector<1x32xf32> to vector<16x32xf32>
    %344 = arith.addf %342, %343 : vector<16x32xf32>
    %c0_203 = arith.constant 0 : index
    %c0_204 = arith.constant 0 : index
    %c0_205 = arith.constant 0 : index
    %345 = vector.load %arg24[%c0_203, %c0_204, %c0_205] : memref<2x1x32xf32, #tpu.memory_space<vmem>>, vector<1x1x32xf32>
    %346 = vector.shape_cast %345 : vector<1x1x32xf32> to vector<1x32xf32>
    %c0_206 = arith.constant 0 : index
    %c0_207 = arith.constant 0 : index
    %c0_208 = arith.constant 0 : index
    %347 = vector.load %arg25[%c0_206, %c0_207, %c0_208] : memref<2x1x32xf32, #tpu.memory_space<vmem>>, vector<1x1x32xf32>
    %348 = vector.shape_cast %347 : vector<1x1x32xf32> to vector<1x32xf32>
    %cst_209 = arith.constant dense<0.000000e+00> : vector<16xf32>
    %349 = vector.multi_reduction <add>, %344, %cst_209 [1] : vector<16x32xf32> to vector<16xf32>
    %350 = vector.shape_cast %349 : vector<16xf32> to vector<16x1xf32>
    %cst_210 = arith.constant 3.200000e+01 : f32
    %351 = vector.broadcast %cst_210 : f32 to vector<16x1xf32>
    %352 = arith.divf %350, %351 : vector<16x1xf32>
    %353 = vector.broadcast %352 : vector<16x1xf32> to vector<16x32xf32>
    %354 = arith.subf %344, %353 : vector<16x32xf32>
    %355 = arith.mulf %354, %354 : vector<16x32xf32>
    %cst_211 = arith.constant dense<0.000000e+00> : vector<16xf32>
    %356 = vector.multi_reduction <add>, %355, %cst_211 [1] : vector<16x32xf32> to vector<16xf32>
    %357 = vector.shape_cast %356 : vector<16xf32> to vector<16x1xf32>
    %cst_212 = arith.constant 3.200000e+01 : f32
    %358 = vector.broadcast %cst_212 : f32 to vector<16x1xf32>
    %359 = arith.divf %357, %358 : vector<16x1xf32>
    %360 = vector.broadcast %352 : vector<16x1xf32> to vector<16x32xf32>
    %361 = arith.subf %344, %360 : vector<16x32xf32>
    %cst_213 = arith.constant 9.99999974E-6 : f32
    %362 = vector.broadcast %cst_213 : f32 to vector<16x1xf32>
    %363 = arith.addf %359, %362 : vector<16x1xf32>
    %364 = math.rsqrt %363 : vector<16x1xf32>
    %365 = vector.broadcast %364 : vector<16x1xf32> to vector<16x32xf32>
    %366 = arith.mulf %361, %365 : vector<16x32xf32>
    %367 = vector.broadcast %346 : vector<1x32xf32> to vector<16x32xf32>
    %368 = arith.mulf %366, %367 : vector<16x32xf32>
    %369 = vector.broadcast %348 : vector<1x32xf32> to vector<16x32xf32>
    %370 = arith.addf %368, %369 : vector<16x32xf32>
    %c0_214 = arith.constant 0 : index
    %c0_215 = arith.constant 0 : index
    %c0_216 = arith.constant 0 : index
    %371 = vector.load %arg26[%c0_214, %c0_215, %c0_216] : memref<2x32x32xf32, #tpu.memory_space<vmem>>, vector<1x32x32xf32>
    %372 = vector.shape_cast %371 : vector<1x32x32xf32> to vector<32x32xf32>
    %cst_217 = arith.constant dense<0.000000e+00> : vector<16x32xf32>
    %373 = tpu.matmul %370, %372, %cst_217 {dimension_numbers = #tpu.dot_dimension_numbers<[1], [0], [0], [1], [0, 0, 1, 1], [], []>} : vector<16x32xf32>, vector<32x32xf32>, vector<16x32xf32> -> vector<16x32xf32>
    %c0_218 = arith.constant 0 : index
    %c0_219 = arith.constant 0 : index
    %c0_220 = arith.constant 0 : index
    %374 = vector.load %arg27[%c0_218, %c0_219, %c0_220] : memref<2x1x32xf32, #tpu.memory_space<vmem>>, vector<1x1x32xf32>
    %375 = vector.shape_cast %374 : vector<1x1x32xf32> to vector<1x32xf32>
    %376 = vector.broadcast %375 : vector<1x32xf32> to vector<16x32xf32>
    %377 = arith.addf %373, %376 : vector<16x32xf32>
    %378 = arith.mulf %377, %377 : vector<16x32xf32>
    %379 = arith.mulf %377, %378 : vector<16x32xf32>
    %cst_221 = arith.constant 4.471500e-02 : f32
    %380 = vector.broadcast %cst_221 : f32 to vector<16x32xf32>
    %381 = arith.mulf %380, %379 : vector<16x32xf32>
    %382 = arith.addf %377, %381 : vector<16x32xf32>
    %cst_222 = arith.constant 0.797884583 : f32
    %383 = vector.broadcast %cst_222 : f32 to vector<16x32xf32>
    %384 = arith.mulf %383, %382 : vector<16x32xf32>
    %385 = math.tanh %384 : vector<16x32xf32>
    %cst_223 = arith.constant 1.000000e+00 : f32
    %386 = vector.broadcast %cst_223 : f32 to vector<16x32xf32>
    %387 = arith.addf %386, %385 : vector<16x32xf32>
    %cst_224 = arith.constant 5.000000e-01 : f32
    %388 = vector.broadcast %cst_224 : f32 to vector<16x32xf32>
    %389 = arith.mulf %388, %387 : vector<16x32xf32>
    %390 = arith.mulf %377, %389 : vector<16x32xf32>
    %c0_225 = arith.constant 0 : index
    %c0_226 = arith.constant 0 : index
    %c0_227 = arith.constant 0 : index
    %391 = vector.load %arg28[%c0_225, %c0_226, %c0_227] : memref<2x32x32xf32, #tpu.memory_space<vmem>>, vector<1x32x32xf32>
    %392 = vector.shape_cast %391 : vector<1x32x32xf32> to vector<32x32xf32>
    %cst_228 = arith.constant dense<0.000000e+00> : vector<16x32xf32>
    %393 = tpu.matmul %390, %392, %cst_228 {dimension_numbers = #tpu.dot_dimension_numbers<[1], [0], [0], [1], [0, 0, 1, 1], [], []>} : vector<16x32xf32>, vector<32x32xf32>, vector<16x32xf32> -> vector<16x32xf32>
    %c0_229 = arith.constant 0 : index
    %c0_230 = arith.constant 0 : index
    %c0_231 = arith.constant 0 : index
    %394 = vector.load %arg29[%c0_229, %c0_230, %c0_231] : memref<2x1x32xf32, #tpu.memory_space<vmem>>, vector<1x1x32xf32>
    %395 = vector.shape_cast %394 : vector<1x1x32xf32> to vector<1x32xf32>
    %396 = vector.broadcast %395 : vector<1x32xf32> to vector<16x32xf32>
    %397 = arith.addf %393, %396 : vector<16x32xf32>
    %398 = arith.addf %397, %344 : vector<16x32xf32>
    %c4 = arith.constant 4 : index
    %c0_232 = arith.constant 0 : index
    %c0_233 = arith.constant 0 : index
    %399 = vector.load %arg14[%c4, %c0_232, %c0_233] : memref<8x32x8xf32, #tpu.memory_space<vmem>>, vector<1x32x8xf32>
    %400 = vector.shape_cast %399 : vector<1x32x8xf32> to vector<32x8xf32>
    %cst_234 = arith.constant dense<0.000000e+00> : vector<16x8xf32>
    %401 = tpu.matmul %398, %400, %cst_234 {dimension_numbers = #tpu.dot_dimension_numbers<[1], [0], [0], [1], [0, 0, 1, 1], [], []>} : vector<16x32xf32>, vector<32x8xf32>, vector<16x8xf32> -> vector<16x8xf32>
    %c4_235 = arith.constant 4 : index
    %c0_236 = arith.constant 0 : index
    %c0_237 = arith.constant 0 : index
    %402 = vector.load %arg15[%c4_235, %c0_236, %c0_237] : memref<8x1x8xf32, #tpu.memory_space<vmem>>, vector<1x1x8xf32>
    %403 = vector.shape_cast %402 : vector<1x1x8xf32> to vector<1x8xf32>
    %404 = vector.broadcast %403 : vector<1x8xf32> to vector<16x8xf32>
    %405 = arith.addf %401, %404 : vector<16x8xf32>
    %c4_238 = arith.constant 4 : index
    %c0_239 = arith.constant 0 : index
    %c0_240 = arith.constant 0 : index
    %406 = vector.load %arg16[%c4_238, %c0_239, %c0_240] : memref<8x32x8xf32, #tpu.memory_space<vmem>>, vector<1x32x8xf32>
    %407 = vector.shape_cast %406 : vector<1x32x8xf32> to vector<32x8xf32>
    %cst_241 = arith.constant dense<0.000000e+00> : vector<16x8xf32>
    %408 = tpu.matmul %398, %407, %cst_241 {dimension_numbers = #tpu.dot_dimension_numbers<[1], [0], [0], [1], [0, 0, 1, 1], [], []>} : vector<16x32xf32>, vector<32x8xf32>, vector<16x8xf32> -> vector<16x8xf32>
    %c4_242 = arith.constant 4 : index
    %c0_243 = arith.constant 0 : index
    %c0_244 = arith.constant 0 : index
    %409 = vector.load %arg17[%c4_242, %c0_243, %c0_244] : memref<8x1x8xf32, #tpu.memory_space<vmem>>, vector<1x1x8xf32>
    %410 = vector.shape_cast %409 : vector<1x1x8xf32> to vector<1x8xf32>
    %411 = vector.broadcast %410 : vector<1x8xf32> to vector<16x8xf32>
    %412 = arith.addf %408, %411 : vector<16x8xf32>
    %c4_245 = arith.constant 4 : index
    %c0_246 = arith.constant 0 : index
    %c0_247 = arith.constant 0 : index
    %413 = vector.load %arg18[%c4_245, %c0_246, %c0_247] : memref<8x32x8xf32, #tpu.memory_space<vmem>>, vector<1x32x8xf32>
    %414 = vector.shape_cast %413 : vector<1x32x8xf32> to vector<32x8xf32>
    %cst_248 = arith.constant dense<0.000000e+00> : vector<16x8xf32>
    %415 = tpu.matmul %398, %414, %cst_248 {dimension_numbers = #tpu.dot_dimension_numbers<[1], [0], [0], [1], [0, 0, 1, 1], [], []>} : vector<16x32xf32>, vector<32x8xf32>, vector<16x8xf32> -> vector<16x8xf32>
    %c4_249 = arith.constant 4 : index
    %c0_250 = arith.constant 0 : index
    %c0_251 = arith.constant 0 : index
    %416 = vector.load %arg19[%c4_249, %c0_250, %c0_251] : memref<8x1x8xf32, #tpu.memory_space<vmem>>, vector<1x1x8xf32>
    %417 = vector.shape_cast %416 : vector<1x1x8xf32> to vector<1x8xf32>
    %418 = vector.broadcast %417 : vector<1x8xf32> to vector<16x8xf32>
    %419 = arith.addf %415, %418 : vector<16x8xf32>
    %c5 = arith.constant 5 : index
    %c0_252 = arith.constant 0 : index
    %c0_253 = arith.constant 0 : index
    %420 = vector.load %arg14[%c5, %c0_252, %c0_253] : memref<8x32x8xf32, #tpu.memory_space<vmem>>, vector<1x32x8xf32>
    %421 = vector.shape_cast %420 : vector<1x32x8xf32> to vector<32x8xf32>
    %cst_254 = arith.constant dense<0.000000e+00> : vector<16x8xf32>
    %422 = tpu.matmul %398, %421, %cst_254 {dimension_numbers = #tpu.dot_dimension_numbers<[1], [0], [0], [1], [0, 0, 1, 1], [], []>} : vector<16x32xf32>, vector<32x8xf32>, vector<16x8xf32> -> vector<16x8xf32>
    %c5_255 = arith.constant 5 : index
    %c0_256 = arith.constant 0 : index
    %c0_257 = arith.constant 0 : index
    %423 = vector.load %arg15[%c5_255, %c0_256, %c0_257] : memref<8x1x8xf32, #tpu.memory_space<vmem>>, vector<1x1x8xf32>
    %424 = vector.shape_cast %423 : vector<1x1x8xf32> to vector<1x8xf32>
    %425 = vector.broadcast %424 : vector<1x8xf32> to vector<16x8xf32>
    %426 = arith.addf %422, %425 : vector<16x8xf32>
    %c5_258 = arith.constant 5 : index
    %c0_259 = arith.constant 0 : index
    %c0_260 = arith.constant 0 : index
    %427 = vector.load %arg16[%c5_258, %c0_259, %c0_260] : memref<8x32x8xf32, #tpu.memory_space<vmem>>, vector<1x32x8xf32>
    %428 = vector.shape_cast %427 : vector<1x32x8xf32> to vector<32x8xf32>
    %cst_261 = arith.constant dense<0.000000e+00> : vector<16x8xf32>
    %429 = tpu.matmul %398, %428, %cst_261 {dimension_numbers = #tpu.dot_dimension_numbers<[1], [0], [0], [1], [0, 0, 1, 1], [], []>} : vector<16x32xf32>, vector<32x8xf32>, vector<16x8xf32> -> vector<16x8xf32>
    %c5_262 = arith.constant 5 : index
    %c0_263 = arith.constant 0 : index
    %c0_264 = arith.constant 0 : index
    %430 = vector.load %arg17[%c5_262, %c0_263, %c0_264] : memref<8x1x8xf32, #tpu.memory_space<vmem>>, vector<1x1x8xf32>
    %431 = vector.shape_cast %430 : vector<1x1x8xf32> to vector<1x8xf32>
    %432 = vector.broadcast %431 : vector<1x8xf32> to vector<16x8xf32>
    %433 = arith.addf %429, %432 : vector<16x8xf32>
    %c5_265 = arith.constant 5 : index
    %c0_266 = arith.constant 0 : index
    %c0_267 = arith.constant 0 : index
    %434 = vector.load %arg18[%c5_265, %c0_266, %c0_267] : memref<8x32x8xf32, #tpu.memory_space<vmem>>, vector<1x32x8xf32>
    %435 = vector.shape_cast %434 : vector<1x32x8xf32> to vector<32x8xf32>
    %cst_268 = arith.constant dense<0.000000e+00> : vector<16x8xf32>
    %436 = tpu.matmul %398, %435, %cst_268 {dimension_numbers = #tpu.dot_dimension_numbers<[1], [0], [0], [1], [0, 0, 1, 1], [], []>} : vector<16x32xf32>, vector<32x8xf32>, vector<16x8xf32> -> vector<16x8xf32>
    %c5_269 = arith.constant 5 : index
    %c0_270 = arith.constant 0 : index
    %c0_271 = arith.constant 0 : index
    %437 = vector.load %arg19[%c5_269, %c0_270, %c0_271] : memref<8x1x8xf32, #tpu.memory_space<vmem>>, vector<1x1x8xf32>
    %438 = vector.shape_cast %437 : vector<1x1x8xf32> to vector<1x8xf32>
    %439 = vector.broadcast %438 : vector<1x8xf32> to vector<16x8xf32>
    %440 = arith.addf %436, %439 : vector<16x8xf32>
    %c6 = arith.constant 6 : index
    %c0_272 = arith.constant 0 : index
    %c0_273 = arith.constant 0 : index
    %441 = vector.load %arg14[%c6, %c0_272, %c0_273] : memref<8x32x8xf32, #tpu.memory_space<vmem>>, vector<1x32x8xf32>
    %442 = vector.shape_cast %441 : vector<1x32x8xf32> to vector<32x8xf32>
    %cst_274 = arith.constant dense<0.000000e+00> : vector<16x8xf32>
    %443 = tpu.matmul %398, %442, %cst_274 {dimension_numbers = #tpu.dot_dimension_numbers<[1], [0], [0], [1], [0, 0, 1, 1], [], []>} : vector<16x32xf32>, vector<32x8xf32>, vector<16x8xf32> -> vector<16x8xf32>
    %c6_275 = arith.constant 6 : index
    %c0_276 = arith.constant 0 : index
    %c0_277 = arith.constant 0 : index
    %444 = vector.load %arg15[%c6_275, %c0_276, %c0_277] : memref<8x1x8xf32, #tpu.memory_space<vmem>>, vector<1x1x8xf32>
    %445 = vector.shape_cast %444 : vector<1x1x8xf32> to vector<1x8xf32>
    %446 = vector.broadcast %445 : vector<1x8xf32> to vector<16x8xf32>
    %447 = arith.addf %443, %446 : vector<16x8xf32>
    %c6_278 = arith.constant 6 : index
    %c0_279 = arith.constant 0 : index
    %c0_280 = arith.constant 0 : index
    %448 = vector.load %arg16[%c6_278, %c0_279, %c0_280] : memref<8x32x8xf32, #tpu.memory_space<vmem>>, vector<1x32x8xf32>
    %449 = vector.shape_cast %448 : vector<1x32x8xf32> to vector<32x8xf32>
    %cst_281 = arith.constant dense<0.000000e+00> : vector<16x8xf32>
    %450 = tpu.matmul %398, %449, %cst_281 {dimension_numbers = #tpu.dot_dimension_numbers<[1], [0], [0], [1], [0, 0, 1, 1], [], []>} : vector<16x32xf32>, vector<32x8xf32>, vector<16x8xf32> -> vector<16x8xf32>
    %c6_282 = arith.constant 6 : index
    %c0_283 = arith.constant 0 : index
    %c0_284 = arith.constant 0 : index
    %451 = vector.load %arg17[%c6_282, %c0_283, %c0_284] : memref<8x1x8xf32, #tpu.memory_space<vmem>>, vector<1x1x8xf32>
    %452 = vector.shape_cast %451 : vector<1x1x8xf32> to vector<1x8xf32>
    %453 = vector.broadcast %452 : vector<1x8xf32> to vector<16x8xf32>
    %454 = arith.addf %450, %453 : vector<16x8xf32>
    %c6_285 = arith.constant 6 : index
    %c0_286 = arith.constant 0 : index
    %c0_287 = arith.constant 0 : index
    %455 = vector.load %arg18[%c6_285, %c0_286, %c0_287] : memref<8x32x8xf32, #tpu.memory_space<vmem>>, vector<1x32x8xf32>
    %456 = vector.shape_cast %455 : vector<1x32x8xf32> to vector<32x8xf32>
    %cst_288 = arith.constant dense<0.000000e+00> : vector<16x8xf32>
    %457 = tpu.matmul %398, %456, %cst_288 {dimension_numbers = #tpu.dot_dimension_numbers<[1], [0], [0], [1], [0, 0, 1, 1], [], []>} : vector<16x32xf32>, vector<32x8xf32>, vector<16x8xf32> -> vector<16x8xf32>
    %c6_289 = arith.constant 6 : index
    %c0_290 = arith.constant 0 : index
    %c0_291 = arith.constant 0 : index
    %458 = vector.load %arg19[%c6_289, %c0_290, %c0_291] : memref<8x1x8xf32, #tpu.memory_space<vmem>>, vector<1x1x8xf32>
    %459 = vector.shape_cast %458 : vector<1x1x8xf32> to vector<1x8xf32>
    %460 = vector.broadcast %459 : vector<1x8xf32> to vector<16x8xf32>
    %461 = arith.addf %457, %460 : vector<16x8xf32>
    %c7 = arith.constant 7 : index
    %c0_292 = arith.constant 0 : index
    %c0_293 = arith.constant 0 : index
    %462 = vector.load %arg14[%c7, %c0_292, %c0_293] : memref<8x32x8xf32, #tpu.memory_space<vmem>>, vector<1x32x8xf32>
    %463 = vector.shape_cast %462 : vector<1x32x8xf32> to vector<32x8xf32>
    %cst_294 = arith.constant dense<0.000000e+00> : vector<16x8xf32>
    %464 = tpu.matmul %398, %463, %cst_294 {dimension_numbers = #tpu.dot_dimension_numbers<[1], [0], [0], [1], [0, 0, 1, 1], [], []>} : vector<16x32xf32>, vector<32x8xf32>, vector<16x8xf32> -> vector<16x8xf32>
    %c7_295 = arith.constant 7 : index
    %c0_296 = arith.constant 0 : index
    %c0_297 = arith.constant 0 : index
    %465 = vector.load %arg15[%c7_295, %c0_296, %c0_297] : memref<8x1x8xf32, #tpu.memory_space<vmem>>, vector<1x1x8xf32>
    %466 = vector.shape_cast %465 : vector<1x1x8xf32> to vector<1x8xf32>
    %467 = vector.broadcast %466 : vector<1x8xf32> to vector<16x8xf32>
    %468 = arith.addf %464, %467 : vector<16x8xf32>
    %c7_298 = arith.constant 7 : index
    %c0_299 = arith.constant 0 : index
    %c0_300 = arith.constant 0 : index
    %469 = vector.load %arg16[%c7_298, %c0_299, %c0_300] : memref<8x32x8xf32, #tpu.memory_space<vmem>>, vector<1x32x8xf32>
    %470 = vector.shape_cast %469 : vector<1x32x8xf32> to vector<32x8xf32>
    %cst_301 = arith.constant dense<0.000000e+00> : vector<16x8xf32>
    %471 = tpu.matmul %398, %470, %cst_301 {dimension_numbers = #tpu.dot_dimension_numbers<[1], [0], [0], [1], [0, 0, 1, 1], [], []>} : vector<16x32xf32>, vector<32x8xf32>, vector<16x8xf32> -> vector<16x8xf32>
    %c7_302 = arith.constant 7 : index
    %c0_303 = arith.constant 0 : index
    %c0_304 = arith.constant 0 : index
    %472 = vector.load %arg17[%c7_302, %c0_303, %c0_304] : memref<8x1x8xf32, #tpu.memory_space<vmem>>, vector<1x1x8xf32>
    %473 = vector.shape_cast %472 : vector<1x1x8xf32> to vector<1x8xf32>
    %474 = vector.broadcast %473 : vector<1x8xf32> to vector<16x8xf32>
    %475 = arith.addf %471, %474 : vector<16x8xf32>
    %c7_305 = arith.constant 7 : index
    %c0_306 = arith.constant 0 : index
    %c0_307 = arith.constant 0 : index
    %476 = vector.load %arg18[%c7_305, %c0_306, %c0_307] : memref<8x32x8xf32, #tpu.memory_space<vmem>>, vector<1x32x8xf32>
    %477 = vector.shape_cast %476 : vector<1x32x8xf32> to vector<32x8xf32>
    %cst_308 = arith.constant dense<0.000000e+00> : vector<16x8xf32>
    %478 = tpu.matmul %398, %477, %cst_308 {dimension_numbers = #tpu.dot_dimension_numbers<[1], [0], [0], [1], [0, 0, 1, 1], [], []>} : vector<16x32xf32>, vector<32x8xf32>, vector<16x8xf32> -> vector<16x8xf32>
    %c7_309 = arith.constant 7 : index
    %c0_310 = arith.constant 0 : index
    %c0_311 = arith.constant 0 : index
    %479 = vector.load %arg19[%c7_309, %c0_310, %c0_311] : memref<8x1x8xf32, #tpu.memory_space<vmem>>, vector<1x1x8xf32>
    %480 = vector.shape_cast %479 : vector<1x1x8xf32> to vector<1x8xf32>
    %481 = vector.broadcast %480 : vector<1x8xf32> to vector<16x8xf32>
    %482 = arith.addf %478, %481 : vector<16x8xf32>
    %483 = vector.extract_strided_slice %405 {offsets = [0, 0], sizes = [8, 8], strides = [1, 1]} : vector<16x8xf32> to vector<8x8xf32>
    %484 = vector.extract_strided_slice %412 {offsets = [0, 0], sizes = [8, 8], strides = [1, 1]} : vector<16x8xf32> to vector<8x8xf32>
    %485 = vector.extract_strided_slice %419 {offsets = [0, 0], sizes = [8, 8], strides = [1, 1]} : vector<16x8xf32> to vector<8x8xf32>
    %cst_312 = arith.constant dense<0.000000e+00> : vector<8x8xf32>
    %486 = tpu.matmul %483, %484, %cst_312 {dimension_numbers = #tpu.dot_dimension_numbers<[1], [1], [0], [0], [0, 0, 1, 0], [], []>} : vector<8x8xf32>, vector<8x8xf32>, vector<8x8xf32> -> vector<8x8xf32>
    %cst_313 = arith.constant 0.353553385 : f32
    %487 = vector.broadcast %cst_313 : f32 to vector<8x8xf32>
    %488 = arith.mulf %486, %487 : vector<8x8xf32>
    %cst_314 = arith.constant dense<0xFF800000> : vector<8xf32>
    %489 = vector.multi_reduction <maximumf>, %488, %cst_314 [1] : vector<8x8xf32> to vector<8xf32>
    %490 = vector.shape_cast %489 : vector<8xf32> to vector<8x1xf32>
    %491 = vector.broadcast %490 : vector<8x1xf32> to vector<8x8xf32>
    %492 = arith.subf %488, %491 : vector<8x8xf32>
    %493 = math.exp %492 : vector<8x8xf32>
    %cst_315 = arith.constant dense<0.000000e+00> : vector<8xf32>
    %494 = vector.multi_reduction <add>, %493, %cst_315 [1] : vector<8x8xf32> to vector<8xf32>
    %495 = vector.shape_cast %494 : vector<8xf32> to vector<8x1xf32>
    %496 = tpu.reciprocal %495 {approx = true} : vector<8x1xf32> -> vector<8x1xf32>
    %497 = vector.broadcast %496 : vector<8x1xf32> to vector<8x8xf32>
    %498 = arith.mulf %493, %497 : vector<8x8xf32>
    %cst_316 = arith.constant dense<0.000000e+00> : vector<8x8xf32>
    %499 = tpu.matmul %498, %485, %cst_316 {dimension_numbers = #tpu.dot_dimension_numbers<[1], [0], [0], [1], [0, 0, 1, 1], [], []>} : vector<8x8xf32>, vector<8x8xf32>, vector<8x8xf32> -> vector<8x8xf32>
    %c4_317 = arith.constant 4 : index
    %c0_318 = arith.constant 0 : index
    %c0_319 = arith.constant 0 : index
    %500 = vector.load %arg20[%c4_317, %c0_318, %c0_319] : memref<8x8x32xf32, #tpu.memory_space<vmem>>, vector<1x8x32xf32>
    %501 = vector.shape_cast %500 : vector<1x8x32xf32> to vector<8x32xf32>
    %cst_320 = arith.constant dense<0.000000e+00> : vector<8x32xf32>
    %502 = tpu.matmul %499, %501, %cst_320 {dimension_numbers = #tpu.dot_dimension_numbers<[1], [0], [0], [1], [0, 0, 1, 1], [], []>} : vector<8x8xf32>, vector<8x32xf32>, vector<8x32xf32> -> vector<8x32xf32>
    %503 = vector.extract_strided_slice %426 {offsets = [0, 0], sizes = [8, 8], strides = [1, 1]} : vector<16x8xf32> to vector<8x8xf32>
    %504 = vector.extract_strided_slice %433 {offsets = [0, 0], sizes = [8, 8], strides = [1, 1]} : vector<16x8xf32> to vector<8x8xf32>
    %505 = vector.extract_strided_slice %440 {offsets = [0, 0], sizes = [8, 8], strides = [1, 1]} : vector<16x8xf32> to vector<8x8xf32>
    %cst_321 = arith.constant dense<0.000000e+00> : vector<8x8xf32>
    %506 = tpu.matmul %503, %504, %cst_321 {dimension_numbers = #tpu.dot_dimension_numbers<[1], [1], [0], [0], [0, 0, 1, 0], [], []>} : vector<8x8xf32>, vector<8x8xf32>, vector<8x8xf32> -> vector<8x8xf32>
    %cst_322 = arith.constant 0.353553385 : f32
    %507 = vector.broadcast %cst_322 : f32 to vector<8x8xf32>
    %508 = arith.mulf %506, %507 : vector<8x8xf32>
    %cst_323 = arith.constant dense<0xFF800000> : vector<8xf32>
    %509 = vector.multi_reduction <maximumf>, %508, %cst_323 [1] : vector<8x8xf32> to vector<8xf32>
    %510 = vector.shape_cast %509 : vector<8xf32> to vector<8x1xf32>
    %511 = vector.broadcast %510 : vector<8x1xf32> to vector<8x8xf32>
    %512 = arith.subf %508, %511 : vector<8x8xf32>
    %513 = math.exp %512 : vector<8x8xf32>
    %cst_324 = arith.constant dense<0.000000e+00> : vector<8xf32>
    %514 = vector.multi_reduction <add>, %513, %cst_324 [1] : vector<8x8xf32> to vector<8xf32>
    %515 = vector.shape_cast %514 : vector<8xf32> to vector<8x1xf32>
    %516 = tpu.reciprocal %515 {approx = true} : vector<8x1xf32> -> vector<8x1xf32>
    %517 = vector.broadcast %516 : vector<8x1xf32> to vector<8x8xf32>
    %518 = arith.mulf %513, %517 : vector<8x8xf32>
    %cst_325 = arith.constant dense<0.000000e+00> : vector<8x8xf32>
    %519 = tpu.matmul %518, %505, %cst_325 {dimension_numbers = #tpu.dot_dimension_numbers<[1], [0], [0], [1], [0, 0, 1, 1], [], []>} : vector<8x8xf32>, vector<8x8xf32>, vector<8x8xf32> -> vector<8x8xf32>
    %c5_326 = arith.constant 5 : index
    %c0_327 = arith.constant 0 : index
    %c0_328 = arith.constant 0 : index
    %520 = vector.load %arg20[%c5_326, %c0_327, %c0_328] : memref<8x8x32xf32, #tpu.memory_space<vmem>>, vector<1x8x32xf32>
    %521 = vector.shape_cast %520 : vector<1x8x32xf32> to vector<8x32xf32>
    %cst_329 = arith.constant dense<0.000000e+00> : vector<8x32xf32>
    %522 = tpu.matmul %519, %521, %cst_329 {dimension_numbers = #tpu.dot_dimension_numbers<[1], [0], [0], [1], [0, 0, 1, 1], [], []>} : vector<8x8xf32>, vector<8x32xf32>, vector<8x32xf32> -> vector<8x32xf32>
    %523 = arith.addf %502, %522 : vector<8x32xf32>
    %524 = vector.extract_strided_slice %447 {offsets = [0, 0], sizes = [8, 8], strides = [1, 1]} : vector<16x8xf32> to vector<8x8xf32>
    %525 = vector.extract_strided_slice %454 {offsets = [0, 0], sizes = [8, 8], strides = [1, 1]} : vector<16x8xf32> to vector<8x8xf32>
    %526 = vector.extract_strided_slice %461 {offsets = [0, 0], sizes = [8, 8], strides = [1, 1]} : vector<16x8xf32> to vector<8x8xf32>
    %cst_330 = arith.constant dense<0.000000e+00> : vector<8x8xf32>
    %527 = tpu.matmul %524, %525, %cst_330 {dimension_numbers = #tpu.dot_dimension_numbers<[1], [1], [0], [0], [0, 0, 1, 0], [], []>} : vector<8x8xf32>, vector<8x8xf32>, vector<8x8xf32> -> vector<8x8xf32>
    %cst_331 = arith.constant 0.353553385 : f32
    %528 = vector.broadcast %cst_331 : f32 to vector<8x8xf32>
    %529 = arith.mulf %527, %528 : vector<8x8xf32>
    %cst_332 = arith.constant dense<0xFF800000> : vector<8xf32>
    %530 = vector.multi_reduction <maximumf>, %529, %cst_332 [1] : vector<8x8xf32> to vector<8xf32>
    %531 = vector.shape_cast %530 : vector<8xf32> to vector<8x1xf32>
    %532 = vector.broadcast %531 : vector<8x1xf32> to vector<8x8xf32>
    %533 = arith.subf %529, %532 : vector<8x8xf32>
    %534 = math.exp %533 : vector<8x8xf32>
    %cst_333 = arith.constant dense<0.000000e+00> : vector<8xf32>
    %535 = vector.multi_reduction <add>, %534, %cst_333 [1] : vector<8x8xf32> to vector<8xf32>
    %536 = vector.shape_cast %535 : vector<8xf32> to vector<8x1xf32>
    %537 = tpu.reciprocal %536 {approx = true} : vector<8x1xf32> -> vector<8x1xf32>
    %538 = vector.broadcast %537 : vector<8x1xf32> to vector<8x8xf32>
    %539 = arith.mulf %534, %538 : vector<8x8xf32>
    %cst_334 = arith.constant dense<0.000000e+00> : vector<8x8xf32>
    %540 = tpu.matmul %539, %526, %cst_334 {dimension_numbers = #tpu.dot_dimension_numbers<[1], [0], [0], [1], [0, 0, 1, 1], [], []>} : vector<8x8xf32>, vector<8x8xf32>, vector<8x8xf32> -> vector<8x8xf32>
    %c6_335 = arith.constant 6 : index
    %c0_336 = arith.constant 0 : index
    %c0_337 = arith.constant 0 : index
    %541 = vector.load %arg20[%c6_335, %c0_336, %c0_337] : memref<8x8x32xf32, #tpu.memory_space<vmem>>, vector<1x8x32xf32>
    %542 = vector.shape_cast %541 : vector<1x8x32xf32> to vector<8x32xf32>
    %cst_338 = arith.constant dense<0.000000e+00> : vector<8x32xf32>
    %543 = tpu.matmul %540, %542, %cst_338 {dimension_numbers = #tpu.dot_dimension_numbers<[1], [0], [0], [1], [0, 0, 1, 1], [], []>} : vector<8x8xf32>, vector<8x32xf32>, vector<8x32xf32> -> vector<8x32xf32>
    %544 = arith.addf %523, %543 : vector<8x32xf32>
    %545 = vector.extract_strided_slice %468 {offsets = [0, 0], sizes = [8, 8], strides = [1, 1]} : vector<16x8xf32> to vector<8x8xf32>
    %546 = vector.extract_strided_slice %475 {offsets = [0, 0], sizes = [8, 8], strides = [1, 1]} : vector<16x8xf32> to vector<8x8xf32>
    %547 = vector.extract_strided_slice %482 {offsets = [0, 0], sizes = [8, 8], strides = [1, 1]} : vector<16x8xf32> to vector<8x8xf32>
    %cst_339 = arith.constant dense<0.000000e+00> : vector<8x8xf32>
    %548 = tpu.matmul %545, %546, %cst_339 {dimension_numbers = #tpu.dot_dimension_numbers<[1], [1], [0], [0], [0, 0, 1, 0], [], []>} : vector<8x8xf32>, vector<8x8xf32>, vector<8x8xf32> -> vector<8x8xf32>
    %cst_340 = arith.constant 0.353553385 : f32
    %549 = vector.broadcast %cst_340 : f32 to vector<8x8xf32>
    %550 = arith.mulf %548, %549 : vector<8x8xf32>
    %cst_341 = arith.constant dense<0xFF800000> : vector<8xf32>
    %551 = vector.multi_reduction <maximumf>, %550, %cst_341 [1] : vector<8x8xf32> to vector<8xf32>
    %552 = vector.shape_cast %551 : vector<8xf32> to vector<8x1xf32>
    %553 = vector.broadcast %552 : vector<8x1xf32> to vector<8x8xf32>
    %554 = arith.subf %550, %553 : vector<8x8xf32>
    %555 = math.exp %554 : vector<8x8xf32>
    %cst_342 = arith.constant dense<0.000000e+00> : vector<8xf32>
    %556 = vector.multi_reduction <add>, %555, %cst_342 [1] : vector<8x8xf32> to vector<8xf32>
    %557 = vector.shape_cast %556 : vector<8xf32> to vector<8x1xf32>
    %558 = tpu.reciprocal %557 {approx = true} : vector<8x1xf32> -> vector<8x1xf32>
    %559 = vector.broadcast %558 : vector<8x1xf32> to vector<8x8xf32>
    %560 = arith.mulf %555, %559 : vector<8x8xf32>
    %cst_343 = arith.constant dense<0.000000e+00> : vector<8x8xf32>
    %561 = tpu.matmul %560, %547, %cst_343 {dimension_numbers = #tpu.dot_dimension_numbers<[1], [0], [0], [1], [0, 0, 1, 1], [], []>} : vector<8x8xf32>, vector<8x8xf32>, vector<8x8xf32> -> vector<8x8xf32>
    %c7_344 = arith.constant 7 : index
    %c0_345 = arith.constant 0 : index
    %c0_346 = arith.constant 0 : index
    %562 = vector.load %arg20[%c7_344, %c0_345, %c0_346] : memref<8x8x32xf32, #tpu.memory_space<vmem>>, vector<1x8x32xf32>
    %563 = vector.shape_cast %562 : vector<1x8x32xf32> to vector<8x32xf32>
    %cst_347 = arith.constant dense<0.000000e+00> : vector<8x32xf32>
    %564 = tpu.matmul %561, %563, %cst_347 {dimension_numbers = #tpu.dot_dimension_numbers<[1], [0], [0], [1], [0, 0, 1, 1], [], []>} : vector<8x8xf32>, vector<8x32xf32>, vector<8x32xf32> -> vector<8x32xf32>
    %565 = arith.addf %544, %564 : vector<8x32xf32>
    %566 = vector.extract_strided_slice %405 {offsets = [8, 0], sizes = [8, 8], strides = [1, 1]} : vector<16x8xf32> to vector<8x8xf32>
    %567 = vector.extract_strided_slice %412 {offsets = [8, 0], sizes = [8, 8], strides = [1, 1]} : vector<16x8xf32> to vector<8x8xf32>
    %568 = vector.extract_strided_slice %419 {offsets = [8, 0], sizes = [8, 8], strides = [1, 1]} : vector<16x8xf32> to vector<8x8xf32>
    %cst_348 = arith.constant dense<0.000000e+00> : vector<8x8xf32>
    %569 = tpu.matmul %566, %567, %cst_348 {dimension_numbers = #tpu.dot_dimension_numbers<[1], [1], [0], [0], [0, 0, 1, 0], [], []>} : vector<8x8xf32>, vector<8x8xf32>, vector<8x8xf32> -> vector<8x8xf32>
    %cst_349 = arith.constant 0.353553385 : f32
    %570 = vector.broadcast %cst_349 : f32 to vector<8x8xf32>
    %571 = arith.mulf %569, %570 : vector<8x8xf32>
    %cst_350 = arith.constant dense<0xFF800000> : vector<8xf32>
    %572 = vector.multi_reduction <maximumf>, %571, %cst_350 [1] : vector<8x8xf32> to vector<8xf32>
    %573 = vector.shape_cast %572 : vector<8xf32> to vector<8x1xf32>
    %574 = vector.broadcast %573 : vector<8x1xf32> to vector<8x8xf32>
    %575 = arith.subf %571, %574 : vector<8x8xf32>
    %576 = math.exp %575 : vector<8x8xf32>
    %cst_351 = arith.constant dense<0.000000e+00> : vector<8xf32>
    %577 = vector.multi_reduction <add>, %576, %cst_351 [1] : vector<8x8xf32> to vector<8xf32>
    %578 = vector.shape_cast %577 : vector<8xf32> to vector<8x1xf32>
    %579 = tpu.reciprocal %578 {approx = true} : vector<8x1xf32> -> vector<8x1xf32>
    %580 = vector.broadcast %579 : vector<8x1xf32> to vector<8x8xf32>
    %581 = arith.mulf %576, %580 : vector<8x8xf32>
    %cst_352 = arith.constant dense<0.000000e+00> : vector<8x8xf32>
    %582 = tpu.matmul %581, %568, %cst_352 {dimension_numbers = #tpu.dot_dimension_numbers<[1], [0], [0], [1], [0, 0, 1, 1], [], []>} : vector<8x8xf32>, vector<8x8xf32>, vector<8x8xf32> -> vector<8x8xf32>
    %c4_353 = arith.constant 4 : index
    %c0_354 = arith.constant 0 : index
    %c0_355 = arith.constant 0 : index
    %583 = vector.load %arg20[%c4_353, %c0_354, %c0_355] : memref<8x8x32xf32, #tpu.memory_space<vmem>>, vector<1x8x32xf32>
    %584 = vector.shape_cast %583 : vector<1x8x32xf32> to vector<8x32xf32>
    %cst_356 = arith.constant dense<0.000000e+00> : vector<8x32xf32>
    %585 = tpu.matmul %582, %584, %cst_356 {dimension_numbers = #tpu.dot_dimension_numbers<[1], [0], [0], [1], [0, 0, 1, 1], [], []>} : vector<8x8xf32>, vector<8x32xf32>, vector<8x32xf32> -> vector<8x32xf32>
    %586 = vector.extract_strided_slice %426 {offsets = [8, 0], sizes = [8, 8], strides = [1, 1]} : vector<16x8xf32> to vector<8x8xf32>
    %587 = vector.extract_strided_slice %433 {offsets = [8, 0], sizes = [8, 8], strides = [1, 1]} : vector<16x8xf32> to vector<8x8xf32>
    %588 = vector.extract_strided_slice %440 {offsets = [8, 0], sizes = [8, 8], strides = [1, 1]} : vector<16x8xf32> to vector<8x8xf32>
    %cst_357 = arith.constant dense<0.000000e+00> : vector<8x8xf32>
    %589 = tpu.matmul %586, %587, %cst_357 {dimension_numbers = #tpu.dot_dimension_numbers<[1], [1], [0], [0], [0, 0, 1, 0], [], []>} : vector<8x8xf32>, vector<8x8xf32>, vector<8x8xf32> -> vector<8x8xf32>
    %cst_358 = arith.constant 0.353553385 : f32
    %590 = vector.broadcast %cst_358 : f32 to vector<8x8xf32>
    %591 = arith.mulf %589, %590 : vector<8x8xf32>
    %cst_359 = arith.constant dense<0xFF800000> : vector<8xf32>
    %592 = vector.multi_reduction <maximumf>, %591, %cst_359 [1] : vector<8x8xf32> to vector<8xf32>
    %593 = vector.shape_cast %592 : vector<8xf32> to vector<8x1xf32>
    %594 = vector.broadcast %593 : vector<8x1xf32> to vector<8x8xf32>
    %595 = arith.subf %591, %594 : vector<8x8xf32>
    %596 = math.exp %595 : vector<8x8xf32>
    %cst_360 = arith.constant dense<0.000000e+00> : vector<8xf32>
    %597 = vector.multi_reduction <add>, %596, %cst_360 [1] : vector<8x8xf32> to vector<8xf32>
    %598 = vector.shape_cast %597 : vector<8xf32> to vector<8x1xf32>
    %599 = tpu.reciprocal %598 {approx = true} : vector<8x1xf32> -> vector<8x1xf32>
    %600 = vector.broadcast %599 : vector<8x1xf32> to vector<8x8xf32>
    %601 = arith.mulf %596, %600 : vector<8x8xf32>
    %cst_361 = arith.constant dense<0.000000e+00> : vector<8x8xf32>
    %602 = tpu.matmul %601, %588, %cst_361 {dimension_numbers = #tpu.dot_dimension_numbers<[1], [0], [0], [1], [0, 0, 1, 1], [], []>} : vector<8x8xf32>, vector<8x8xf32>, vector<8x8xf32> -> vector<8x8xf32>
    %c5_362 = arith.constant 5 : index
    %c0_363 = arith.constant 0 : index
    %c0_364 = arith.constant 0 : index
    %603 = vector.load %arg20[%c5_362, %c0_363, %c0_364] : memref<8x8x32xf32, #tpu.memory_space<vmem>>, vector<1x8x32xf32>
    %604 = vector.shape_cast %603 : vector<1x8x32xf32> to vector<8x32xf32>
    %cst_365 = arith.constant dense<0.000000e+00> : vector<8x32xf32>
    %605 = tpu.matmul %602, %604, %cst_365 {dimension_numbers = #tpu.dot_dimension_numbers<[1], [0], [0], [1], [0, 0, 1, 1], [], []>} : vector<8x8xf32>, vector<8x32xf32>, vector<8x32xf32> -> vector<8x32xf32>
    %606 = arith.addf %585, %605 : vector<8x32xf32>
    %607 = vector.extract_strided_slice %447 {offsets = [8, 0], sizes = [8, 8], strides = [1, 1]} : vector<16x8xf32> to vector<8x8xf32>
    %608 = vector.extract_strided_slice %454 {offsets = [8, 0], sizes = [8, 8], strides = [1, 1]} : vector<16x8xf32> to vector<8x8xf32>
    %609 = vector.extract_strided_slice %461 {offsets = [8, 0], sizes = [8, 8], strides = [1, 1]} : vector<16x8xf32> to vector<8x8xf32>
    %cst_366 = arith.constant dense<0.000000e+00> : vector<8x8xf32>
    %610 = tpu.matmul %607, %608, %cst_366 {dimension_numbers = #tpu.dot_dimension_numbers<[1], [1], [0], [0], [0, 0, 1, 0], [], []>} : vector<8x8xf32>, vector<8x8xf32>, vector<8x8xf32> -> vector<8x8xf32>
    %cst_367 = arith.constant 0.353553385 : f32
    %611 = vector.broadcast %cst_367 : f32 to vector<8x8xf32>
    %612 = arith.mulf %610, %611 : vector<8x8xf32>
    %cst_368 = arith.constant dense<0xFF800000> : vector<8xf32>
    %613 = vector.multi_reduction <maximumf>, %612, %cst_368 [1] : vector<8x8xf32> to vector<8xf32>
    %614 = vector.shape_cast %613 : vector<8xf32> to vector<8x1xf32>
    %615 = vector.broadcast %614 : vector<8x1xf32> to vector<8x8xf32>
    %616 = arith.subf %612, %615 : vector<8x8xf32>
    %617 = math.exp %616 : vector<8x8xf32>
    %cst_369 = arith.constant dense<0.000000e+00> : vector<8xf32>
    %618 = vector.multi_reduction <add>, %617, %cst_369 [1] : vector<8x8xf32> to vector<8xf32>
    %619 = vector.shape_cast %618 : vector<8xf32> to vector<8x1xf32>
    %620 = tpu.reciprocal %619 {approx = true} : vector<8x1xf32> -> vector<8x1xf32>
    %621 = vector.broadcast %620 : vector<8x1xf32> to vector<8x8xf32>
    %622 = arith.mulf %617, %621 : vector<8x8xf32>
    %cst_370 = arith.constant dense<0.000000e+00> : vector<8x8xf32>
    %623 = tpu.matmul %622, %609, %cst_370 {dimension_numbers = #tpu.dot_dimension_numbers<[1], [0], [0], [1], [0, 0, 1, 1], [], []>} : vector<8x8xf32>, vector<8x8xf32>, vector<8x8xf32> -> vector<8x8xf32>
    %c6_371 = arith.constant 6 : index
    %c0_372 = arith.constant 0 : index
    %c0_373 = arith.constant 0 : index
    %624 = vector.load %arg20[%c6_371, %c0_372, %c0_373] : memref<8x8x32xf32, #tpu.memory_space<vmem>>, vector<1x8x32xf32>
    %625 = vector.shape_cast %624 : vector<1x8x32xf32> to vector<8x32xf32>
    %cst_374 = arith.constant dense<0.000000e+00> : vector<8x32xf32>
    %626 = tpu.matmul %623, %625, %cst_374 {dimension_numbers = #tpu.dot_dimension_numbers<[1], [0], [0], [1], [0, 0, 1, 1], [], []>} : vector<8x8xf32>, vector<8x32xf32>, vector<8x32xf32> -> vector<8x32xf32>
    %627 = arith.addf %606, %626 : vector<8x32xf32>
    %628 = vector.extract_strided_slice %468 {offsets = [8, 0], sizes = [8, 8], strides = [1, 1]} : vector<16x8xf32> to vector<8x8xf32>
    %629 = vector.extract_strided_slice %475 {offsets = [8, 0], sizes = [8, 8], strides = [1, 1]} : vector<16x8xf32> to vector<8x8xf32>
    %630 = vector.extract_strided_slice %482 {offsets = [8, 0], sizes = [8, 8], strides = [1, 1]} : vector<16x8xf32> to vector<8x8xf32>
    %cst_375 = arith.constant dense<0.000000e+00> : vector<8x8xf32>
    %631 = tpu.matmul %628, %629, %cst_375 {dimension_numbers = #tpu.dot_dimension_numbers<[1], [1], [0], [0], [0, 0, 1, 0], [], []>} : vector<8x8xf32>, vector<8x8xf32>, vector<8x8xf32> -> vector<8x8xf32>
    %cst_376 = arith.constant 0.353553385 : f32
    %632 = vector.broadcast %cst_376 : f32 to vector<8x8xf32>
    %633 = arith.mulf %631, %632 : vector<8x8xf32>
    %cst_377 = arith.constant dense<0xFF800000> : vector<8xf32>
    %634 = vector.multi_reduction <maximumf>, %633, %cst_377 [1] : vector<8x8xf32> to vector<8xf32>
    %635 = vector.shape_cast %634 : vector<8xf32> to vector<8x1xf32>
    %636 = vector.broadcast %635 : vector<8x1xf32> to vector<8x8xf32>
    %637 = arith.subf %633, %636 : vector<8x8xf32>
    %638 = math.exp %637 : vector<8x8xf32>
    %cst_378 = arith.constant dense<0.000000e+00> : vector<8xf32>
    %639 = vector.multi_reduction <add>, %638, %cst_378 [1] : vector<8x8xf32> to vector<8xf32>
    %640 = vector.shape_cast %639 : vector<8xf32> to vector<8x1xf32>
    %641 = tpu.reciprocal %640 {approx = true} : vector<8x1xf32> -> vector<8x1xf32>
    %642 = vector.broadcast %641 : vector<8x1xf32> to vector<8x8xf32>
    %643 = arith.mulf %638, %642 : vector<8x8xf32>
    %cst_379 = arith.constant dense<0.000000e+00> : vector<8x8xf32>
    %644 = tpu.matmul %643, %630, %cst_379 {dimension_numbers = #tpu.dot_dimension_numbers<[1], [0], [0], [1], [0, 0, 1, 1], [], []>} : vector<8x8xf32>, vector<8x8xf32>, vector<8x8xf32> -> vector<8x8xf32>
    %c7_380 = arith.constant 7 : index
    %c0_381 = arith.constant 0 : index
    %c0_382 = arith.constant 0 : index
    %645 = vector.load %arg20[%c7_380, %c0_381, %c0_382] : memref<8x8x32xf32, #tpu.memory_space<vmem>>, vector<1x8x32xf32>
    %646 = vector.shape_cast %645 : vector<1x8x32xf32> to vector<8x32xf32>
    %cst_383 = arith.constant dense<0.000000e+00> : vector<8x32xf32>
    %647 = tpu.matmul %644, %646, %cst_383 {dimension_numbers = #tpu.dot_dimension_numbers<[1], [0], [0], [1], [0, 0, 1, 1], [], []>} : vector<8x8xf32>, vector<8x32xf32>, vector<8x32xf32> -> vector<8x32xf32>
    %648 = arith.addf %627, %647 : vector<8x32xf32>
    %649 = tpu.concatenate %565, %648 in 0 : vector<8x32xf32>, vector<8x32xf32> -> vector<16x32xf32>
    %c1_384 = arith.constant 1 : index
    %c0_385 = arith.constant 0 : index
    %c0_386 = arith.constant 0 : index
    %650 = vector.load %arg21[%c1_384, %c0_385, %c0_386] : memref<2x1x32xf32, #tpu.memory_space<vmem>>, vector<1x1x32xf32>
    %651 = vector.shape_cast %650 : vector<1x1x32xf32> to vector<1x32xf32>
    %652 = vector.broadcast %651 : vector<1x32xf32> to vector<16x32xf32>
    %653 = arith.addf %649, %652 : vector<16x32xf32>
    %654 = arith.addf %653, %398 : vector<16x32xf32>
    %c1_387 = arith.constant 1 : index
    %c0_388 = arith.constant 0 : index
    %c0_389 = arith.constant 0 : index
    %655 = vector.load %arg22[%c1_387, %c0_388, %c0_389] : memref<2x1x32xf32, #tpu.memory_space<vmem>>, vector<1x1x32xf32>
    %656 = vector.shape_cast %655 : vector<1x1x32xf32> to vector<1x32xf32>
    %c1_390 = arith.constant 1 : index
    %c0_391 = arith.constant 0 : index
    %c0_392 = arith.constant 0 : index
    %657 = vector.load %arg23[%c1_390, %c0_391, %c0_392] : memref<2x1x32xf32, #tpu.memory_space<vmem>>, vector<1x1x32xf32>
    %658 = vector.shape_cast %657 : vector<1x1x32xf32> to vector<1x32xf32>
    %cst_393 = arith.constant dense<0.000000e+00> : vector<16xf32>
    %659 = vector.multi_reduction <add>, %654, %cst_393 [1] : vector<16x32xf32> to vector<16xf32>
    %660 = vector.shape_cast %659 : vector<16xf32> to vector<16x1xf32>
    %cst_394 = arith.constant 3.200000e+01 : f32
    %661 = vector.broadcast %cst_394 : f32 to vector<16x1xf32>
    %662 = arith.divf %660, %661 : vector<16x1xf32>
    %663 = vector.broadcast %662 : vector<16x1xf32> to vector<16x32xf32>
    %664 = arith.subf %654, %663 : vector<16x32xf32>
    %665 = arith.mulf %664, %664 : vector<16x32xf32>
    %cst_395 = arith.constant dense<0.000000e+00> : vector<16xf32>
    %666 = vector.multi_reduction <add>, %665, %cst_395 [1] : vector<16x32xf32> to vector<16xf32>
    %667 = vector.shape_cast %666 : vector<16xf32> to vector<16x1xf32>
    %cst_396 = arith.constant 3.200000e+01 : f32
    %668 = vector.broadcast %cst_396 : f32 to vector<16x1xf32>
    %669 = arith.divf %667, %668 : vector<16x1xf32>
    %670 = vector.broadcast %662 : vector<16x1xf32> to vector<16x32xf32>
    %671 = arith.subf %654, %670 : vector<16x32xf32>
    %cst_397 = arith.constant 9.99999974E-6 : f32
    %672 = vector.broadcast %cst_397 : f32 to vector<16x1xf32>
    %673 = arith.addf %669, %672 : vector<16x1xf32>
    %674 = math.rsqrt %673 : vector<16x1xf32>
    %675 = vector.broadcast %674 : vector<16x1xf32> to vector<16x32xf32>
    %676 = arith.mulf %671, %675 : vector<16x32xf32>
    %677 = vector.broadcast %656 : vector<1x32xf32> to vector<16x32xf32>
    %678 = arith.mulf %676, %677 : vector<16x32xf32>
    %679 = vector.broadcast %658 : vector<1x32xf32> to vector<16x32xf32>
    %680 = arith.addf %678, %679 : vector<16x32xf32>
    %c1_398 = arith.constant 1 : index
    %c0_399 = arith.constant 0 : index
    %c0_400 = arith.constant 0 : index
    %681 = vector.load %arg24[%c1_398, %c0_399, %c0_400] : memref<2x1x32xf32, #tpu.memory_space<vmem>>, vector<1x1x32xf32>
    %682 = vector.shape_cast %681 : vector<1x1x32xf32> to vector<1x32xf32>
    %c1_401 = arith.constant 1 : index
    %c0_402 = arith.constant 0 : index
    %c0_403 = arith.constant 0 : index
    %683 = vector.load %arg25[%c1_401, %c0_402, %c0_403] : memref<2x1x32xf32, #tpu.memory_space<vmem>>, vector<1x1x32xf32>
    %684 = vector.shape_cast %683 : vector<1x1x32xf32> to vector<1x32xf32>
    %cst_404 = arith.constant dense<0.000000e+00> : vector<16xf32>
    %685 = vector.multi_reduction <add>, %680, %cst_404 [1] : vector<16x32xf32> to vector<16xf32>
    %686 = vector.shape_cast %685 : vector<16xf32> to vector<16x1xf32>
    %cst_405 = arith.constant 3.200000e+01 : f32
    %687 = vector.broadcast %cst_405 : f32 to vector<16x1xf32>
    %688 = arith.divf %686, %687 : vector<16x1xf32>
    %689 = vector.broadcast %688 : vector<16x1xf32> to vector<16x32xf32>
    %690 = arith.subf %680, %689 : vector<16x32xf32>
    %691 = arith.mulf %690, %690 : vector<16x32xf32>
    %cst_406 = arith.constant dense<0.000000e+00> : vector<16xf32>
    %692 = vector.multi_reduction <add>, %691, %cst_406 [1] : vector<16x32xf32> to vector<16xf32>
    %693 = vector.shape_cast %692 : vector<16xf32> to vector<16x1xf32>
    %cst_407 = arith.constant 3.200000e+01 : f32
    %694 = vector.broadcast %cst_407 : f32 to vector<16x1xf32>
    %695 = arith.divf %693, %694 : vector<16x1xf32>
    %696 = vector.broadcast %688 : vector<16x1xf32> to vector<16x32xf32>
    %697 = arith.subf %680, %696 : vector<16x32xf32>
    %cst_408 = arith.constant 9.99999974E-6 : f32
    %698 = vector.broadcast %cst_408 : f32 to vector<16x1xf32>
    %699 = arith.addf %695, %698 : vector<16x1xf32>
    %700 = math.rsqrt %699 : vector<16x1xf32>
    %701 = vector.broadcast %700 : vector<16x1xf32> to vector<16x32xf32>
    %702 = arith.mulf %697, %701 : vector<16x32xf32>
    %703 = vector.broadcast %682 : vector<1x32xf32> to vector<16x32xf32>
    %704 = arith.mulf %702, %703 : vector<16x32xf32>
    %705 = vector.broadcast %684 : vector<1x32xf32> to vector<16x32xf32>
    %706 = arith.addf %704, %705 : vector<16x32xf32>
    %c1_409 = arith.constant 1 : index
    %c0_410 = arith.constant 0 : index
    %c0_411 = arith.constant 0 : index
    %707 = vector.load %arg26[%c1_409, %c0_410, %c0_411] : memref<2x32x32xf32, #tpu.memory_space<vmem>>, vector<1x32x32xf32>
    %708 = vector.shape_cast %707 : vector<1x32x32xf32> to vector<32x32xf32>
    %cst_412 = arith.constant dense<0.000000e+00> : vector<16x32xf32>
    %709 = tpu.matmul %706, %708, %cst_412 {dimension_numbers = #tpu.dot_dimension_numbers<[1], [0], [0], [1], [0, 0, 1, 1], [], []>} : vector<16x32xf32>, vector<32x32xf32>, vector<16x32xf32> -> vector<16x32xf32>
    %c1_413 = arith.constant 1 : index
    %c0_414 = arith.constant 0 : index
    %c0_415 = arith.constant 0 : index
    %710 = vector.load %arg27[%c1_413, %c0_414, %c0_415] : memref<2x1x32xf32, #tpu.memory_space<vmem>>, vector<1x1x32xf32>
    %711 = vector.shape_cast %710 : vector<1x1x32xf32> to vector<1x32xf32>
    %712 = vector.broadcast %711 : vector<1x32xf32> to vector<16x32xf32>
    %713 = arith.addf %709, %712 : vector<16x32xf32>
    %714 = arith.mulf %713, %713 : vector<16x32xf32>
    %715 = arith.mulf %713, %714 : vector<16x32xf32>
    %cst_416 = arith.constant 4.471500e-02 : f32
    %716 = vector.broadcast %cst_416 : f32 to vector<16x32xf32>
    %717 = arith.mulf %716, %715 : vector<16x32xf32>
    %718 = arith.addf %713, %717 : vector<16x32xf32>
    %cst_417 = arith.constant 0.797884583 : f32
    %719 = vector.broadcast %cst_417 : f32 to vector<16x32xf32>
    %720 = arith.mulf %719, %718 : vector<16x32xf32>
    %721 = math.tanh %720 : vector<16x32xf32>
    %cst_418 = arith.constant 1.000000e+00 : f32
    %722 = vector.broadcast %cst_418 : f32 to vector<16x32xf32>
    %723 = arith.addf %722, %721 : vector<16x32xf32>
    %cst_419 = arith.constant 5.000000e-01 : f32
    %724 = vector.broadcast %cst_419 : f32 to vector<16x32xf32>
    %725 = arith.mulf %724, %723 : vector<16x32xf32>
    %726 = arith.mulf %713, %725 : vector<16x32xf32>
    %c1_420 = arith.constant 1 : index
    %c0_421 = arith.constant 0 : index
    %c0_422 = arith.constant 0 : index
    %727 = vector.load %arg28[%c1_420, %c0_421, %c0_422] : memref<2x32x32xf32, #tpu.memory_space<vmem>>, vector<1x32x32xf32>
    %728 = vector.shape_cast %727 : vector<1x32x32xf32> to vector<32x32xf32>
    %cst_423 = arith.constant dense<0.000000e+00> : vector<16x32xf32>
    %729 = tpu.matmul %726, %728, %cst_423 {dimension_numbers = #tpu.dot_dimension_numbers<[1], [0], [0], [1], [0, 0, 1, 1], [], []>} : vector<16x32xf32>, vector<32x32xf32>, vector<16x32xf32> -> vector<16x32xf32>
    %c1_424 = arith.constant 1 : index
    %c0_425 = arith.constant 0 : index
    %c0_426 = arith.constant 0 : index
    %730 = vector.load %arg29[%c1_424, %c0_425, %c0_426] : memref<2x1x32xf32, #tpu.memory_space<vmem>>, vector<1x1x32xf32>
    %731 = vector.shape_cast %730 : vector<1x1x32xf32> to vector<1x32xf32>
    %732 = vector.broadcast %731 : vector<1x32xf32> to vector<16x32xf32>
    %733 = arith.addf %729, %732 : vector<16x32xf32>
    %734 = arith.addf %733, %680 : vector<16x32xf32>
    %c0_427 = arith.constant 0 : index
    %c0_428 = arith.constant 0 : index
    %735 = vector.load %arg30[%c0_427, %c0_428] : memref<32x16xf32, #tpu.memory_space<vmem>>, vector<32x16xf32>
    %cst_429 = arith.constant dense<0.000000e+00> : vector<16x16xf32>
    %736 = tpu.matmul %734, %735, %cst_429 {dimension_numbers = #tpu.dot_dimension_numbers<[1], [0], [0], [1], [0, 0, 1, 1], [], []>} : vector<16x32xf32>, vector<32x16xf32>, vector<16x16xf32> -> vector<16x16xf32>
    %c0_430 = arith.constant 0 : index
    %c0_431 = arith.constant 0 : index
    %737 = vector.load %arg31[%c0_430, %c0_431] : memref<1x16xf32, #tpu.memory_space<vmem>>, vector<1x16xf32>
    %738 = vector.broadcast %737 : vector<1x16xf32> to vector<16x16xf32>
    %739 = arith.addf %736, %738 : vector<16x16xf32>
    %cst_432 = arith.constant 0.000000e+00 : f32
    %740 = vector.broadcast %cst_432 : f32 to vector<16x16xf32>
    %741 = arith.maximumf %739, %740 : vector<16x16xf32>
    %c0_433 = arith.constant 0 : index
    %c0_434 = arith.constant 0 : index
    %742 = vector.load %arg32[%c0_433, %c0_434] : memref<16x1xf32, #tpu.memory_space<vmem>>, vector<16x1xf32>
    %cst_435 = arith.constant dense<0.000000e+00> : vector<16x1xf32>
    %743 = tpu.matmul %741, %742, %cst_435 {dimension_numbers = #tpu.dot_dimension_numbers<[1], [0], [0], [1], [0, 0, 1, 1], [], []>} : vector<16x16xf32>, vector<16x1xf32>, vector<16x1xf32> -> vector<16x1xf32>
    %c0_436 = arith.constant 0 : index
    %c0_437 = arith.constant 0 : index
    %744 = vector.load %arg33[%c0_436, %c0_437] : memref<1x1xf32, #tpu.memory_space<vmem>>, vector<1x1xf32>
    %745 = vector.broadcast %744 : vector<1x1xf32> to vector<16x1xf32>
    %746 = arith.addf %743, %745 : vector<16x1xf32>
    %c0_438 = arith.constant 0 : index
    %c0_439 = arith.constant 0 : index
    %747 = vector.load %arg34[%c0_438, %c0_439] : memref<16x1xf32, #tpu.memory_space<vmem>>, vector<16x1xf32>
    tpu.vector_store %arg34[%c0_438, %c0_439], %746 {strides = array<i32>} : memref<16x1xf32, #tpu.memory_space<vmem>>, vector<16x1xf32>,
    return
  }
}

</mosaic_0001>

<bundles_post_ra>
// kernel: tpu_custom_call.1
= control target key start
LH: loop header
LB: loop body
LE: loop exit
PB: predicated region body
PF: predicated region fallthrough
CT: control target
= control target key end

     0   :  { %v8916_v0 = vmov 0   ;;  %s8917_s3 = smov 1   ;;  %s8918_s10 = smov 8   ;;  %v8919_v4 = vmov 1   ;;  %v8920_v7 = vmov 2   ;;  %v159_v9 = vlaneseq  ;;  %s9867_s0 = inlined_call_operand.smem [shape: u32[35], index: -1, kind: input, shape index: {}] }
   0x1   :  { %8823 = vset.pattern.permute.xlu1 %v8916_v0  ;;  %8822 = vset.pattern.permute.xlu0 %v8916_v0  ;;  %s7311_s6 = sld [smem:[%s9867_s0 + %s8917_s3]]   ;;  %s8921_s14 = smov 4   ;;  %vm216_vm0 = vcmask 64512   ;;  %vm429_vm1 = vcmask 130048   ;;  %vm443_vm2 = vcmask 261120   ;;  %vm8936_vm3 = vmmov 0  }
   0x2   :  { %s1_s9 = sld [smem:[%s9867_s0]]   ;;  %s8922_s18 = smov 6   ;;  %v160_v11 = vshrl.u32 %v159_v9, 7  ;;  %vm7304_vm4 = vcmask 7168  }
   0x3   :  { %s7318_s13 = sld [smem:[%s9867_s0 + %s8918_s10]]   ;;  %s8923_s22 = smov 7  }
   0x4   :  { %s7314_s17 = sld [smem:[%s9867_s0 + %s8921_s14]]   ;;  %s8924_s26 = smov 2   ;;  %v161_v16 = vsub.s32 0, %v160_v11  ;;  %v175_v17 = vsub.s32 1, %v160_v11  ;;  %v191_v26 = vsub.s32 2, %v160_v11 }
   0x5   :  { %s7316_s21 = sld [smem:[%s9867_s0 + %s8922_s18]]   ;;  %s8925_s30 = smov 3  }
   0x6   :  { %s7317_s25 = sld [smem:[%s9867_s0 + %s8923_s22]]   ;;  %s8926_s4 = smov 10  }
   0x7   :  { %v146_v1 = vld [vmem:[%s7311_s6] sm:$0xff]  ;;  %v147_v3 = vld [vmem:[%s7311_s6 + $0x8] sm:$0xff]  ;;  %s7312_s29 = sld [smem:[%s9867_s0 + %s8924_s26]]   ;;  %s8927_s8 = smov 9  }
   0x8   :  { %v144_v2 = vld [vmem:[%s1_s9] sm:$0xff]  ;;  %303 = vperm.xlu0 %8822, %v146_v1   ;;  %v145_v5 = vld [vmem:[%s1_s9 + $0x8] sm:$0xff]  ;;  %s7313_s3 = sld [smem:[%s9867_s0 + %s8925_s30]]   ;;  %s8928_s12 = smov 16  }
   0x9   :  { %151 = vperm.xlu1 %8823, %v144_v2   ;;  %v330_v6 = vld [vmem:[%s7318_s13] sm:$0xff]  ;;  %s7320_s7 = sld [smem:[%s9867_s0 + %s8926_s4]]   ;;  %s8929_s13 = smov 5  }
   0xa   :  { %7946 = vmatprep.subr.mxu1 %v330_v6  ;;  %v208_v8 = vld [vmem:[%s7314_s17] sm:$0xff]  ;;  %s7319_s11 = sld [smem:[%s9867_s0 + %s8927_s8]]   ;;  %s8930_s17 = smov 12  }
   0xb   :  { %7947 = vmatpush3.msra.mxu1 %v330_v6  ;;  %7941 = vmatprep.subr.mxu0 %v208_v8  ;;  %v7349_v10 = vld [vmem:[%s7316_s21] ss:$0 sm:$0xff]  ;;  %s7315_s16 = sld [smem:[%s9867_s0 + %s8929_s13]]   ;;  %s8931_s24 = smov 14  }
   0xc   :  { %308 = vperm.xlu0 %8822, %v147_v3   ;;  %7942 = vmatpush3.msra.mxu0 %v208_v8  ;;  %v7350_v14 = vld [vmem:[%s7317_s25] ss:$0 sm:$0xff]  ;;  %s7322_s20 = sld [smem:[%s9867_s0 + %s8930_s17]]   ;;  %s8932_s28 = smov 11  }
   0xd   :  { %8824 = vset.pattern.permute.xlu1 %v8919_v4  ;;  %v148_v18 = vld [vmem:[%s7312_s29] sm:$0x7]  ;;  %s9007_s23 = sld [smem:[%s9867_s0 + %s8928_s12]]   ;;  %s8933_s2 = smov 18  }
   0xe   :  { %166 = vperm.xlu1 %8824, %v144_v2   ;;  %v162_v24 = vrot.slane %v148_v18, %v161_v16  ;;  %v176_v25 = vrot.slane %v148_v18, %v175_v17  ;;  %v192_v33 = vrot.slane %v148_v18, %v191_v26  ;;  %v7345_v42 = vld [vmem:[%s7313_s3] ss:$0 sm:$0xff]  ;;  %s9014_s27 = sld [smem:[%s9867_s0 + %s8931_s24]]   ;;  %s8934_s6 = smov 13  }
   0xf   :  { %v432_v49 = vld [vmem:[%s7320_s7] sm:$0xff]  ;;  %v433_v50 = vld [vmem:[%s7320_s7 + $0x8] sm:$0xff]  ;;  %v434_v52 = vld [vmem:[%s7320_s7 + $0x10] sm:$0xff]  ;;  %s7321_s1 = sld [smem:[%s9867_s0 + %s8932_s28]]   ;;  %s8937_s10 = smov 15  }
  0x10   :  { %156 = vperm.xlu0 %8822, %v145_v5   ;;  %v8535_v51 = vpack.c.bf16 %v433_v50, %v432_v49  ;;  %v435_v53 = vld [vmem:[%s7320_s7 + $0x18] sm:$0xff]  ;;  %v7351_v55 = vld [vmem:[%s7319_s11] ss:$0 sm:$0xff]  ;;  %s9026_s5 = sld [smem:[%s9867_s0 + %s8933_s2]]   ;;  %s8938_s14 = smov 17  }
  0x11   :  { %v8539_v54 = vpack.c.bf16 %v435_v53, %v434_v52  ;;  %s7323_s9 = sld [smem:[%s9867_s0 + %s8934_s6]]   ;;  %s8939_s18 = smov 19  }
  0x12   :  { %170 = vperm.xlu1 %8824, %v145_v5   ;;  %8536 = vmatprep.subr.bf16.mxu0 %v8535_v51  ;;  %v527_v9 = vld [vmem:[%s7322_s20] sm:$0xff]  ;;  %s9136_s13 = sld [smem:[%s9867_s0 + %s8937_s10]]   ;;  %s8940_s22 = smov 20  }
  0x13   :  { %s9141_s17 = sld [smem:[%s9867_s0 + %s8938_s14]]   ;;  %s8941_s28 = smov 21  }
  0x14   :  { %8825 = vset.pattern.permute.xlu0 %v8920_v7  ;;  %v620_v16 = vld [vmem:[%s9014_s27 + $0x8] sm:$0xff]  ;;  %v622_v26 = vld [vmem:[%s9014_s27 + $0x18] sm:$0xff]  ;;  %s9148_s21 = sld [smem:[%s9867_s0 + %s8939_s18]]   ;;  %s8942_s2 = smov 22  }
  0x15   :  { %182 = vperm.xlu0 %8825, %v144_v2   ;;  %v7354_v18 = vld [vmem:[%s7321_s1] ss:$0 sm:$0xff]  ;;  %s9238_s26 = sld [smem:[%s9867_s0 + %s8940_s22]]   ;;  %s8943_s7 = smov 23  }
  0x16   :  { %8826 = vset.pattern.permute.xlu1 %v8920_v7  ;;  %v7385_v52 = vld [vmem:[%s9026_s5 + $0x20] sm:$0xff]  ;;  %v7386_v53 = vld [vmem:[%s9026_s5 + $0x28] sm:$0xff]  ;;  %s9375_s1 = sld [smem:[%s9867_s0 + %s8941_s28]]   ;;  %s8944_s11 = smov 24  }
  0x17   :  { %186 = vperm.xlu1 %8826, %v145_v5   ;;  %s9394_s6 = sld [smem:[%s9867_s0 + %s8942_s2]]   ;;  %s8946_s22 = smov 26  }
  0x18   :  { %s9399_s10 = sld [smem:[%s9867_s0 + %s8943_s7]]   ;;  %s8947_s29 = smov 28  }
  0x19   :  { %8827 = vset.pattern.permute.xlu0 %v8916_v0  ;;  %v7346_v0 = vld [vmem:[%s7315_s16] ss:$0 sm:$0xff]  ;;  %s9414_s15 = sld [smem:[%s9867_s0 + %s8944_s11]]   ;;  %s8945_s16 = smov 25  }
  0x1a   :  { %s9437_s28 = sld [smem:[%s9867_s0 + %s8946_s22]]   ;;  %s8948_s4 = smov 27  }
  0x1b   :  { %s9447_s3 = sld [smem:[%s9867_s0 + %s8947_s29]]   ;;  %s8949_s11 = smov 29  }
  0x1c   :  { %s8953_s19 = smov 31   ;;  %s8954_s25 = smov 34  }
  0x1d   :  { %s7341_s24 = sld [smem:[%s9867_s0 + %s8953_s19]]  }
  0x1e   :  { %s7344_s30 = sld [smem:[%s9867_s0 + %s8954_s25]]  }
  0x87   :  { %v304_v12 = vpop.permute.xlu0 %303 }
  0x88   :  { %v152_v13 = vpop.permute.xlu1 %151  ;;  %v317_v15 = vmul.f32 %v7349_v10, %v304_v12  ;;  %v711_v12 = vld [vmem:[%s9007_s23] sm:$0xff] }
  0x89   :  { %v163_v28 = vmul.f32 %v162_v24, %v152_v13  ;;  %v712_v13 = vld [vmem:[%s9007_s23 + $0x8] sm:$0xff] }
  0x8a   :  { %v326_v19 = vadd.f32 %v7350_v14, %v317_v15  ;;  %v619_v15 = vld [vmem:[%s9014_s27] sm:$0xff] }
  0x8b   :  { %v309_v20 = vpop.permute.xlu0 %308  ;;  %v8547_v17 = vpack.c.bf16 %v620_v16, %v619_v15  ;;  %v7411_v16 = vld [vmem:[%s9026_s5 + $0x50] sm:$0xff] }
  0x8c   :  { %v318_v21 = vmul.f32 %v7349_v10, %v309_v20  ;;  %v328_v23 = vmax.f32 %v326_v19, 0.0  ;;  %v528_v10 = vld [vmem:[%s7322_s20 + $0x8] sm:$0xff]  ;;  %s9419_s20 = sld [smem:[%s9867_s0 + %s8945_s16]]  }
  0x8d   :  { %v167_v22 = vpop.permute.xlu1 %166  ;;  %v8543_v11 = vpack.c.bf16 %v528_v10, %v527_v9  ;;  %v7409_v9 = vld [vmem:[%s9026_s5 + $0x40] sm:$0xff]  ;;  %v7410_v10 = vld [vmem:[%s9026_s5 + $0x48] sm:$0xff]  ;;  %s9476_s16 = sld [smem:[%s9867_s0 + %s8949_s11]]  }
  0x8e   :  { %v327_v27 = vadd.f32 %v7350_v14, %v318_v21  ;;  %7948 = vmatprep.mubr.msk.f32.mxu1 %vm216_vm0, %v328_v23  ;;  %v177_v29 = vmul.f32 %v176_v25, %v167_v22  ;;  %v8555_v14 = vpack.c.bf16 %v712_v13, %v711_v12  ;;  %v7417_v12 = vld [vmem:[%s9014_s27 + $0x60] sm:$0xff]  ;;  %v7418_v13 = vld [vmem:[%s9014_s27 + $0x68] sm:$0xff] }
  0x8f   :  { %v157_v30 = vpop.permute.xlu0 %156  ;;  %8544 = vmatprep.subr.bf16.mxu1 %v8543_v11  ;;  %v8619_v15 = vpack.c.bf16 %v7418_v13, %v7417_v12 }
  0x90   :  { %v329_v31 = vmax.f32 %v327_v27, 0.0  ;;  %v164_v34 = vmul.f32 %v162_v24, %v157_v30  ;;  %v179_v36 = vadd.f32 %v177_v29, %v163_v28  ;;  %v713_v27 = vld [vmem:[%s9007_s23 + $0x10] sm:$0xff]  ;;  %v714_v29 = vld [vmem:[%s9007_s23 + $0x18] sm:$0xff] }
  0x91   :  { %v171_v32 = vpop.permute.xlu1 %170  ;;  %v8559_v30 = vpack.c.bf16 %v714_v29, %v713_v27  ;;  %v7428_v29 = vld [vmem:[%s9007_s23 + $0x78] sm:$0xff] }
  0x92   :  { %v178_v35 = vmul.f32 %v176_v25, %v171_v32  ;;  %7949 = vmatmul.mubr.msk.f32.vlgmr.msra.gmra.mrb[0].mxu1 %vm216_vm0, %v329_v31  ;;  %v621_v25 = vld [vmem:[%s9014_s27 + $0x10] sm:$0xff]  ;;  %v797_v31 = vld [vmem:[%s9026_s5] sm:$0xff]  ;;  %v798_v32 = vld [vmem:[%s9026_s5 + $0x8] sm:$0xff] }
  0x93   :  { %8546 = vmatpush3.bf16.msra.mxu1 %v8543_v11  ;;  %v8551_v28 = vpack.c.bf16 %v622_v26, %v621_v25  ;;  %v7434_v25 = vld [vmem:[%s9026_s5 + $0x68] sm:$0xff] }
  0x94   :  { %v183_v37 = vpop.permute.xlu0 %182  ;;  %v180_v40 = vadd.f32 %v178_v35, %v164_v34  ;;  %8548 = vmatprep.subr.bf16.mxu1 %v8547_v17  ;;  %v8563_v34 = vpack.c.bf16 %v798_v32, %v797_v31  ;;  %v7370_v35 = vld [vmem:[%s9014_s27 + $0x28] sm:$0xff]  ;;  %v7436_v31 = vld [vmem:[%s9026_s5 + $0x78] sm:$0xff] }
  0x95   :  { %v193_v38 = vmul.f32 %v192_v33, %v183_v37  ;;  %v7357_v37 = vld [vmem:[%s7323_s9] ss:$0 sm:$0xff]  ;;  %s9460_s9 = sld [smem:[%s9867_s0 + %s8948_s4]]  }
  0x96   :  { %v187_v39 = vpop.permute.xlu1 %186 }
  0x97   :  { %v194_v41 = vmul.f32 %v192_v33, %v187_v39  ;;  %v195_v43 = vadd.f32 %v193_v38, %v179_v36  ;;  %v7369_v33 = vld [vmem:[%s9014_s27 + $0x20] sm:$0xff] }
  0x98   :  { %v8571_v36 = vpack.c.bf16 %v7370_v35, %v7369_v33  ;;  %v7360_v35 = vld [vmem:[%s9136_s13] ss:$0 sm:$0xff] }
  0x99   :  { %v196_v44 = vadd.f32 %v194_v41, %v180_v40  ;;  %v204_v45 = vadd.f32 %v7345_v42, %v195_v43  ;;  %v800_v43 = vld [vmem:[%s9026_s5 + $0x18] sm:$0xff] }
  0x9b   :  { %v205_v46 = vadd.f32 %v7345_v42, %v196_v44  ;;  %v206_v47 = vmax.f32 %v204_v45, 0.0  ;;  %v799_v42 = vld [vmem:[%s9026_s5 + $0x10] sm:$0xff]  ;;  %v7372_v45 = vld [vmem:[%s9014_s27 + $0x38] sm:$0xff] }
  0x9c   :  { %v7371_v44 = vld [vmem:[%s9014_s27 + $0x30] sm:$0xff]  ;;  %v8567_v49 = vpack.c.bf16 %v800_v43, %v799_v42 }
  0x9d   :  { %v207_v48 = vmax.f32 %v205_v46, 0.0  ;;  %7943 = vmatprep.mubr.msk.f32.mxu0 %vm216_vm0, %v206_v47  ;;  %v8575_v50 = vpack.c.bf16 %v7372_v45, %v7371_v44  ;;  %v7366_v45 = vld [vmem:[%s9148_s21] ss:$0 sm:$0xff] }
  0x9f   :  { %7944 = vmatmul.mubr.msk.f32.vlgmr.msra.gmra.mrb[0].mxu0 %vm216_vm0, %v207_v48  ;;  %v7377_v48 = vld [vmem:[%s9007_s23 + $0x20] sm:$0xff] }
  0xa0   :  { %8538 = vmatpush3.bf16.msra.mxu0 %v8535_v51  ;;  %v7378_v51 = vld [vmem:[%s9007_s23 + $0x28] sm:$0xff] }
  0xa1   :  { %8540 = vmatprep.subr.bf16.mxu0 %v8539_v54 }
  0xa4   :  { %8542 = vmatpush3.bf16.msra.mxu0 %v8539_v54  ;;  %v8579_v54 = vpack.c.bf16 %v7378_v51, %v7377_v48  ;;  %v7374_v48 = vld [vmem:[%s9136_s13 + $0x1] ss:$0 sm:$0xff] }
  0xa5   :  { %8556 = vmatprep.subr.bf16.mxu0 %v8555_v14 }
 0x165   :  { %v7950_v56 = vpop.f32.mrb[0].mxu1 }
 0x166   :  { %v416_v57 = vadd.f32 %v7950_v56, %v7351_v55  ;;  %v410_v58 = vpop.f32.mrb[1].mxu1  ;;  %v7379_v56 = vld [vmem:[%s9007_s23 + $0x30] sm:$0xff] }
 0x167   :  { %v411_v59 = vadd.f32 %v7351_v55, %v410_v58  ;;  %v8587_v55 = vpack.c.bf16 %v7386_v53, %v7385_v52  ;;  %v7387_v58 = vld [vmem:[%s9026_s5 + $0x30] sm:$0xff] }
 0x168   :  { %v420_v60 = vmax.f32 %v416_v57, 0.0  ;;  %v7380_v57 = vld [vmem:[%s9007_s23 + $0x38] sm:$0xff] }
 0x169   :  { %v419_v61 = vmax.f32 %v411_v59, 0.0  ;;  %v7388_v59 = vld [vmem:[%s9026_s5 + $0x38] sm:$0xff] }
 0x16a   :  { %425 = vrot.lane.b32.xlu0 %v420_v60, %s8928_s12  ;;  %v8583_v60 = vpack.c.bf16 %v7380_v57, %v7379_v56  ;;  %v7382_v56 = vld [vmem:[%s9141_s17 + $0x1] ss:$0 sm:$0xff] }
 0x16b   :  { %423 = vrot.lane.b32.xlu1 %v419_v61, %s8928_s12  ;;  %v8591_v61 = vpack.c.bf16 %v7388_v59, %v7387_v58  ;;  %v9168_v57 = vld [vmem:[%s9148_s21 + $0x1] ss:$0 sm:$0xff] }
 0x172   :  { %v7945_v62 = vpop.f32.mrb[0].mxu0 }
 0x173   :  { %v289_v63 = vpop.f32.mrb[1].mxu0  ;;  %v295_v2 = vadd.f32 %v7945_v62, %v7346_v0  ;;  %v7393_v62 = vld [vmem:[%s9014_s27 + $0x40] sm:$0xff] }
 0x174   :  { %v290_v1 = vadd.f32 %v7346_v0, %v289_v63  ;;  %v7394_v63 = vld [vmem:[%s9014_s27 + $0x48] sm:$0xff]  ;;  %v7401_v0 = vld [vmem:[%s9007_s23 + $0x40] sm:$0xff] }
 0x175   :  { %v299_v5 = vmax.f32 %v295_v2, 0.0  ;;  %v8595_v2 = vpack.c.bf16 %v7394_v63, %v7393_v62 }
 0x176   :  { %v298_v3 = vmax.f32 %v290_v1, 0.0  ;;  %v7402_v1 = vld [vmem:[%s9007_s23 + $0x48] sm:$0xff] }
 0x1dc   :  { %v426_v4 = vpop.permute.xlu0 %425 }
 0x1dd   :  { %v424_v6 = vpop.permute.xlu1 %423  ;;  %v431_v8 = vsel %vm429_vm1, %v299_v5, %v426_v4  ;;  %v7395_v4 = vld [vmem:[%s9014_s27 + $0x50] sm:$0xff]  ;;  %v7396_v5 = vld [vmem:[%s9014_s27 + $0x58] sm:$0xff] }
 0x1de   :  { %v430_v7 = vsel %vm429_vm1, %v298_v3, %v424_v6  ;;  %v8603_v3 = vpack.c.bf16 %v7402_v1, %v7401_v0  ;;  %v7403_v6 = vld [vmem:[%s9007_s23 + $0x50] sm:$0xff] }
 0x1df   :  { %7959 = vmatprep.mubr.msk.f32.mxu0 %vm443_vm2, %v430_v7  ;;  %v7404_v7 = vld [vmem:[%s9007_s23 + $0x58] sm:$0xff] }
 0x1e0   :  { %7960 = vmatmul.mubr.msk.f32.vlgmr.msra.gmra.mrb[2].mxu0 %vm443_vm2, %v431_v8  ;;  %v8599_v8 = vpack.c.bf16 %v7396_v5, %v7395_v4  ;;  %v8607_v11 = vpack.c.bf16 %v7404_v7, %v7403_v6 }
 0x1e1   :  { %8558 = vmatpush3.bf16.msra.mxu0 %v8555_v14  ;;  %v8611_v14 = vpack.c.bf16 %v7410_v10, %v7409_v9  ;;  %v9197_v10 = vld [vmem:[%s9148_s21 + $0x2] ss:$0 sm:$0xff] }
 0x1e2   :  { %8560 = vmatprep.subr.bf16.mxu0 %v8559_v30 }
 0x1e5   :  { %8562 = vmatpush3.bf16.msra.mxu0 %v8559_v30  ;;  %v7435_v30 = vld [vmem:[%s9026_s5 + $0x70] sm:$0xff] }
 0x1e6   :  { %8572 = vmatprep.subr.bf16.mxu0 %v8571_v36  ;;  %v8639_v33 = vpack.c.bf16 %v7436_v31, %v7435_v30 }
 0x2b3   :  { %v7961_v19 = vpop.f32.mrb[2].mxu0 }
 0x2b4   :  { %v522_v20 = vadd.f32 %v7961_v19, %v7354_v18  ;;  %v516_v21 = vpop.f32.mrb[3].mxu0  ;;  %v7420_v19 = vld [vmem:[%s9014_s27 + $0x78] sm:$0xff] }
 0x2b5   :  { %v517_v22 = vadd.f32 %v7354_v18, %v516_v21  ;;  %v7419_v18 = vld [vmem:[%s9014_s27 + $0x70] sm:$0xff]  ;;  %v7425_v21 = vld [vmem:[%s9007_s23 + $0x60] sm:$0xff] }
 0x2b6   :  { %v526_v24 = vmax.f32 %v522_v20, 0.0 }
 0x2b7   :  { %v525_v23 = vmax.f32 %v517_v22, 0.0  ;;  %v7426_v22 = vld [vmem:[%s9007_s23 + $0x68] sm:$0xff] }
 0x2b8   :  { %v8627_v26 = vpack.c.bf16 %v7426_v22, %v7425_v21 }
 0x2b9   :  { %7966 = vmatprep.mubr.msk.f32.mxu1 %vm429_vm1, %v525_v23  ;;  %v8623_v23 = vpack.c.bf16 %v7420_v19, %v7419_v18  ;;  %v9211_v18 = vld [vmem:[%s9141_s17 + $0x3] ss:$0 sm:$0xff] }
 0x2ba   :  { %7967 = vmatmul.mubr.msk.f32.vlgmr.msra.gmra.mrb[2].mxu1 %vm429_vm1, %v526_v24  ;;  %v7433_v24 = vld [vmem:[%s9026_s5 + $0x60] sm:$0xff] }
 0x2bb   :  { %8550 = vmatpush3.bf16.msra.mxu1 %v8547_v17  ;;  %v7412_v17 = vld [vmem:[%s9026_s5 + $0x58] sm:$0xff]  ;;  %v8635_v27 = vpack.c.bf16 %v7434_v25, %v7433_v24  ;;  %v9214_v19 = vld [vmem:[%s9148_s21 + $0x3] ss:$0 sm:$0xff] }
 0x2bc   :  { %8552 = vmatprep.subr.bf16.mxu1 %v8551_v28  ;;  %v8615_v20 = vpack.c.bf16 %v7412_v17, %v7411_v16 }
 0x2bf   :  { %8554 = vmatpush3.bf16.msra.mxu1 %v8551_v28  ;;  %v7427_v28 = vld [vmem:[%s9007_s23 + $0x70] sm:$0xff] }
 0x2c0   :  { %8564 = vmatprep.subr.bf16.mxu1 %v8563_v34  ;;  %v8631_v32 = vpack.c.bf16 %v7428_v29, %v7427_v28 }
 0x38d   :  { %v7968_v38 = vpop.f32.mrb[2].mxu1 }
 0x38e   :  { %v614_v39 = vadd.f32 %v7968_v38, %v7357_v37  ;;  %v608_v40 = vpop.f32.mrb[3].mxu1 }
 0x38f   :  { %v609_v41 = vadd.f32 %v7357_v37, %v608_v40 }
 0x390   :  { %v9045_v47 = vmax.f32 %v614_v39, 0.0 }
 0x391   :  { %v9043_v46 = vmax.f32 %v609_v41, 0.0 }
 0x393   :  { %7977 = vmatprep.mubr.msk.f32.mxu1 %vm443_vm2, %v9043_v46  ;;  %7988 = vmatprep.mubr.msk.f32.mxu0 %vm443_vm2, %v9043_v46 }
 0x394   :  { %7978 = vmatmul.mubr.msk.f32.vlgmr.msra.gmra.mrb[4].mxu1 %vm443_vm2, %v9045_v47  ;;  %7989 = vmatmul.mubr.msk.f32.vlgmr.msra.gmra.mrb[4].mxu0 %vm443_vm2, %v9045_v47 }
 0x395   :  { %8566 = vmatpush3.bf16.msra.mxu1 %v8563_v34  ;;  %8574 = vmatpush3.bf16.msra.mxu0 %v8571_v36  ;;  %v8935_v34 = vmov 0.0   ;;  %v7363_v36 = vld [vmem:[%s9141_s17] ss:$0 sm:$0xff] }
 0x396   :  { %7999 = vmatprep.mubr.msk.f32.mxu1 %vm443_vm2, %v9043_v46  ;;  %8010 = vmatprep.mubr.msk.f32.mxu0 %vm443_vm2, %v9043_v46 }
 0x397   :  { %8568 = vmatprep.subr.bf16.mxu1 %v8567_v49  ;;  %8576 = vmatprep.subr.bf16.mxu0 %v8575_v50 }
 0x399   :  { %8570 = vmatpush3.bf16.msra.mxu1 %v8567_v49  ;;  %8578 = vmatpush3.bf16.msra.mxu0 %v8575_v50 }
 0x39a   :  { %8580 = vmatprep.subr.bf16.mxu1 %v8579_v54  ;;  %8588 = vmatprep.subr.bf16.mxu0 %v8587_v55 }
 0x39c   :  { %8000 = vmatmul.mubr.msk.f32.vlgmr.msra.gmra.mrb[6].mxu1 %vm443_vm2, %v9045_v47  ;;  %8011 = vmatmul.mubr.msk.f32.vlgmr.msra.gmra.mrb[6].mxu0 %vm443_vm2, %v9045_v47 }
 0x39d   :  { %8582 = vmatpush3.bf16.msra.mxu1 %v8579_v54  ;;  %8021 = vmatprep.mubr.msk.f32.mxu1 %vm443_vm2, %v9043_v46 }
 0x39e   :  { %8590 = vmatpush3.bf16.msra.mxu0 %v8587_v55  ;;  %8032 = vmatprep.mubr.msk.f32.mxu0 %vm443_vm2, %v9043_v46 }
 0x39f   :  { %8584 = vmatprep.subr.bf16.mxu1 %v8583_v60  ;;  %8592 = vmatprep.subr.bf16.mxu0 %v8591_v61 }
 0x3a1   :  { %8586 = vmatpush3.bf16.msra.mxu1 %v8583_v60 }
 0x3a2   :  { %8594 = vmatpush3.bf16.msra.mxu0 %v8591_v61  ;;  %8596 = vmatprep.subr.bf16.mxu1 %v8595_v2 }
 0x3a3   :  { %8604 = vmatprep.subr.bf16.mxu0 %v8603_v3 }
 0x3a4   :  { %8022 = vmatmul.mubr.msk.f32.vlgmr.msra.gmra.mrb[8].mxu1 %vm443_vm2, %v9045_v47 }
 0x3a5   :  { %8033 = vmatmul.mubr.msk.f32.vlgmr.msra.gmra.mrb[8].mxu0 %vm443_vm2, %v9045_v47  ;;  %8598 = vmatpush3.bf16.msra.mxu1 %v8595_v2  ;;  %v9178_v2 = vld [vmem:[%s9136_s13 + $0x2] ss:$0 sm:$0xff] }
 0x3a6   :  { %8043 = vmatprep.mubr.msk.f32.mxu1 %vm443_vm2, %v9043_v46  ;;  %8606 = vmatpush3.bf16.msra.mxu0 %v8603_v3  ;;  %v9182_v3 = vld [vmem:[%s9141_s17 + $0x2] ss:$0 sm:$0xff] }
 0x3a7   :  { %8054 = vmatprep.mubr.msk.f32.mxu0 %vm443_vm2, %v9043_v46  ;;  %8600 = vmatprep.subr.bf16.mxu1 %v8599_v8 }
 0x3a8   :  { %8608 = vmatprep.subr.bf16.mxu0 %v8607_v11 }
 0x3a9   :  { %8602 = vmatpush3.bf16.msra.mxu1 %v8599_v8 }
 0x3aa   :  { %8610 = vmatpush3.bf16.msra.mxu0 %v8607_v11  ;;  %8612 = vmatprep.subr.bf16.mxu1 %v8611_v14  ;;  %v9200_v11 = vld [vmem:[%s9136_s13 + $0x3] ss:$0 sm:$0xff] }
 0x3ab   :  { %8620 = vmatprep.subr.bf16.mxu0 %v8619_v15 }
 0x3ac   :  { %8044 = vmatmul.mubr.msk.f32.vlgmr.msra.gmra.mrb[10].mxu1 %vm443_vm2, %v9045_v47 }
 0x3ad   :  { %8055 = vmatmul.mubr.msk.f32.vlgmr.msra.gmra.mrb[10].mxu0 %vm443_vm2, %v9045_v47  ;;  %8614 = vmatpush3.bf16.msra.mxu1 %v8611_v14 }
 0x3ae   :  { %8065 = vmatprep.mubr.msk.f32.mxu1 %vm443_vm2, %v9043_v46  ;;  %8622 = vmatpush3.bf16.msra.mxu0 %v8619_v15 }
 0x3af   :  { %8076 = vmatprep.mubr.msk.f32.mxu0 %vm443_vm2, %v9043_v46  ;;  %8616 = vmatprep.subr.bf16.mxu1 %v8615_v20 }
 0x3b0   :  { %8624 = vmatprep.subr.bf16.mxu0 %v8623_v23 }
 0x3b1   :  { %8618 = vmatpush3.bf16.msra.mxu1 %v8615_v20 }
 0x3b2   :  { %8626 = vmatpush3.bf16.msra.mxu0 %v8623_v23  ;;  %8628 = vmatprep.subr.bf16.mxu1 %v8627_v26 }
 0x3b3   :  { %8636 = vmatprep.subr.bf16.mxu0 %v8635_v27 }
 0x3b4   :  { %8066 = vmatmul.mubr.msk.f32.vlgmr.msra.gmra.mrb[12].mxu1 %vm443_vm2, %v9045_v47 }
 0x3b5   :  { %8077 = vmatmul.mubr.msk.f32.vlgmr.msra.gmra.mrb[12].mxu0 %vm443_vm2, %v9045_v47  ;;  %8630 = vmatpush3.bf16.msra.mxu1 %v8627_v26 }
 0x3b6   :  { %8087 = vmatprep.mubr.msk.f32.mxu1 %vm443_vm2, %v9043_v46  ;;  %8638 = vmatpush3.bf16.msra.mxu0 %v8635_v27 }
 0x3b7   :  { %8098 = vmatprep.mubr.msk.f32.mxu0 %vm443_vm2, %v9043_v46  ;;  %8632 = vmatprep.subr.bf16.mxu1 %v8631_v32 }
 0x3b8   :  { %8640 = vmatprep.subr.bf16.mxu0 %v8639_v33 }
 0x3b9   :  { %8634 = vmatpush3.bf16.msra.mxu1 %v8631_v32 }
 0x3ba   :  { %8642 = vmatpush3.bf16.msra.mxu0 %v8639_v33  ;;  %8101 = vmatprep.subr.mxu1 %v8935_v34 }
 0x3bb   :  { %8106 = vmatprep.subr.mxu0 %v8935_v34 }
 0x3bc   :  { %8088 = vmatmul.mubr.msk.f32.vlgmr.msra.gmra.mrb[14].mxu1 %vm443_vm2, %v9045_v47 }
 0x3bd   :  { %8099 = vmatmul.mubr.msk.f32.vlgmr.msra.gmra.mrb[14].mxu0 %vm443_vm2, %v9045_v47  ;;  %8103 = vmatprep.mubr.msk.f32.mxu1 %vm8936_vm3, %v8935_v34 }
 0x3be   :  { %8108 = vmatprep.mubr.msk.f32.mxu0 %vm8936_vm3, %v8935_v34 }
 0x467   :  { %v7979_v37 = vpop.f32.mrb[4].mxu1  ;;  %v7990_v38 = vpop.f32.mrb[4].mxu0 }
 0x468   :  { %v9150_v39 = vadd.f32 %v7979_v37, %v7360_v35  ;;  %v9152_v40 = vadd.f32 %v7990_v38, %v7363_v36  ;;  %v702_v41 = vpop.f32.mrb[5].mxu1  ;;  %v788_v42 = vpop.f32.mrb[5].mxu0 }
 0x469   :  { %v789_v43 = vadd.f32 %v7363_v36, %v788_v42  ;;  %v703_v44 = vadd.f32 %v7360_v35, %v702_v41 }
 0x46b   :  { %8102 = vmatpush3.xpose.msk.msra.mxu1 %vm216_vm0, %v789_v43 }
 0x46c   :  { %8111 = vmatprep.subr.mxu1 %v8935_v34 }
 0x46e   :  { %8104 = vmatmul.mubr.msk.f32.vlgmr.msra.gmra.mrb[16].mxu1 %vm216_vm0, %v703_v44 }
 0x46f   :  { %v8001_v49 = vpop.f32.mrb[6].mxu1  ;;  %v8012_v50 = vpop.f32.mrb[6].mxu0  ;;  %8113 = vmatprep.mubr.msk.f32.mxu1 %vm8936_vm3, %v8935_v34 }
 0x470   :  { %v9161_v51 = vadd.f32 %v8001_v49, %v7366_v45  ;;  %v9163_v52 = vadd.f32 %v8012_v50, %v7374_v48  ;;  %v874_v53 = vpop.f32.mrb[7].mxu1  ;;  %v962_v54 = vpop.f32.mrb[7].mxu0 }
 0x471   :  { %v875_v55 = vadd.f32 %v7366_v45, %v874_v53  ;;  %v963_v1 = vadd.f32 %v7374_v48, %v962_v54 }
 0x473   :  { %8107 = vmatpush3.msra.mxu0 %v875_v55 }
 0x474   :  { %8116 = vmatprep.subr.mxu0 %v8935_v34 }
 0x477   :  { %v8023_v58 = vpop.f32.mrb[8].mxu1 }
 0x478   :  { %v9170_v59 = vadd.f32 %v8023_v58, %v7382_v56  ;;  %v8034_v60 = vpop.f32.mrb[8].mxu0  ;;  %v1050_v61 = vpop.f32.mrb[9].mxu1  ;;  %v9241_v58 = vld [vmem:[%s9238_s26] sm:$0xff] }
 0x479   :  { %v9173_v62 = vadd.f32 %v8034_v60, %v9168_v57  ;;  %v1051_v63 = vadd.f32 %v7382_v56, %v1050_v61  ;;  %v1138_v0 = vpop.f32.mrb[9].mxu0  ;;  %v9249_v60 = vld [vmem:[%s9238_s26 + $0x8] sm:$0xff] }
 0x47a   :  { %v1139_v54 = vadd.f32 %v9168_v57, %v1138_v0 }
 0x47b   :  { %8112 = vmatpush3.xpose.msk.msra.mxu1 %vm216_vm0, %v1051_v63 }
 0x47c   :  { %8121 = vmatprep.subr.mxu1 %v8935_v34 }
 0x47e   :  { %8114 = vmatmul.mubr.msk.f32.vlgmr.msra.gmra.mrb[18].mxu1 %vm216_vm0, %v963_v1 }
 0x47f   :  { %v8045_v4 = vpop.f32.mrb[10].mxu1  ;;  %8123 = vmatprep.mubr.msk.f32.mxu1 %vm8936_vm3, %v8935_v34  ;;  %8122 = vmatpush3.msra.mxu1 %v9249_v60 }
 0x480   :  { %v9187_v5 = vadd.f32 %v8045_v4, %v9178_v2  ;;  %v8056_v6 = vpop.f32.mrb[10].mxu0  ;;  %v9189_v7 = vpop.f32.mrb[11].mxu1  ;;  %8131 = vmatprep.subr.mxu1 %v8935_v34 }
 0x481   :  { %v9192_v8 = vadd.f32 %v8056_v6, %v9182_v3  ;;  %v9194_v9 = vpop.f32.mrb[11].mxu0 }
 0x482   :  { %v1315_v1 = vadd.f32 %v9182_v3, %v9194_v9 }
 0x487   :  { %v8067_v12 = vpop.f32.mrb[12].mxu1 }
 0x488   :  { %v9203_v13 = vadd.f32 %v8067_v12, %v9197_v10  ;;  %v8078_v14 = vpop.f32.mrb[12].mxu0  ;;  %v1402_v15 = vpop.f32.mrb[13].mxu1 }
 0x489   :  { %v9206_v16 = vadd.f32 %v8078_v14, %v9200_v11  ;;  %v9208_v17 = vpop.f32.mrb[13].mxu0  ;;  %v1403_v61 = vadd.f32 %v9197_v10, %v1402_v15  ;;  %v1227_v10 = vadd.f32 %v9178_v2, %v9189_v7 }
 0x48f   :  { %v8089_v20 = vpop.f32.mrb[14].mxu1 }
 0x490   :  { %v9217_v21 = vadd.f32 %v8089_v20, %v9211_v18  ;;  %v8100_v22 = vpop.f32.mrb[14].mxu0  ;;  %v9219_v23 = vpop.f32.mrb[15].mxu1 }
 0x491   :  { %v9222_v24 = vadd.f32 %v8100_v22, %v9214_v19  ;;  %v9224_v25 = vpop.f32.mrb[15].mxu0 }
 0x541   :  { %v1747_v26 = vpop.f32.mrb[16].mxu1 }
 0x542   :  { %v1751_v27 = vmul.f32 0.35355338, %v1747_v26  ;;  %v8105_v28 = vpop.f32.mrb[17].mxu1 }
 0x544   :  { %v1752_v29 = vsel %vm216_vm0, %v1751_v27, -inf }
 0x545   :  { %1753 = vmax.xlane.f32.xlu1 %v1752_v29 }
 0x551   :  { %v1909_v30 = vpop.f32.mrb[18].mxu1 }
 0x552   :  { %v1913_v31 = vmul.f32 0.35355338, %v1909_v30  ;;  %v8115_v32 = vpop.f32.mrb[19].mxu1 }
 0x554   :  { %v1914_v33 = vsel %vm216_vm0, %v1913_v31, -inf }
 0x555   :  { %1915 = vmax.xlane.f32.xlu0 %v1914_v33 }
 0x5d2   :  { %v1754_v35 = vpop.xlane.xlu1 %1753 }
 0x5d3   :  { %v1755_v36 = vsub.f32 %v1751_v27, %v1754_v35 }
 0x5d5   :  { %v1756_v37 = vmul.f32 1.442695, %v1755_v36  ;;  %v1579_v36 = vadd.f32 %v9211_v18, %v9219_v23  ;;  %v1667_v18 = vadd.f32 %v9214_v19, %v9224_v25 }
 0x5d7   :  { %8828 = vpow2.f32 %v1756_v37  ;;  %v1491_v37 = vadd.f32 %v9200_v11, %v9208_v17 }
 0x5e1   :  { %v8829_v38 = vpop.eup %8828 }
 0x5e2   :  { %v1916_v41 = vpop.xlane.xlu0 %1915  ;;  %v1758_v42 = vsel %vm216_vm0, %v8829_v38, 0.0 }
 0x5e3   :  { %v1917_v43 = vsub.f32 %v1913_v31, %v1916_v41  ;;  %1759 = vadd.xlane.f32.xlu0 %v1758_v42  ;;  %v9273_v31 = vld [vmem:[%s9238_s26 + $0x10] sm:$0xff] }
 0x5e5   :  { %v1918_v44 = vmul.f32 1.442695, %v1917_v43 }
 0x5e7   :  { %8830 = vpow2.f32 %v1918_v44 }
 0x5f1   :  { %v8831_v45 = vpop.eup %8830 }
 0x5f2   :  { %v1920_v48 = vsel %vm216_vm0, %v8831_v45, 0.0 }
 0x5f3   :  { %1921 = vadd.xlane.f32.xlu1 %v1920_v48  ;;  %v9298_v48 = vld [vmem:[%s9238_s26 + $0x18] sm:$0xff] }
 0x670   :  { %v1760_v49 = vpop.xlane.xlu0 %1759 }
 0x671   :  { %8832 = vrcp.f32 %v1760_v49 }
 0x67b   :  { %v8833_v50 = vpop.eup %8832 }
 0x67c   :  { %v1762_v53 = vmul.f32 %v8833_v50, %v8829_v38 }
 0x67e   :  { %8109 = vmatmul.mubr.msk.f32.vlgmr.msra.gmra.mrb[16].mxu0 %vm216_vm0, %v1762_v53 }
 0x67f   :  { %8117 = vmatpush3.msra.mxu0 %v1139_v54  ;;  %8118 = vmatprep.mubr.msk.f32.mxu0 %vm8936_vm3, %v8935_v34 }
 0x680   :  { %v1922_v55 = vpop.xlane.xlu1 %1921  ;;  %8126 = vmatprep.subr.mxu0 %v8935_v34 }
 0x681   :  { %8834 = vrcp.f32 %v1922_v55 }
 0x68b   :  { %v8835_v56 = vpop.eup %8834 }
 0x68c   :  { %v1924_v57 = vmul.f32 %v8835_v56, %v8831_v45 }
 0x68e   :  { %8119 = vmatmul.mubr.msk.f32.vlgmr.msra.gmra.mrb[18].mxu0 %vm216_vm0, %v1924_v57 }
 0x68f   :  { %8127 = vmatpush3.msra.mxu0 %v9241_v58  ;;  %8128 = vmatprep.mubr.msk.f32.mxu0 %vm8936_vm3, %v8935_v34 }
 0x690   :  { %8136 = vmatprep.subr.mxu0 %v8935_v34 }
 0x751   :  { %v1832_v63 = vpop.f32.mrb[16].mxu0 }
 0x752   :  { %v8110_v0 = vpop.f32.mrb[17].mxu0  ;;  %8129 = vmatmul.mubr.msk.f32.vlgmr.msra.gmra.mrb[20].mxu0 %vm216_vm0, %v1832_v63 }
 0x753   :  { %8137 = vmatpush3.msra.mxu0 %v1403_v61  ;;  %8138 = vmatprep.mubr.msk.f32.mxu0 %vm8936_vm3, %v8935_v34 }
 0x754   :  { %8146 = vmatprep.subr.mxu0 %v8935_v34 }
 0x761   :  { %v1994_v4 = vpop.f32.mrb[18].mxu0 }
 0x762   :  { %v8120_v6 = vpop.f32.mrb[19].mxu0  ;;  %8124 = vmatmul.mubr.msk.f32.vlgmr.msra.gmra.mrb[20].mxu1 %vm216_vm0, %v1994_v4 }
 0x763   :  { %8132 = vmatpush3.xpose.msk.msra.mxu1 %vm216_vm0, %v1315_v1  ;;  %8133 = vmatprep.mubr.msk.f32.mxu1 %vm8936_vm3, %v8935_v34 }
 0x764   :  { %8141 = vmatprep.subr.mxu1 %v8935_v34 }
 0x766   :  { %8134 = vmatmul.mubr.msk.f32.vlgmr.msra.gmra.mrb[22].mxu1 %vm216_vm0, %v1227_v10 }
 0x767   :  { %8143 = vmatprep.mubr.msk.f32.mxu1 %vm8936_vm3, %v8935_v34  ;;  %8142 = vmatpush3.msra.mxu1 %v9273_v31 }
 0x768   :  { %8151 = vmatprep.subr.mxu1 %v8935_v34 }
 0x825   :  { %v2142_v3 = vpop.f32.mrb[20].mxu0 }
 0x826   :  { %v8130_v9 = vpop.f32.mrb[21].mxu0 }
 0x835   :  { %v2069_v12 = vpop.f32.mrb[20].mxu1 }
 0x836   :  { %v2143_v14 = vadd.f32 %v2142_v3, %v2069_v12  ;;  %v8125_v15 = vpop.f32.mrb[21].mxu1 }
 0x839   :  { %v2218_v20 = vpop.f32.mrb[22].mxu1 }
 0x83a   :  { %v2222_v22 = vmul.f32 0.35355338, %v2218_v20  ;;  %v8135_v26 = vpop.f32.mrb[23].mxu1 }
 0x83c   :  { %v2223_v27 = vsel %vm216_vm0, %v2222_v22, -inf }
 0x83d   :  { %2224 = vmax.xlane.f32.xlu0 %v2223_v27 }
 0x8ca   :  { %v2225_v2 = vpop.xlane.xlu0 %2224 }
 0x8cb   :  { %v2226_v7 = vsub.f32 %v2222_v22, %v2225_v2 }
 0x8cd   :  { %v2227_v28 = vmul.f32 1.442695, %v2226_v7 }
 0x8cf   :  { %8836 = vpow2.f32 %v2227_v28 }
 0x8d9   :  { %v8837_v29 = vpop.eup %8836 }
 0x8da   :  { %v2229_v30 = vsel %vm216_vm0, %v8837_v29, 0.0 }
 0x8db   :  { %2230 = vadd.xlane.f32.xlu1 %v2229_v30 }
 0x968   :  { %v2231_v32 = vpop.xlane.xlu1 %2230 }
 0x969   :  { %8838 = vrcp.f32 %v2231_v32 }
 0x973   :  { %v8839_v33 = vpop.eup %8838 }
 0x974   :  { %v2233_v35 = vmul.f32 %v8839_v33, %v8837_v29 }
 0x976   :  { %8139 = vmatmul.mubr.msk.f32.vlgmr.msra.gmra.mrb[22].mxu0 %vm216_vm0, %v2233_v35 }
 0x977   :  { %8147 = vmatpush3.xpose.msk.msra.mxu0 %vm216_vm0, %v1579_v36  ;;  %8148 = vmatprep.mubr.msk.f32.mxu0 %vm8936_vm3, %v8935_v34 }
 0x978   :  { %8156 = vmatprep.subr.mxu0 %v8935_v34 }
 0x97a   :  { %8149 = vmatmul.mubr.msk.f32.vlgmr.msra.gmra.mrb[24].mxu0 %vm216_vm0, %v1491_v37 }
 0x97b   :  { %8158 = vmatprep.mubr.msk.f32.mxu0 %vm8936_vm3, %v8935_v34  ;;  %8157 = vmatpush3.msra.mxu0 %v9298_v48 }
 0x97c   :  { %8166 = vmatprep.subr.mxu0 %v8935_v34 }
 0xa49   :  { %v2303_v23 = vpop.f32.mrb[22].mxu0 }
 0xa4a   :  { %v8140_v38 = vpop.f32.mrb[23].mxu0  ;;  %8144 = vmatmul.mubr.msk.f32.vlgmr.msra.gmra.mrb[24].mxu1 %vm216_vm0, %v2303_v23 }
 0xa4b   :  { %8152 = vmatpush3.msra.mxu1 %v1667_v18  ;;  %8153 = vmatprep.mubr.msk.f32.mxu1 %vm8936_vm3, %v8935_v34 }
 0xa4c   :  { %8161 = vmatprep.subr.mxu1 %v8935_v34 }
 0xa4d   :  { %v2455_v11 = vpop.f32.mrb[24].mxu0 }
 0xa4e   :  { %v2459_v17 = vmul.f32 0.35355338, %v2455_v11  ;;  %v8150_v41 = vpop.f32.mrb[25].mxu0 }
 0xa50   :  { %v2460_v42 = vsel %vm216_vm0, %v2459_v17, -inf }
 0xa51   :  { %2461 = vmax.xlane.f32.xlu0 %v2460_v42 }
 0xade   :  { %v2462_v43 = vpop.xlane.xlu0 %2461 }
 0xadf   :  { %v2463_v44 = vsub.f32 %v2459_v17, %v2462_v43 }
 0xae1   :  { %v2464_v19 = vmul.f32 1.442695, %v2463_v44 }
 0xae3   :  { %8840 = vpow2.f32 %v2464_v19 }
 0xaed   :  { %v8841_v25 = vpop.eup %8840 }
 0xaee   :  { %v2466_v45 = vsel %vm216_vm0, %v8841_v25, 0.0 }
 0xaef   :  { %2467 = vadd.xlane.f32.xlu1 %v2466_v45 }
 0xb1d   :  { %v2378_v49 = vpop.f32.mrb[24].mxu1 }
 0xb1e   :  { %v2382_v50 = vadd.f32 %v2378_v49, %v2143_v14  ;;  %v8145_v53 = vpop.f32.mrb[25].mxu1 }
 0xb7c   :  { %v2468_v54 = vpop.xlane.xlu1 %2467 }
 0xb7d   :  { %8842 = vrcp.f32 %v2468_v54 }
 0xb87   :  { %v8843_v55 = vpop.eup %8842 }
 0xb88   :  { %v2470_v56 = vmul.f32 %v8843_v55, %v8841_v25 }
 0xb8a   :  { %8154 = vmatmul.mubr.msk.f32.vlgmr.msra.gmra.mrb[26].mxu1 %vm216_vm0, %v2470_v56 }
 0xb8b   :  { %8162 = vmatpush3.xpose.msk.msra.mxu1 %vm216_vm0, %v9152_v40  ;;  %8163 = vmatprep.mubr.msk.f32.mxu1 %vm8936_vm3, %v8935_v34 }
 0xb8c   :  { %8171 = vmatprep.subr.mxu1 %v8935_v34 }
 0xb8e   :  { %8164 = vmatmul.mubr.msk.f32.vlgmr.msra.gmra.mrb[28].mxu1 %vm216_vm0, %v9150_v39 }
 0xb8f   :  { %8172 = vmatpush3.xpose.msk.msra.mxu1 %vm216_vm0, %v9170_v59  ;;  %8173 = vmatprep.mubr.msk.f32.mxu1 %vm8936_vm3, %v8935_v34 }
 0xb90   :  { %8181 = vmatprep.subr.mxu1 %v8935_v34 }
 0xb92   :  { %8174 = vmatmul.mubr.msk.f32.vlgmr.msra.gmra.mrb[30].mxu1 %vm216_vm0, %v9163_v52 }
 0xb93   :  { %8182 = vmatpush3.msra.mxu1 %v9249_v60  ;;  %8183 = vmatprep.mubr.msk.f32.mxu1 %vm8936_vm3, %v8935_v34 }
 0xb94   :  { %8191 = vmatprep.subr.mxu1 %v8935_v34 }
 0xc5d   :  { %v2540_v40 = vpop.f32.mrb[26].mxu1 }
 0xc5e   :  { %v8155_v39 = vpop.f32.mrb[27].mxu1  ;;  %8159 = vmatmul.mubr.msk.f32.vlgmr.msra.gmra.mrb[26].mxu0 %vm216_vm0, %v2540_v40 }
 0xc5f   :  { %8167 = vmatpush3.msra.mxu0 %v9161_v51  ;;  %8168 = vmatprep.mubr.msk.f32.mxu0 %vm8936_vm3, %v8935_v34 }
 0xc60   :  { %8176 = vmatprep.subr.mxu0 %v8935_v34 }
 0xc61   :  { %v2692_v59 = vpop.f32.mrb[28].mxu1 }
 0xc62   :  { %v2696_v52 = vmul.f32 0.35355338, %v2692_v59  ;;  %v8165_v57 = vpop.f32.mrb[29].mxu1 }
 0xc64   :  { %v2697_v60 = vsel %vm216_vm0, %v2696_v52, -inf }
 0xc65   :  { %2698 = vmax.xlane.f32.xlu0 %v2697_v60  ;;  %v2853_v61 = vpop.f32.mrb[30].mxu1 }
 0xc66   :  { %v2857_v63 = vmul.f32 0.35355338, %v2853_v61  ;;  %v8175_v0 = vpop.f32.mrb[31].mxu1 }
 0xc68   :  { %v2858_v1 = vsel %vm216_vm0, %v2857_v63, -inf }
 0xc69   :  { %2859 = vmax.xlane.f32.xlu1 %v2858_v1 }
 0xcf2   :  { %v2699_v4 = vpop.xlane.xlu0 %2698 }
 0xcf3   :  { %v2700_v6 = vsub.f32 %v2696_v52, %v2699_v4 }
 0xcf5   :  { %v2701_v51 = vmul.f32 1.442695, %v2700_v6 }
 0xcf6   :  { %v2860_v10 = vpop.xlane.xlu1 %2859 }
 0xcf7   :  { %8844 = vpow2.f32 %v2701_v51  ;;  %v2861_v3 = vsub.f32 %v2857_v63, %v2860_v10 }
 0xcf9   :  { %v2862_v9 = vmul.f32 1.442695, %v2861_v3 }
 0xcfb   :  { %8846 = vpow2.f32 %v2862_v9 }
 0xd01   :  { %v8845_v12 = vpop.eup %8844 }
 0xd02   :  { %v2703_v14 = vsel %vm216_vm0, %v8845_v12, 0.0 }
 0xd03   :  { %2704 = vadd.xlane.f32.xlu0 %v2703_v14 }
 0xd05   :  { %v8847_v15 = vpop.eup %8846 }
 0xd06   :  { %v2864_v20 = vsel %vm216_vm0, %v8847_v15, 0.0 }
 0xd07   :  { %2865 = vadd.xlane.f32.xlu1 %v2864_v20 }
 0xd31   :  { %v2615_v22 = vpop.f32.mrb[26].mxu0 }
 0xd32   :  { %v9330_v26 = vadd.f32 %v2615_v22, %v2382_v50  ;;  %v8160_v27 = vpop.f32.mrb[27].mxu0  ;;  %v7478_v22 = vld [vmem:[%s9399_s10] ss:$0 sm:$0xff] }
 0xd90   :  { %v2705_v2 = vpop.xlane.xlu0 %2704 }
 0xd91   :  { %8848 = vrcp.f32 %v2705_v2 }
 0xd94   :  { %v2866_v7 = vpop.xlane.xlu1 %2865 }
 0xd95   :  { %8850 = vrcp.f32 %v2866_v7 }
 0xd9b   :  { %v8849_v28 = vpop.eup %8848 }
 0xd9c   :  { %v2707_v29 = vmul.f32 %v8849_v28, %v8845_v12  ;;  %v7477_v12 = vld [vmem:[%s9394_s6] ss:$0 sm:$0xff] }
 0xd9e   :  { %8169 = vmatmul.mubr.msk.f32.vlgmr.msra.gmra.mrb[28].mxu0 %vm216_vm0, %v2707_v29 }
 0xd9f   :  { %v8851_v30 = vpop.eup %8850  ;;  %8177 = vmatpush3.msra.mxu0 %v9173_v62  ;;  %8178 = vmatprep.mubr.msk.f32.mxu0 %vm8936_vm3, %v8935_v34 }
 0xda0   :  { %v2868_v32 = vmul.f32 %v8851_v30, %v8847_v15  ;;  %8186 = vmatprep.subr.mxu0 %v8935_v34 }
 0xda2   :  { %8179 = vmatmul.mubr.msk.f32.vlgmr.msra.gmra.mrb[30].mxu0 %vm216_vm0, %v2868_v32 }
 0xda3   :  { %8187 = vmatpush3.msra.mxu0 %v9241_v58  ;;  %8188 = vmatprep.mubr.msk.f32.mxu0 %vm8936_vm3, %v8935_v34 }
 0xda4   :  { %8196 = vmatprep.subr.mxu0 %v8935_v34 }
 0xe71   :  { %v2777_v33 = vpop.f32.mrb[28].mxu0 }
 0xe72   :  { %v8170_v35 = vpop.f32.mrb[29].mxu0  ;;  %8189 = vmatmul.mubr.msk.f32.vlgmr.msra.gmra.mrb[32].mxu0 %vm216_vm0, %v2777_v33 }
 0xe73   :  { %8197 = vmatpush3.msra.mxu0 %v9203_v13  ;;  %8198 = vmatprep.mubr.msk.f32.mxu0 %vm8936_vm3, %v8935_v34 }
 0xe74   :  { %8206 = vmatprep.subr.mxu0 %v8935_v34 }
 0xe75   :  { %v2938_v62 = vpop.f32.mrb[30].mxu0 }
 0xe76   :  { %v8180_v36 = vpop.f32.mrb[31].mxu0  ;;  %8184 = vmatmul.mubr.msk.f32.vlgmr.msra.gmra.mrb[32].mxu1 %vm216_vm0, %v2938_v62 }
 0xe77   :  { %8192 = vmatpush3.xpose.msk.msra.mxu1 %vm216_vm0, %v9192_v8  ;;  %8193 = vmatprep.mubr.msk.f32.mxu1 %vm8936_vm3, %v8935_v34 }
 0xe78   :  { %8201 = vmatprep.subr.mxu1 %v8935_v34 }
 0xe7a   :  { %8194 = vmatmul.mubr.msk.f32.vlgmr.msra.gmra.mrb[34].mxu1 %vm216_vm0, %v9187_v5 }
 0xe7b   :  { %8202 = vmatpush3.msra.mxu1 %v9273_v31  ;;  %8203 = vmatprep.mubr.msk.f32.mxu1 %vm8936_vm3, %v8935_v34 }
 0xe7c   :  { %8211 = vmatprep.subr.mxu1 %v8935_v34 }
 0xf45   :  { %v3084_v13 = vpop.f32.mrb[32].mxu0 }
 0xf46   :  { %v8190_v58 = vpop.f32.mrb[33].mxu0 }
 0xf49   :  { %v3011_v37 = vpop.f32.mrb[32].mxu1 }
 0xf4a   :  { %v3085_v18 = vadd.f32 %v3084_v13, %v3011_v37  ;;  %v8185_v8 = vpop.f32.mrb[33].mxu1  ;;  %v7479_v37 = vld [vmem:[%s9414_s15] ss:$0 sm:$0xff] }
 0xf4b   :  { %v7480_v8 = vld [vmem:[%s9419_s20] ss:$0 sm:$0xff] }
 0xf4d   :  { %v3160_v23 = vpop.f32.mrb[34].mxu1 }
 0xf4e   :  { %v3164_v38 = vmul.f32 0.35355338, %v3160_v23  ;;  %v8195_v11 = vpop.f32.mrb[35].mxu1 }
 0xf50   :  { %v3165_v17 = vsel %vm216_vm0, %v3164_v38, -inf }
 0xf51   :  { %3166 = vmax.xlane.f32.xlu0 %v3165_v17 }
 0xfde   :  { %v3167_v41 = vpop.xlane.xlu0 %3166 }
 0xfdf   :  { %v3168_v5 = vsub.f32 %v3164_v38, %v3167_v41 }
 0xfe1   :  { %v3169_v42 = vmul.f32 1.442695, %v3168_v5 }
 0xfe3   :  { %8852 = vpow2.f32 %v3169_v42 }
 0xfed   :  { %v8853_v31 = vpop.eup %8852 }
 0xfee   :  { %v3171_v43 = vsel %vm216_vm0, %v8853_v31, 0.0 }
 0xfef   :  { %3172 = vadd.xlane.f32.xlu1 %v3171_v43 }
0x107c   :  { %v3173_v44 = vpop.xlane.xlu1 %3172 }
0x107d   :  { %8854 = vrcp.f32 %v3173_v44 }
0x1087   :  { %v8855_v19 = vpop.eup %8854 }
0x1088   :  { %v3175_v25 = vmul.f32 %v8855_v19, %v8853_v31 }
0x108a   :  { %8199 = vmatmul.mubr.msk.f32.vlgmr.msra.gmra.mrb[34].mxu0 %vm216_vm0, %v3175_v25 }
0x108b   :  { %8207 = vmatpush3.xpose.msk.msra.mxu0 %vm216_vm0, %v9217_v21  ;;  %8208 = vmatprep.mubr.msk.f32.mxu0 %vm8936_vm3, %v8935_v34  ;;  %v9378_v21 = vld [vmem:[%s9375_s1] ss:$0 sm:$0xff] }
0x108c   :  { %8216 = vmatprep.subr.mxu0 %v8935_v34 }
0x108e   :  { %8209 = vmatmul.mubr.msk.f32.vlgmr.msra.gmra.mrb[36].mxu0 %vm216_vm0, %v9206_v16  ;;  %v3565_v16 = vadd.f32 %v9378_v21, %v9330_v26 }
0x108f   :  { %8217 = vmatpush3.msra.mxu0 %v9298_v48  ;;  %8218 = vmatprep.mubr.msk.f32.mxu0 %vm8936_vm3, %v8935_v34 }
0x1090   :  { %v3567_v55 = vadd.f32 %v3565_v16, %v9043_v46 }
0x1092   :  { %v3571_v56 = vsel %vm443_vm2, %v3567_v55, 0.0 }
0x115d   :  { %v3245_v45 = vpop.f32.mrb[34].mxu0 }
0x115e   :  { %v8200_v49 = vpop.f32.mrb[35].mxu0  ;;  %8204 = vmatmul.mubr.msk.f32.vlgmr.msra.gmra.mrb[36].mxu1 %vm216_vm0, %v3245_v45 }
0x115f   :  { %8212 = vmatpush3.msra.mxu1 %v9222_v24  ;;  %8213 = vmatprep.mubr.msk.f32.mxu1 %vm8936_vm3, %v8935_v34 }
0x1161   :  { %v3395_v48 = vpop.f32.mrb[36].mxu0 }
0x1162   :  { %v3399_v50 = vmul.f32 0.35355338, %v3395_v48  ;;  %v8210_v53 = vpop.f32.mrb[37].mxu0 }
0x1164   :  { %v3400_v54 = vsel %vm216_vm0, %v3399_v50, -inf }
0x1165   :  { %3401 = vmax.xlane.f32.xlu0 %v3400_v54 }
0x1169   :  { %3572 = vadd.xlane.f32.xlu0 %v3571_v56 }
0x11f2   :  { %v3402_v40 = vpop.xlane.xlu0 %3401 }
0x11f3   :  { %v3403_v39 = vsub.f32 %v3399_v50, %v3402_v40 }
0x11f5   :  { %v3404_v24 = vmul.f32 1.442695, %v3403_v39 }
0x11f6   :  { %v3573_v59 = vpop.xlane.xlu0 %3572 }
0x11f7   :  { %8856 = vpow2.f32 %v3404_v24  ;;  %v3578_v52 = vmul.f32 0.03125, %v3573_v59  ;;  %v3658_v59 = vld [vmem:[%s9437_s28] sm:$0xff] }
0x11f9   :  { %v3580_v57 = vsub.f32 %v3567_v55, %v3578_v52  ;;  %v3659_v52 = vld [vmem:[%s9437_s28 + $0x8] sm:$0xff] }
0x11fb   :  { %v3582_v60 = vmul.f32 %v3580_v57, %v3580_v57 }
0x11fd   :  { %v3584_v61 = vsel %vm443_vm2, %v3582_v60, 0.0  ;;  %v3660_v60 = vld [vmem:[%s9437_s28 + $0x10] sm:$0xff] }
0x11fe   :  { %3585 = vadd.xlane.f32.xlu0 %v3584_v61  ;;  %v3661_v61 = vld [vmem:[%s9437_s28 + $0x18] sm:$0xff] }
0x1201   :  { %v8857_v63 = vpop.eup %8856 }
0x1202   :  { %v3406_v0 = vsel %vm216_vm0, %v8857_v63, 0.0 }
0x1203   :  { %3407 = vadd.xlane.f32.xlu1 %v3406_v0 }
0x1231   :  { %v3318_v46 = vpop.f32.mrb[36].mxu1 }
0x1232   :  { %v3322_v1 = vadd.f32 %v3318_v46, %v3085_v18  ;;  %v8205_v4 = vpop.f32.mrb[37].mxu1 }
0x128b   :  { %v3586_v6 = vpop.xlane.xlu0 %3585 }
0x128c   :  { %v3590_v51 = vmul.f32 0.03125, %v3586_v6 }
0x128e   :  { %v3592_v10 = vadd.f32 1e-05, %v3590_v51 }
0x1290   :  { %8858 = vrsqrt.f32 %v3592_v10  ;;  %v3408_v3 = vpop.xlane.xlu1 %3407 }
0x1291   :  { %8860 = vrcp.f32 %v3408_v3  ;;  %v3768_v3 = vld [vmem:[%s9447_s3] sm:$0xff] }
0x129a   :  { %v8859_v9 = vpop.eup %8858 }
0x129b   :  { %v8861_v14 = vpop.eup %8860  ;;  %v3596_v15 = vmul.f32 %v8859_v9, %v3580_v57  ;;  %v8643_v57 = vpack.c.bf16 %v3659_v52, %v3658_v59  ;;  %v3769_v9 = vld [vmem:[%s9447_s3 + $0x8] sm:$0xff] }
0x129c   :  { %v3410_v20 = vmul.f32 %v8861_v14, %v8857_v63  ;;  %v8647_v63 = vpack.c.bf16 %v3661_v61, %v3660_v60  ;;  %v3770_v14 = vld [vmem:[%s9447_s3 + $0x10] sm:$0xff] }
0x129d   :  { %v3604_v26 = vmul.f32 %v7477_v12, %v3596_v15  ;;  %8644 = vmatprep.subr.bf16.mxu1 %v8643_v57  ;;  %v3771_v15 = vld [vmem:[%s9447_s3 + $0x18] sm:$0xff]  ;;  %v7505_v61 = vld [vmem:[%s9026_s5 + $0x90] sm:$0xff] }
0x129e   :  { %8214 = vmatmul.mubr.msk.f32.vlgmr.msra.gmra.mrb[38].mxu1 %vm216_vm0, %v3410_v20  ;;  %v8655_v20 = vpack.c.bf16 %v3771_v15, %v3770_v14  ;;  %v7521_v14 = vld [vmem:[%s9007_s23 + $0xb0] sm:$0xff]  ;;  %v7522_v15 = vld [vmem:[%s9007_s23 + $0xb8] sm:$0xff] }
0x129f   :  { %v9404_v27 = vadd.f32 %v7478_v22, %v3604_v26  ;;  %8646 = vmatpush3.bf16.msra.mxu1 %v8643_v57  ;;  %v7488_v26 = vld [vmem:[%s9014_s27 + $0x88] sm:$0xff] }
0x12a0   :  { %8648 = vmatprep.subr.bf16.mxu1 %v8647_v63 }
0x12a1   :  { %v3616_v2 = vsel %vm443_vm2, %v9404_v27, 0.0 }
0x12a2   :  { %3617 = vadd.xlane.f32.xlu0 %v3616_v2  ;;  %v7495_v2 = vld [vmem:[%s9007_s23 + $0x80] sm:$0xff] }
0x12a3   :  { %8650 = vmatpush3.bf16.msra.mxu1 %v8647_v63  ;;  %v7506_v63 = vld [vmem:[%s9026_s5 + $0x98] sm:$0xff] }
0x132f   :  { %v3618_v7 = vpop.xlane.xlu0 %3617 }
0x1330   :  { %v3622_v28 = vmul.f32 0.03125, %v3618_v7 }
0x1332   :  { %v3624_v29 = vsub.f32 %v9404_v27, %v3622_v28  ;;  %v7496_v28 = vld [vmem:[%s9007_s23 + $0x88] sm:$0xff] }
0x1334   :  { %v3626_v30 = vmul.f32 %v3624_v29, %v3624_v29 }
0x1336   :  { %v3628_v32 = vsel %vm443_vm2, %v3626_v30, 0.0  ;;  %v7481_v30 = vld [vmem:[%s9460_s9] ss:$0 sm:$0xff] }
0x1337   :  { %3629 = vadd.xlane.f32.xlu0 %v3628_v32 }
0x1371   :  { %v3480_v33 = vpop.f32.mrb[38].mxu1 }
0x1372   :  { %v8215_v35 = vpop.f32.mrb[39].mxu1  ;;  %8219 = vmatmul.mubr.msk.f32.vlgmr.msra.gmra.mrb[38].mxu0 %vm216_vm0, %v3480_v33 }
0x13c4   :  { %v3630_v62 = vpop.xlane.xlu0 %3629 }
0x13c5   :  { %v3634_v36 = vmul.f32 0.03125, %v3630_v62 }
0x13c7   :  { %v3636_v13 = vadd.f32 1e-05, %v3634_v36 }
0x13c9   :  { %8862 = vrsqrt.f32 %v3636_v13 }
0x13d3   :  { %v8863_v58 = vpop.eup %8862 }
0x13d4   :  { %v3640_v18 = vmul.f32 %v8863_v58, %v3624_v29  ;;  %v8667_v29 = vpack.c.bf16 %v7496_v28, %v7495_v2  ;;  %v7536_v28 = vld [vmem:[%s9014_s27 + $0xc8] sm:$0xff] }
0x13d6   :  { %v3648_v23 = vmul.f32 %v7479_v37, %v3640_v18 }
0x13d8   :  { %v3656_v38 = vadd.f32 %v7480_v8, %v3648_v23 }
0x13da   :  { %8229 = vmatprep.mubr.msk.f32.mxu1 %vm443_vm2, %v3656_v38 }
0x1445   :  { %v3553_v11 = vpop.f32.mrb[38].mxu0 }
0x1446   :  { %v3557_v17 = vadd.f32 %v3553_v11, %v3322_v1  ;;  %v8220_v41 = vpop.f32.mrb[39].mxu0 }
0x1448   :  { %v3566_v5 = vadd.f32 %v9378_v21, %v3557_v17 }
0x144a   :  { %v3568_v42 = vadd.f32 %v3566_v5, %v9045_v47 }
0x144c   :  { %v3574_v31 = vsel %vm443_vm2, %v3568_v42, 0.0 }
0x144d   :  { %3575 = vadd.xlane.f32.xlu1 %v3574_v31 }
0x14da   :  { %v3576_v43 = vpop.xlane.xlu1 %3575 }
0x14db   :  { %v3579_v44 = vmul.f32 0.03125, %v3576_v43 }
0x14dd   :  { %v3581_v19 = vsub.f32 %v3568_v42, %v3579_v44 }
0x14df   :  { %v3583_v25 = vmul.f32 %v3581_v19, %v3581_v19 }
0x14e1   :  { %v3587_v45 = vsel %vm443_vm2, %v3583_v25, 0.0 }
0x14e2   :  { %3588 = vadd.xlane.f32.xlu1 %v3587_v45  ;;  %v7489_v45 = vld [vmem:[%s9014_s27 + $0x90] sm:$0xff] }
0x156f   :  { %v3589_v49 = vpop.xlane.xlu1 %3588 }
0x1570   :  { %v3591_v16 = vmul.f32 0.03125, %v3589_v49  ;;  %v7490_v49 = vld [vmem:[%s9014_s27 + $0x98] sm:$0xff] }
0x1572   :  { %v3593_v48 = vadd.f32 1e-05, %v3591_v16  ;;  %v7497_v16 = vld [vmem:[%s9007_s23 + $0x90] sm:$0xff] }
0x1574   :  { %8864 = vrsqrt.f32 %v3593_v48  ;;  %v8663_v48 = vpack.c.bf16 %v7490_v49, %v7489_v45  ;;  %v7575_v45 = vld [vmem:[%s9026_s5 + $0xe0] sm:$0xff]  ;;  %v7576_v49 = vld [vmem:[%s9026_s5 + $0xe8] sm:$0xff] }
0x157e   :  { %v8865_v50 = vpop.eup %8864 }
0x157f   :  { %v3597_v53 = vmul.f32 %v8865_v50, %v3581_v19  ;;  %v7498_v50 = vld [vmem:[%s9007_s23 + $0x98] sm:$0xff] }
0x1581   :  { %v3605_v54 = vmul.f32 %v7477_v12, %v3597_v53  ;;  %v8651_v12 = vpack.c.bf16 %v3769_v9, %v3768_v3  ;;  %v8671_v53 = vpack.c.bf16 %v7498_v50, %v7497_v16  ;;  %v7520_v3 = vld [vmem:[%s9007_s23 + $0xa8] sm:$0xff]  ;;  %v7527_v9 = vld [vmem:[%s9026_s5 + $0xa0] sm:$0xff]  ;;  %v7569_v50 = vld [vmem:[%s9007_s23 + $0xf0] sm:$0xff] }
0x1583   :  { %v9428_v21 = vadd.f32 %v7478_v22, %v3605_v54  ;;  %8652 = vmatprep.subr.bf16.mxu0 %v8651_v12  ;;  %v7487_v22 = vld [vmem:[%s9014_s27 + $0x80] sm:$0xff] }
0x1584   :  { %8654 = vmatpush3.bf16.msra.mxu0 %v8651_v12  ;;  %v8659_v7 = vpack.c.bf16 %v7488_v26, %v7487_v22  ;;  %v7503_v54 = vld [vmem:[%s9026_s5 + $0x80] sm:$0xff]  ;;  %v7530_v22 = vld [vmem:[%s9026_s5 + $0xb8] sm:$0xff]  ;;  %v8695_v26 = vpack.c.bf16 %v7522_v15, %v7521_v14 }
0x1585   :  { %v3619_v47 = vsel %vm443_vm2, %v9428_v21, 0.0  ;;  %8656 = vmatprep.subr.bf16.mxu0 %v8655_v20  ;;  %v7524_v14 = vld [vmem:[%s9141_s17 + $0x5] ss:$0 sm:$0xff] }
0x1586   :  { %3620 = vadd.xlane.f32.xlu1 %v3619_v47  ;;  %8660 = vmatprep.subr.bf16.mxu1 %v8659_v7  ;;  %v7504_v47 = vld [vmem:[%s9026_s5 + $0x88] sm:$0xff]  ;;  %v9595_v15 = vld [vmem:[%s9148_s21 + $0x5] ss:$0 sm:$0xff] }
0x1588   :  { %8658 = vmatpush3.bf16.msra.mxu0 %v8655_v20  ;;  %v7529_v20 = vld [vmem:[%s9026_s5 + $0xb0] sm:$0xff] }
0x1589   :  { %8668 = vmatprep.subr.bf16.mxu0 %v8667_v29  ;;  %v8703_v2 = vpack.c.bf16 %v7530_v22, %v7529_v20 }
0x1613   :  { %v3621_v55 = vpop.xlane.xlu1 %3620 }
0x1614   :  { %v3623_v56 = vmul.f32 0.03125, %v3621_v55  ;;  %v7511_v55 = vld [vmem:[%s9014_s27 + $0xa0] sm:$0xff] }
0x1616   :  { %v3625_v40 = vsub.f32 %v9428_v21, %v3623_v56  ;;  %v8675_v56 = vpack.c.bf16 %v7504_v47, %v7503_v54  ;;  %v7577_v54 = vld [vmem:[%s9026_s5 + $0xf0] sm:$0xff]  ;;  %v7578_v47 = vld [vmem:[%s9026_s5 + $0xf8] sm:$0xff] }
0x1618   :  { %v3627_v39 = vmul.f32 %v3625_v40, %v3625_v40 }
0x161a   :  { %v3631_v24 = vsel %vm443_vm2, %v3627_v39, 0.0 }
0x161b   :  { %3632 = vadd.xlane.f32.xlu1 %v3631_v24  ;;  %v7484_v24 = vld [vmem:[%s9476_s16] ss:$0 sm:$0xff] }
0x16a8   :  { %v3633_v0 = vpop.xlane.xlu1 %3632 }
0x16a9   :  { %v3635_v46 = vmul.f32 0.03125, %v3633_v0  ;;  %v7513_v0 = vld [vmem:[%s9014_s27 + $0xb0] sm:$0xff] }
0x16ab   :  { %v3637_v1 = vadd.f32 1e-05, %v3635_v46  ;;  %v7514_v46 = vld [vmem:[%s9014_s27 + $0xb8] sm:$0xff] }
0x16ad   :  { %8866 = vrsqrt.f32 %v3637_v1 }
0x16b7   :  { %v8867_v4 = vpop.eup %8866 }
0x16b8   :  { %v3641_v6 = vmul.f32 %v8867_v4, %v3625_v40  ;;  %v7512_v40 = vld [vmem:[%s9014_s27 + $0xa8] sm:$0xff] }
0x16b9   :  { %v8683_v39 = vpack.c.bf16 %v7512_v40, %v7511_v55  ;;  %v7492_v40 = vld [vmem:[%s9136_s13 + $0x4] ss:$0 sm:$0xff] }
0x16ba   :  { %v3649_v51 = vmul.f32 %v7479_v37, %v3641_v6  ;;  %v7519_v6 = vld [vmem:[%s9007_s23 + $0xa0] sm:$0xff] }
0x16bc   :  { %v3657_v10 = vadd.f32 %v7480_v8, %v3649_v51  ;;  %v8679_v51 = vpack.c.bf16 %v7506_v63, %v7505_v61 }
0x16be   :  { %8230 = vmatmul.mubr.msk.f32.vlgmr.msra.gmra.mrb[40].mxu1 %vm443_vm2, %v3657_v10  ;;  %v8687_v10 = vpack.c.bf16 %v7514_v46, %v7513_v0  ;;  %v7508_v46 = vld [vmem:[%s9148_s21 + $0x4] ss:$0 sm:$0xff] }
0x16bf   :  { %8662 = vmatpush3.bf16.msra.mxu1 %v8659_v7  ;;  %v7535_v7 = vld [vmem:[%s9014_s27 + $0xc0] sm:$0xff] }
0x16c0   :  { %8664 = vmatprep.subr.bf16.mxu1 %v8663_v48 }
0x16c3   :  { %8666 = vmatpush3.bf16.msra.mxu1 %v8663_v48  ;;  %v8747_v48 = vpack.c.bf16 %v7576_v49, %v7575_v45 }
0x16c4   :  { %8676 = vmatprep.subr.bf16.mxu1 %v8675_v56 }
0x1791   :  { %v8231_v32 = vpop.f32.mrb[40].mxu1 }
0x1792   :  { %v3747_v33 = vadd.f32 %v8231_v32, %v7481_v30  ;;  %v3741_v35 = vpop.f32.mrb[41].mxu1  ;;  %v8707_v32 = vpack.c.bf16 %v7536_v28, %v7535_v7 }
0x1793   :  { %v3742_v62 = vadd.f32 %v7481_v30, %v3741_v35  ;;  %v7544_v30 = vld [vmem:[%s9007_s23 + $0xc8] sm:$0xff]  ;;  %v7537_v35 = vld [vmem:[%s9014_s27 + $0xd0] sm:$0xff] }
0x1794   :  { %v3751_v36 = vmul.f32 %v3747_v33, %v3747_v33 }
0x1795   :  { %v3750_v13 = vmul.f32 %v3742_v62, %v3742_v62 }
0x1796   :  { %v3753_v58 = vmul.f32 %v3751_v36, %v3747_v33  ;;  %v7545_v36 = vld [vmem:[%s9007_s23 + $0xd0] sm:$0xff] }
0x1797   :  { %v3752_v37 = vmul.f32 %v3750_v13, %v3742_v62  ;;  %v7546_v13 = vld [vmem:[%s9007_s23 + $0xd8] sm:$0xff] }
0x1798   :  { %v3755_v18 = vmul.f32 0.044715, %v3753_v58 }
0x1799   :  { %v3754_v8 = vmul.f32 0.044715, %v3752_v37  ;;  %v7551_v37 = vld [vmem:[%s9026_s5 + $0xc0] sm:$0xff] }
0x179a   :  { %v3757_v23 = vadd.f32 %v3755_v18, %v3747_v33  ;;  %v7552_v18 = vld [vmem:[%s9026_s5 + $0xc8] sm:$0xff] }
0x179b   :  { %v3756_v38 = vadd.f32 %v3754_v8, %v3742_v62  ;;  %v8719_v8 = vpack.c.bf16 %v7546_v13, %v7545_v36 }
0x179c   :  { %v3759_v11 = vmul.f32 0.7978846, %v3757_v23  ;;  %v7559_v23 = vld [vmem:[%s9014_s27 + $0xe0] sm:$0xff] }
0x179d   :  { %v3758_v17 = vmul.f32 0.7978846, %v3756_v38  ;;  %v7560_v38 = vld [vmem:[%s9014_s27 + $0xe8] sm:$0xff] }
0x179e   :  { %8868 = vtanh.f32 %v3759_v11  ;;  %v8723_v11 = vpack.c.bf16 %v7552_v18, %v7551_v37  ;;  %v7556_v18 = vld [vmem:[%s9148_s21 + $0x6] ss:$0 sm:$0xff] }
0x179f   :  { %8870 = vtanh.f32 %v3758_v17  ;;  %v8731_v17 = vpack.c.bf16 %v7560_v38, %v7559_v23 }
0x17a8   :  { %v8869_v41 = vpop.eup %8868 }
0x17a9   :  { %v8871_v5 = vpop.eup %8870  ;;  %v3763_v42 = vadd.f32 1.0, %v8869_v41  ;;  %v7553_v41 = vld [vmem:[%s9026_s5 + $0xd0] sm:$0xff] }
0x17aa   :  { %v3762_v31 = vadd.f32 1.0, %v8871_v5  ;;  %v7554_v5 = vld [vmem:[%s9026_s5 + $0xd8] sm:$0xff] }
0x17ab   :  { %v3765_v43 = vmul.f32 0.5, %v3763_v42  ;;  %v7561_v42 = vld [vmem:[%s9014_s27 + $0xf0] sm:$0xff] }
0x17ac   :  { %v3764_v44 = vmul.f32 0.5, %v3762_v31  ;;  %v7562_v31 = vld [vmem:[%s9014_s27 + $0xf8] sm:$0xff] }
0x17ad   :  { %v3767_v25 = vmul.f32 %v3765_v43, %v3747_v33  ;;  %v8727_v43 = vpack.c.bf16 %v7554_v5, %v7553_v41 }
0x17ae   :  { %v3766_v19 = vmul.f32 %v3764_v44, %v3742_v62  ;;  %v7538_v62 = vld [vmem:[%s9014_s27 + $0xd8] sm:$0xff]  ;;  %v7567_v44 = vld [vmem:[%s9007_s23 + $0xe0] sm:$0xff] }
0x17af   :  { %v8711_v58 = vpack.c.bf16 %v7538_v62, %v7537_v35 }
0x17b0   :  { %8240 = vmatprep.mubr.msk.f32.mxu0 %vm443_vm2, %v3766_v19  ;;  %v7568_v19 = vld [vmem:[%s9007_s23 + $0xe8] sm:$0xff] }
0x17b1   :  { %8241 = vmatmul.mubr.msk.f32.vlgmr.msra.gmra.mrb[40].mxu0 %vm443_vm2, %v3767_v25  ;;  %v8735_v25 = vpack.c.bf16 %v7562_v31, %v7561_v42  ;;  %v8739_v16 = vpack.c.bf16 %v7568_v19, %v7567_v44  ;;  %v9635_v42 = vld [vmem:[%s9141_s17 + $0x7] ss:$0 sm:$0xff] }
0x17b2   :  { %8670 = vmatpush3.bf16.msra.mxu0 %v8667_v29  ;;  %v7543_v29 = vld [vmem:[%s9007_s23 + $0xc0] sm:$0xff] }
0x17b3   :  { %8672 = vmatprep.subr.bf16.mxu0 %v8671_v53  ;;  %v8715_v33 = vpack.c.bf16 %v7544_v30, %v7543_v29  ;;  %v9638_v31 = vld [vmem:[%s9148_s21 + $0x7] ss:$0 sm:$0xff] }
0x17b6   :  { %8674 = vmatpush3.bf16.msra.mxu0 %v8671_v53  ;;  %v7570_v53 = vld [vmem:[%s9007_s23 + $0xf8] sm:$0xff]  ;;  %s8950_s23 = smov 30  }
0x17b7   :  { %8684 = vmatprep.subr.bf16.mxu0 %v8683_v39  ;;  %v8743_v55 = vpack.c.bf16 %v7570_v53, %v7569_v50 }
0x1884   :  { %v8242_v59 = vpop.f32.mrb[40].mxu0 }
0x1885   :  { %v3857_v52 = vadd.f32 %v8242_v59, %v7484_v24  ;;  %v3851_v57 = vpop.f32.mrb[41].mxu0 }
0x1886   :  { %v3852_v60 = vadd.f32 %v7484_v24, %v3851_v57 }
0x1887   :  { %v9487_v4 = vadd.f32 %v3857_v52, %v9428_v21  ;;  %v8691_v21 = vpack.c.bf16 %v7520_v3, %v7519_v6  ;;  %v7516_v6 = vld [vmem:[%s9136_s13 + $0x5] ss:$0 sm:$0xff] }
0x1888   :  { %v9484_v1 = vadd.f32 %v3852_v60, %v9404_v27  ;;  %v7528_v27 = vld [vmem:[%s9026_s5 + $0xa8] sm:$0xff] }
0x1889   :  { %v8699_v12 = vpack.c.bf16 %v7528_v27, %v7527_v9 }
0x188a   :  { %8251 = vmatprep.mubr.msk.f32.mxu1 %vm443_vm2, %v9484_v1  ;;  %8262 = vmatprep.mubr.msk.f32.mxu0 %vm443_vm2, %v9484_v1 }
0x188b   :  { %8252 = vmatmul.mubr.msk.f32.vlgmr.msra.gmra.mrb[42].mxu1 %vm443_vm2, %v9487_v4  ;;  %8263 = vmatmul.mubr.msk.f32.vlgmr.msra.gmra.mrb[42].mxu0 %vm443_vm2, %v9487_v4 }
0x188c   :  { %8678 = vmatpush3.bf16.msra.mxu1 %v8675_v56  ;;  %8686 = vmatpush3.bf16.msra.mxu0 %v8683_v39  ;;  %v8751_v56 = vpack.c.bf16 %v7578_v47, %v7577_v54  ;;  %v7500_v39 = vld [vmem:[%s9141_s17 + $0x4] ss:$0 sm:$0xff] }
0x188d   :  { %8273 = vmatprep.mubr.msk.f32.mxu1 %vm443_vm2, %v9484_v1  ;;  %8284 = vmatprep.mubr.msk.f32.mxu0 %vm443_vm2, %v9484_v1 }
0x188e   :  { %8680 = vmatprep.subr.bf16.mxu1 %v8679_v51  ;;  %8688 = vmatprep.subr.bf16.mxu0 %v8687_v10 }
0x1890   :  { %8682 = vmatpush3.bf16.msra.mxu1 %v8679_v51  ;;  %8690 = vmatpush3.bf16.msra.mxu0 %v8687_v10 }
0x1891   :  { %8692 = vmatprep.subr.bf16.mxu1 %v8691_v21  ;;  %8700 = vmatprep.subr.bf16.mxu0 %v8699_v12 }
0x1893   :  { %8274 = vmatmul.mubr.msk.f32.vlgmr.msra.gmra.mrb[44].mxu1 %vm443_vm2, %v9487_v4  ;;  %8285 = vmatmul.mubr.msk.f32.vlgmr.msra.gmra.mrb[44].mxu0 %vm443_vm2, %v9487_v4 }
0x1894   :  { %8694 = vmatpush3.bf16.msra.mxu1 %v8691_v21  ;;  %8295 = vmatprep.mubr.msk.f32.mxu1 %vm443_vm2, %v9484_v1 }
0x1895   :  { %8702 = vmatpush3.bf16.msra.mxu0 %v8699_v12  ;;  %8306 = vmatprep.mubr.msk.f32.mxu0 %vm443_vm2, %v9484_v1 }
0x1896   :  { %8696 = vmatprep.subr.bf16.mxu1 %v8695_v26  ;;  %8704 = vmatprep.subr.bf16.mxu0 %v8703_v2 }
0x1898   :  { %8698 = vmatpush3.bf16.msra.mxu1 %v8695_v26 }
0x1899   :  { %8706 = vmatpush3.bf16.msra.mxu0 %v8703_v2  ;;  %8708 = vmatprep.subr.bf16.mxu1 %v8707_v32 }
0x189a   :  { %8716 = vmatprep.subr.bf16.mxu0 %v8715_v33 }
0x189b   :  { %8296 = vmatmul.mubr.msk.f32.vlgmr.msra.gmra.mrb[46].mxu1 %vm443_vm2, %v9487_v4 }
0x189c   :  { %8307 = vmatmul.mubr.msk.f32.vlgmr.msra.gmra.mrb[46].mxu0 %vm443_vm2, %v9487_v4  ;;  %8710 = vmatpush3.bf16.msra.mxu1 %v8707_v32  ;;  %v9605_v32 = vld [vmem:[%s9136_s13 + $0x6] ss:$0 sm:$0xff] }
0x189d   :  { %8317 = vmatprep.mubr.msk.f32.mxu1 %vm443_vm2, %v9484_v1  ;;  %8718 = vmatpush3.bf16.msra.mxu0 %v8715_v33  ;;  %v9609_v33 = vld [vmem:[%s9141_s17 + $0x6] ss:$0 sm:$0xff]  ;;  %s8951_s17 = smov 32  }
0x189e   :  { %8328 = vmatprep.mubr.msk.f32.mxu0 %vm443_vm2, %v9484_v1  ;;  %8712 = vmatprep.subr.bf16.mxu1 %v8711_v58 }
0x189f   :  { %8720 = vmatprep.subr.bf16.mxu0 %v8719_v8 }
0x18a0   :  { %8714 = vmatpush3.bf16.msra.mxu1 %v8711_v58 }
0x18a1   :  { %8722 = vmatpush3.bf16.msra.mxu0 %v8719_v8  ;;  %8724 = vmatprep.subr.bf16.mxu1 %v8723_v11  ;;  %v9625_v8 = vld [vmem:[%s9136_s13 + $0x7] ss:$0 sm:$0xff]  ;;  %s9839_s13 = sld [smem:[%s9867_s0 + %s8950_s23]]  }
0x18a2   :  { %8732 = vmatprep.subr.bf16.mxu0 %v8731_v17 }
0x18a3   :  { %8318 = vmatmul.mubr.msk.f32.vlgmr.msra.gmra.mrb[48].mxu1 %vm443_vm2, %v9487_v4 }
0x18a4   :  { %8329 = vmatmul.mubr.msk.f32.vlgmr.msra.gmra.mrb[48].mxu0 %vm443_vm2, %v9487_v4  ;;  %8726 = vmatpush3.bf16.msra.mxu1 %v8723_v11 }
0x18a5   :  { %8339 = vmatprep.mubr.msk.f32.mxu1 %vm443_vm2, %v9484_v1  ;;  %8734 = vmatpush3.bf16.msra.mxu0 %v8731_v17 }
0x18a6   :  { %8350 = vmatprep.mubr.msk.f32.mxu0 %vm443_vm2, %v9484_v1  ;;  %8728 = vmatprep.subr.bf16.mxu1 %v8727_v43 }
0x18a7   :  { %8736 = vmatprep.subr.bf16.mxu0 %v8735_v25 }
0x18a8   :  { %8730 = vmatpush3.bf16.msra.mxu1 %v8727_v43 }
0x18a9   :  { %8738 = vmatpush3.bf16.msra.mxu0 %v8735_v25  ;;  %8740 = vmatprep.subr.bf16.mxu1 %v8739_v16 }
0x18aa   :  { %8748 = vmatprep.subr.bf16.mxu0 %v8747_v48 }
0x18ab   :  { %8340 = vmatmul.mubr.msk.f32.vlgmr.msra.gmra.mrb[50].mxu1 %vm443_vm2, %v9487_v4 }
0x18ac   :  { %8351 = vmatmul.mubr.msk.f32.vlgmr.msra.gmra.mrb[50].mxu0 %vm443_vm2, %v9487_v4  ;;  %8742 = vmatpush3.bf16.msra.mxu1 %v8739_v16 }
0x18ad   :  { %8361 = vmatprep.mubr.msk.f32.mxu1 %vm443_vm2, %v9484_v1  ;;  %8750 = vmatpush3.bf16.msra.mxu0 %v8747_v48 }
0x18ae   :  { %8372 = vmatprep.mubr.msk.f32.mxu0 %vm443_vm2, %v9484_v1  ;;  %8744 = vmatprep.subr.bf16.mxu1 %v8743_v55 }
0x18af   :  { %8752 = vmatprep.subr.bf16.mxu0 %v8751_v56 }
0x18b0   :  { %8746 = vmatpush3.bf16.msra.mxu1 %v8743_v55 }
0x18b1   :  { %8754 = vmatpush3.bf16.msra.mxu0 %v8751_v56  ;;  %8375 = vmatprep.subr.mxu1 %v8935_v34 }
0x18b2   :  { %8380 = vmatprep.subr.mxu0 %v8935_v34 }
0x18b3   :  { %8362 = vmatmul.mubr.msk.f32.vlgmr.msra.gmra.mrb[52].mxu1 %vm443_vm2, %v9487_v4 }
0x18b4   :  { %8373 = vmatmul.mubr.msk.f32.vlgmr.msra.gmra.mrb[52].mxu0 %vm443_vm2, %v9487_v4  ;;  %8377 = vmatprep.mubr.msk.f32.mxu1 %vm8936_vm3, %v8935_v34 }
0x18b5   :  { %8382 = vmatprep.mubr.msk.f32.mxu0 %vm8936_vm3, %v8935_v34 }
0x195e   :  { %v8253_v24 = vpop.f32.mrb[42].mxu1  ;;  %v8264_v59 = vpop.f32.mrb[42].mxu0 }
0x195f   :  { %v9577_v52 = vadd.f32 %v8253_v24, %v7492_v40  ;;  %v9579_v57 = vadd.f32 %v8264_v59, %v7500_v39  ;;  %v3947_v60 = vpop.f32.mrb[43].mxu1  ;;  %v4035_v61 = vpop.f32.mrb[43].mxu0 }
0x1960   :  { %v4036_v63 = vadd.f32 %v7500_v39, %v4035_v61  ;;  %v3948_v0 = vadd.f32 %v7492_v40, %v3947_v60 }
0x1962   :  { %8376 = vmatpush3.xpose.msk.msra.mxu1 %vm216_vm0, %v4036_v63 }
0x1963   :  { %8385 = vmatprep.subr.mxu1 %v8935_v34 }
0x1965   :  { %8378 = vmatmul.mubr.msk.f32.vlgmr.msra.gmra.mrb[54].mxu1 %vm216_vm0, %v3948_v0 }
0x1966   :  { %v8275_v51 = vpop.f32.mrb[44].mxu1  ;;  %v8286_v10 = vpop.f32.mrb[44].mxu0  ;;  %8387 = vmatprep.mubr.msk.f32.mxu1 %vm8936_vm3, %v8935_v34 }
0x1967   :  { %v9588_v3 = vadd.f32 %v8275_v51, %v7508_v46  ;;  %v9590_v9 = vadd.f32 %v8286_v10, %v7516_v6  ;;  %v4123_v27 = vpop.f32.mrb[45].mxu1  ;;  %v4211_v21 = vpop.f32.mrb[45].mxu0 }
0x1968   :  { %v4124_v12 = vadd.f32 %v7508_v46, %v4123_v27  ;;  %v4212_v30 = vadd.f32 %v7516_v6, %v4211_v21 }
0x196a   :  { %8381 = vmatpush3.msra.mxu0 %v4124_v12 }
0x196b   :  { %8390 = vmatprep.subr.mxu0 %v8935_v34 }
0x196e   :  { %v8297_v20 = vpop.f32.mrb[46].mxu1 }
0x196f   :  { %v9597_v22 = vadd.f32 %v8297_v20, %v7524_v14  ;;  %v8308_v26 = vpop.f32.mrb[46].mxu0  ;;  %v4299_v2 = vpop.f32.mrb[47].mxu1 }
0x1970   :  { %v9600_v7 = vadd.f32 %v8308_v26, %v9595_v15  ;;  %v4300_v28 = vadd.f32 %v7524_v14, %v4299_v2  ;;  %v4387_v29 = vpop.f32.mrb[47].mxu0  ;;  %v9660_v26 = vld [vmem:[%s9238_s26 + $0x20] sm:$0xff] }
0x1971   :  { %v4388_v21 = vadd.f32 %v9595_v15, %v4387_v29  ;;  %v9668_v15 = vld [vmem:[%s9238_s26 + $0x28] sm:$0xff] }
0x1972   :  { %8386 = vmatpush3.xpose.msk.msra.mxu1 %vm216_vm0, %v4300_v28 }
0x1973   :  { %8395 = vmatprep.subr.mxu1 %v8935_v34 }
0x1975   :  { %8388 = vmatmul.mubr.msk.f32.vlgmr.msra.gmra.mrb[56].mxu1 %vm216_vm0, %v4212_v30 }
0x1976   :  { %v8319_v35 = vpop.f32.mrb[48].mxu1  ;;  %8397 = vmatprep.mubr.msk.f32.mxu1 %vm8936_vm3, %v8935_v34  ;;  %8396 = vmatpush3.msra.mxu1 %v9668_v15 }
0x1977   :  { %v9614_v62 = vadd.f32 %v8319_v35, %v9605_v32  ;;  %v8330_v36 = vpop.f32.mrb[48].mxu0  ;;  %v9616_v13 = vpop.f32.mrb[49].mxu1  ;;  %8405 = vmatprep.subr.mxu1 %v8935_v34 }
0x1978   :  { %v9619_v58 = vadd.f32 %v8330_v36, %v9609_v33  ;;  %v9621_v37 = vpop.f32.mrb[49].mxu0 }
0x1979   :  { %v4564_v30 = vadd.f32 %v9609_v33, %v9621_v37 }
0x197e   :  { %v8341_v23 = vpop.f32.mrb[50].mxu1 }
0x197f   :  { %v9627_v38 = vadd.f32 %v8341_v23, %v7556_v18  ;;  %v8352_v11 = vpop.f32.mrb[50].mxu0  ;;  %v4651_v17 = vpop.f32.mrb[51].mxu1 }
0x1980   :  { %v9630_v41 = vadd.f32 %v8352_v11, %v9625_v8  ;;  %v9632_v5 = vpop.f32.mrb[51].mxu0  ;;  %v4652_v2 = vadd.f32 %v7556_v18, %v4651_v17  ;;  %v4476_v18 = vadd.f32 %v9605_v32, %v9616_v13 }
0x1986   :  { %v8363_v43 = vpop.f32.mrb[52].mxu1 }
0x1987   :  { %v9641_v44 = vadd.f32 %v8363_v43, %v9635_v42  ;;  %v8374_v19 = vpop.f32.mrb[52].mxu0  ;;  %v9643_v25 = vpop.f32.mrb[53].mxu1 }
0x1988   :  { %v9646_v45 = vadd.f32 %v8374_v19, %v9638_v31  ;;  %v9648_v49 = vpop.f32.mrb[53].mxu0 }
0x1a38   :  { %v4996_v16 = vpop.f32.mrb[54].mxu1 }
0x1a39   :  { %v5000_v48 = vmul.f32 0.35355338, %v4996_v16  ;;  %v8379_v50 = vpop.f32.mrb[55].mxu1 }
0x1a3b   :  { %v5001_v53 = vsel %vm216_vm0, %v5000_v48, -inf }
0x1a3c   :  { %5002 = vmax.xlane.f32.xlu0 %v5001_v53 }
0x1a48   :  { %v5159_v54 = vpop.f32.mrb[56].mxu1 }
0x1a49   :  { %v5163_v47 = vmul.f32 0.35355338, %v5159_v54  ;;  %v8389_v55 = vpop.f32.mrb[57].mxu1 }
0x1a4b   :  { %v5164_v56 = vsel %vm216_vm0, %v5163_v47, -inf }
0x1a4c   :  { %5165 = vmax.xlane.f32.xlu1 %v5164_v56 }
0x1ac9   :  { %v5003_v40 = vpop.xlane.xlu0 %5002 }
0x1aca   :  { %v5004_v39 = vsub.f32 %v5000_v48, %v5003_v40 }
0x1acc   :  { %v5005_v24 = vmul.f32 1.442695, %v5004_v39  ;;  %v4828_v39 = vadd.f32 %v9635_v42, %v9643_v25  ;;  %v4916_v42 = vadd.f32 %v9638_v31, %v9648_v49 }
0x1ace   :  { %8872 = vpow2.f32 %v5005_v24  ;;  %v4740_v24 = vadd.f32 %v9625_v8, %v9632_v5 }
0x1ad8   :  { %v8873_v59 = vpop.eup %8872 }
0x1ad9   :  { %v5166_v60 = vpop.xlane.xlu1 %5165  ;;  %v5007_v61 = vsel %vm216_vm0, %v8873_v59, 0.0 }
0x1ada   :  { %v5167_v63 = vsub.f32 %v5163_v47, %v5166_v60  ;;  %5008 = vadd.xlane.f32.xlu0 %v5007_v61  ;;  %v9691_v47 = vld [vmem:[%s9238_s26 + $0x30] sm:$0xff] }
0x1adc   :  { %v5168_v0 = vmul.f32 1.442695, %v5167_v63 }
0x1ade   :  { %8874 = vpow2.f32 %v5168_v0 }
0x1ae8   :  { %v8875_v46 = vpop.eup %8874 }
0x1ae9   :  { %v5170_v6 = vsel %vm216_vm0, %v8875_v46, 0.0 }
0x1aea   :  { %5171 = vadd.xlane.f32.xlu1 %v5170_v6  ;;  %v9716_v6 = vld [vmem:[%s9238_s26 + $0x38] sm:$0xff] }
0x1b67   :  { %v5009_v51 = vpop.xlane.xlu0 %5008 }
0x1b68   :  { %8876 = vrcp.f32 %v5009_v51 }
0x1b72   :  { %v8877_v10 = vpop.eup %8876 }
0x1b73   :  { %v5011_v27 = vmul.f32 %v8877_v10, %v8873_v59 }
0x1b75   :  { %8383 = vmatmul.mubr.msk.f32.vlgmr.msra.gmra.mrb[54].mxu0 %vm216_vm0, %v5011_v27 }
0x1b76   :  { %8391 = vmatpush3.msra.mxu0 %v4388_v21  ;;  %8392 = vmatprep.mubr.msk.f32.mxu0 %vm8936_vm3, %v8935_v34 }
0x1b77   :  { %v5172_v12 = vpop.xlane.xlu1 %5171  ;;  %8400 = vmatprep.subr.mxu0 %v8935_v34 }
0x1b78   :  { %8878 = vrcp.f32 %v5172_v12 }
0x1b82   :  { %v8879_v14 = vpop.eup %8878 }
0x1b83   :  { %v5174_v20 = vmul.f32 %v8879_v14, %v8875_v46 }
0x1b85   :  { %8393 = vmatmul.mubr.msk.f32.vlgmr.msra.gmra.mrb[56].mxu0 %vm216_vm0, %v5174_v20 }
0x1b86   :  { %8401 = vmatpush3.msra.mxu0 %v9660_v26  ;;  %8402 = vmatprep.mubr.msk.f32.mxu0 %vm8936_vm3, %v8935_v34 }
0x1b87   :  { %8410 = vmatprep.subr.mxu0 %v8935_v34 }
0x1c48   :  { %v5081_v28 = vpop.f32.mrb[54].mxu0 }
0x1c49   :  { %v8384_v29 = vpop.f32.mrb[55].mxu0  ;;  %8403 = vmatmul.mubr.msk.f32.vlgmr.msra.gmra.mrb[58].mxu0 %vm216_vm0, %v5081_v28 }
0x1c4a   :  { %8411 = vmatpush3.msra.mxu0 %v4652_v2  ;;  %8412 = vmatprep.mubr.msk.f32.mxu0 %vm8936_vm3, %v8935_v34 }
0x1c4b   :  { %8420 = vmatprep.subr.mxu0 %v8935_v34 }
0x1c58   :  { %v5244_v35 = vpop.f32.mrb[56].mxu0 }
0x1c59   :  { %v8394_v36 = vpop.f32.mrb[57].mxu0  ;;  %8398 = vmatmul.mubr.msk.f32.vlgmr.msra.gmra.mrb[58].mxu1 %vm216_vm0, %v5244_v35 }
0x1c5a   :  { %8406 = vmatpush3.xpose.msk.msra.mxu1 %vm216_vm0, %v4564_v30  ;;  %8407 = vmatprep.mubr.msk.f32.mxu1 %vm8936_vm3, %v8935_v34 }
0x1c5b   :  { %8415 = vmatprep.subr.mxu1 %v8935_v34 }
0x1c5d   :  { %8408 = vmatmul.mubr.msk.f32.vlgmr.msra.gmra.mrb[60].mxu1 %vm216_vm0, %v4476_v18 }
0x1c5e   :  { %8417 = vmatprep.mubr.msk.f32.mxu1 %vm8936_vm3, %v8935_v34  ;;  %8416 = vmatpush3.msra.mxu1 %v9691_v47 }
0x1c5f   :  { %8425 = vmatprep.subr.mxu1 %v8935_v34 }
0x1d1c   :  { %v5392_v33 = vpop.f32.mrb[58].mxu0 }
0x1d1d   :  { %v8404_v37 = vpop.f32.mrb[59].mxu0 }
0x1d2c   :  { %v5319_v23 = vpop.f32.mrb[58].mxu1 }
0x1d2d   :  { %v5393_v11 = vadd.f32 %v5392_v33, %v5319_v23  ;;  %v8399_v17 = vpop.f32.mrb[59].mxu1 }
0x1d30   :  { %v5468_v43 = vpop.f32.mrb[60].mxu1 }
0x1d31   :  { %v5472_v19 = vmul.f32 0.35355338, %v5468_v43  ;;  %v8409_v16 = vpop.f32.mrb[61].mxu1 }
0x1d33   :  { %v5473_v48 = vsel %vm216_vm0, %v5472_v19, -inf }
0x1d34   :  { %5474 = vmax.xlane.f32.xlu0 %v5473_v48 }
0x1dc1   :  { %v5475_v32 = vpop.xlane.xlu0 %5474 }
0x1dc2   :  { %v5476_v13 = vsub.f32 %v5472_v19, %v5475_v32 }
0x1dc4   :  { %v5477_v50 = vmul.f32 1.442695, %v5476_v13 }
0x1dc6   :  { %8880 = vpow2.f32 %v5477_v50 }
0x1dd0   :  { %v8881_v53 = vpop.eup %8880 }
0x1dd1   :  { %v5479_v54 = vsel %vm216_vm0, %v8881_v53, 0.0 }
0x1dd2   :  { %5480 = vadd.xlane.f32.xlu1 %v5479_v54 }
0x1e5f   :  { %v5481_v55 = vpop.xlane.xlu1 %5480 }
0x1e60   :  { %8882 = vrcp.f32 %v5481_v55 }
0x1e6a   :  { %v8883_v56 = vpop.eup %8882 }
0x1e6b   :  { %v5483_v40 = vmul.f32 %v8883_v56, %v8881_v53 }
0x1e6d   :  { %8413 = vmatmul.mubr.msk.f32.vlgmr.msra.gmra.mrb[60].mxu0 %vm216_vm0, %v5483_v40 }
0x1e6e   :  { %8421 = vmatpush3.xpose.msk.msra.mxu0 %vm216_vm0, %v4828_v39  ;;  %8422 = vmatprep.mubr.msk.f32.mxu0 %vm8936_vm3, %v8935_v34 }
0x1e6f   :  { %8430 = vmatprep.subr.mxu0 %v8935_v34 }
0x1e71   :  { %8423 = vmatmul.mubr.msk.f32.vlgmr.msra.gmra.mrb[62].mxu0 %vm216_vm0, %v4740_v24 }
0x1e72   :  { %8432 = vmatprep.mubr.msk.f32.mxu0 %vm8936_vm3, %v8935_v34  ;;  %8431 = vmatpush3.msra.mxu0 %v9716_v6 }
0x1e73   :  { %8440 = vmatprep.subr.mxu0 %v8935_v34 }
0x1f40   :  { %v5553_v25 = vpop.f32.mrb[60].mxu0 }
0x1f41   :  { %v8414_v59 = vpop.f32.mrb[61].mxu0  ;;  %8418 = vmatmul.mubr.msk.f32.vlgmr.msra.gmra.mrb[62].mxu1 %vm216_vm0, %v5553_v25 }
0x1f42   :  { %8426 = vmatpush3.msra.mxu1 %v4916_v42  ;;  %8427 = vmatprep.mubr.msk.f32.mxu1 %vm8936_vm3, %v8935_v34 }
0x1f43   :  { %8435 = vmatprep.subr.mxu1 %v8935_v34 }
0x1f44   :  { %v5705_v8 = vpop.f32.mrb[62].mxu0 }
0x1f45   :  { %v5709_v5 = vmul.f32 0.35355338, %v5705_v8  ;;  %v8424_v60 = vpop.f32.mrb[63].mxu0 }
0x1f47   :  { %v5710_v61 = vsel %vm216_vm0, %v5709_v5, -inf }
0x1f48   :  { %5711 = vmax.xlane.f32.xlu0 %v5710_v61 }
0x1fd5   :  { %v5712_v63 = vpop.xlane.xlu0 %5711 }
0x1fd6   :  { %v5713_v0 = vsub.f32 %v5709_v5, %v5712_v63 }
0x1fd8   :  { %v5714_v31 = vmul.f32 1.442695, %v5713_v0 }
0x1fda   :  { %8884 = vpow2.f32 %v5714_v31 }
0x1fe4   :  { %v8885_v49 = vpop.eup %8884 }
0x1fe5   :  { %v5716_v46 = vsel %vm216_vm0, %v8885_v49, 0.0 }
0x1fe6   :  { %5717 = vadd.xlane.f32.xlu1 %v5716_v46  ;;  %v9791_v46 = vld [vmem:[%s9375_s1 + $0x1] ss:$0 sm:$0xff]  ;;  %s7342_s1 = sld [smem:[%s9867_s0 + %s8951_s17]]  }
0x2014   :  { %v5628_v51 = vpop.f32.mrb[62].mxu1 }
0x2015   :  { %v5632_v10 = vadd.f32 %v5628_v51, %v5393_v11  ;;  %v8419_v27 = vpop.f32.mrb[63].mxu1 }
0x2073   :  { %v5718_v21 = vpop.xlane.xlu1 %5717 }
0x2074   :  { %8886 = vrcp.f32 %v5718_v21 }
0x207e   :  { %v8887_v12 = vpop.eup %8886 }
0x207f   :  { %v5720_v14 = vmul.f32 %v8887_v12, %v8885_v49 }
0x2081   :  { %8428 = vmatmul.mubr.msk.f32.vlgmr.msra.gmra.mrb[64].mxu1 %vm216_vm0, %v5720_v14 }
0x2082   :  { %8436 = vmatpush3.xpose.msk.msra.mxu1 %vm216_vm0, %v9579_v57  ;;  %8437 = vmatprep.mubr.msk.f32.mxu1 %vm8936_vm3, %v8935_v34 }
0x2083   :  { %8445 = vmatprep.subr.mxu1 %v8935_v34 }
0x2085   :  { %8438 = vmatmul.mubr.msk.f32.vlgmr.msra.gmra.mrb[66].mxu1 %vm216_vm0, %v9577_v52 }
0x2086   :  { %8446 = vmatpush3.xpose.msk.msra.mxu1 %vm216_vm0, %v9597_v22  ;;  %8447 = vmatprep.mubr.msk.f32.mxu1 %vm8936_vm3, %v8935_v34 }
0x2087   :  { %8455 = vmatprep.subr.mxu1 %v8935_v34 }
0x2089   :  { %8448 = vmatmul.mubr.msk.f32.vlgmr.msra.gmra.mrb[68].mxu1 %vm216_vm0, %v9590_v9 }
0x208a   :  { %8456 = vmatpush3.msra.mxu1 %v9668_v15  ;;  %8457 = vmatprep.mubr.msk.f32.mxu1 %vm8936_vm3, %v8935_v34 }
0x208b   :  { %8465 = vmatprep.subr.mxu1 %v8935_v34 }
0x2154   :  { %v5790_v57 = vpop.f32.mrb[64].mxu1 }
0x2155   :  { %v8429_v52 = vpop.f32.mrb[65].mxu1  ;;  %8433 = vmatmul.mubr.msk.f32.vlgmr.msra.gmra.mrb[64].mxu0 %vm216_vm0, %v5790_v57 }
0x2156   :  { %8441 = vmatpush3.msra.mxu0 %v9588_v3  ;;  %8442 = vmatprep.mubr.msk.f32.mxu0 %vm8936_vm3, %v8935_v34 }
0x2157   :  { %8450 = vmatprep.subr.mxu0 %v8935_v34 }
0x2158   :  { %v5942_v22 = vpop.f32.mrb[66].mxu1 }
0x2159   :  { %v5946_v9 = vmul.f32 0.35355338, %v5942_v22  ;;  %v8439_v20 = vpop.f32.mrb[67].mxu1 }
0x215b   :  { %v5947_v15 = vsel %vm216_vm0, %v5946_v9, -inf }
0x215c   :  { %5948 = vmax.xlane.f32.xlu0 %v5947_v15  ;;  %v6103_v2 = vpop.f32.mrb[68].mxu1 }
0x215d   :  { %v6107_v28 = vmul.f32 0.35355338, %v6103_v2  ;;  %v8449_v29 = vpop.f32.mrb[69].mxu1 }
0x215f   :  { %v6108_v30 = vsel %vm216_vm0, %v6107_v28, -inf }
0x2160   :  { %6109 = vmax.xlane.f32.xlu1 %v6108_v30 }
0x21e9   :  { %v5949_v35 = vpop.xlane.xlu0 %5948 }
0x21ea   :  { %v5950_v36 = vsub.f32 %v5946_v9, %v5949_v35 }
0x21ec   :  { %v5951_v3 = vmul.f32 1.442695, %v5950_v36 }
0x21ed   :  { %v6110_v18 = vpop.xlane.xlu1 %6109 }
0x21ee   :  { %8888 = vpow2.f32 %v5951_v3  ;;  %v6111_v33 = vsub.f32 %v6107_v28, %v6110_v18 }
0x21f0   :  { %v6112_v37 = vmul.f32 1.442695, %v6111_v33 }
0x21f2   :  { %8890 = vpow2.f32 %v6112_v37  ;;  %v7623_v37 = vld [vmem:[%s9394_s6 + $0x1] ss:$0 sm:$0xff]  ;;  %s8952_s6 = smov 33  }
0x21f3   :  { %s7343_s18 = sld [smem:[%s9867_s0 + %s8952_s6]]  }
0x21f8   :  { %v8889_v23 = vpop.eup %8888 }
0x21f9   :  { %v5953_v11 = vsel %vm216_vm0, %v8889_v23, 0.0 }
0x21fa   :  { %5954 = vadd.xlane.f32.xlu0 %v5953_v11 }
0x21fc   :  { %v8891_v17 = vpop.eup %8890 }
0x21fd   :  { %v6114_v43 = vsel %vm216_vm0, %v8891_v17, 0.0 }
0x21fe   :  { %6115 = vadd.xlane.f32.xlu1 %v6114_v43  ;;  %v7624_v43 = vld [vmem:[%s9399_s10 + $0x1] ss:$0 sm:$0xff] }
0x2228   :  { %v5865_v19 = vpop.f32.mrb[64].mxu0 }
0x2229   :  { %v9748_v16 = vadd.f32 %v5865_v19, %v5632_v10  ;;  %v8434_v48 = vpop.f32.mrb[65].mxu0 }
0x2287   :  { %v5955_v32 = vpop.xlane.xlu0 %5954 }
0x2288   :  { %8892 = vrcp.f32 %v5955_v32 }
0x228b   :  { %v6116_v13 = vpop.xlane.xlu1 %6115 }
0x228c   :  { %8894 = vrcp.f32 %v6116_v13 }
0x2292   :  { %v8893_v50 = vpop.eup %8892 }
0x2293   :  { %v5957_v53 = vmul.f32 %v8893_v50, %v8889_v23 }
0x2295   :  { %8443 = vmatmul.mubr.msk.f32.vlgmr.msra.gmra.mrb[66].mxu0 %vm216_vm0, %v5957_v53 }
0x2296   :  { %v8895_v54 = vpop.eup %8894  ;;  %8451 = vmatpush3.msra.mxu0 %v9600_v7  ;;  %8452 = vmatprep.mubr.msk.f32.mxu0 %vm8936_vm3, %v8935_v34 }
0x2297   :  { %v6118_v55 = vmul.f32 %v8895_v54, %v8891_v17  ;;  %8460 = vmatprep.subr.mxu0 %v8935_v34 }
0x2299   :  { %8453 = vmatmul.mubr.msk.f32.vlgmr.msra.gmra.mrb[68].mxu0 %vm216_vm0, %v6118_v55 }
0x229a   :  { %8461 = vmatpush3.msra.mxu0 %v9660_v26  ;;  %8462 = vmatprep.mubr.msk.f32.mxu0 %vm8936_vm3, %v8935_v34 }
0x229b   :  { %8470 = vmatprep.subr.mxu0 %v8935_v34 }
0x2368   :  { %v6027_v56 = vpop.f32.mrb[66].mxu0 }
0x2369   :  { %v8444_v40 = vpop.f32.mrb[67].mxu0  ;;  %8463 = vmatmul.mubr.msk.f32.vlgmr.msra.gmra.mrb[70].mxu0 %vm216_vm0, %v6027_v56 }
0x236a   :  { %8471 = vmatpush3.msra.mxu0 %v9627_v38  ;;  %8472 = vmatprep.mubr.msk.f32.mxu0 %vm8936_vm3, %v8935_v34 }
0x236b   :  { %8480 = vmatprep.subr.mxu0 %v8935_v34 }
0x236c   :  { %v6188_v7 = vpop.f32.mrb[68].mxu0 }
0x236d   :  { %v8454_v39 = vpop.f32.mrb[69].mxu0  ;;  %8458 = vmatmul.mubr.msk.f32.vlgmr.msra.gmra.mrb[70].mxu1 %vm216_vm0, %v6188_v7 }
0x236e   :  { %8466 = vmatpush3.xpose.msk.msra.mxu1 %vm216_vm0, %v9619_v58  ;;  %8467 = vmatprep.mubr.msk.f32.mxu1 %vm8936_vm3, %v8935_v34 }
0x236f   :  { %8475 = vmatprep.subr.mxu1 %v8935_v34 }
0x2371   :  { %8468 = vmatmul.mubr.msk.f32.vlgmr.msra.gmra.mrb[72].mxu1 %vm216_vm0, %v9614_v62 }
0x2372   :  { %8476 = vmatpush3.msra.mxu1 %v9691_v47  ;;  %8477 = vmatprep.mubr.msk.f32.mxu1 %vm8936_vm3, %v8935_v34 }
0x2373   :  { %8485 = vmatprep.subr.mxu1 %v8935_v34 }
0x243c   :  { %v6334_v38 = vpop.f32.mrb[70].mxu0 }
0x243d   :  { %v8464_v26 = vpop.f32.mrb[71].mxu0 }
0x243e   :  { %v7627_v26 = vld [vmem:[%s9414_s15 + $0x1] ss:$0 sm:$0xff] }
0x2440   :  { %v6261_v24 = vpop.f32.mrb[70].mxu1 }
0x2441   :  { %v6335_v42 = vadd.f32 %v6334_v38, %v6261_v24  ;;  %v8459_v58 = vpop.f32.mrb[71].mxu1 }
0x2444   :  { %v6410_v25 = vpop.f32.mrb[72].mxu1 }
0x2445   :  { %v6414_v59 = vmul.f32 0.35355338, %v6410_v25  ;;  %v8469_v8 = vpop.f32.mrb[73].mxu1 }
0x2447   :  { %v6415_v5 = vsel %vm216_vm0, %v6414_v59, -inf }
0x2448   :  { %6416 = vmax.xlane.f32.xlu0 %v6415_v5 }
0x24d5   :  { %v6417_v60 = vpop.xlane.xlu0 %6416 }
0x24d6   :  { %v6418_v62 = vsub.f32 %v6414_v59, %v6417_v60 }
0x24d8   :  { %v6419_v61 = vmul.f32 1.442695, %v6418_v62 }
0x24da   :  { %8896 = vpow2.f32 %v6419_v61 }
0x24e4   :  { %v8897_v47 = vpop.eup %8896 }
0x24e5   :  { %v6421_v63 = vsel %vm216_vm0, %v8897_v47, 0.0 }
0x24e6   :  { %6422 = vadd.xlane.f32.xlu1 %v6421_v63 }
0x2573   :  { %v6423_v0 = vpop.xlane.xlu1 %6422 }
0x2574   :  { %8898 = vrcp.f32 %v6423_v0 }
0x257e   :  { %v8899_v31 = vpop.eup %8898 }
0x257f   :  { %v6425_v49 = vmul.f32 %v8899_v31, %v8897_v47 }
0x2581   :  { %8473 = vmatmul.mubr.msk.f32.vlgmr.msra.gmra.mrb[72].mxu0 %vm216_vm0, %v6425_v49 }
0x2582   :  { %8481 = vmatpush3.xpose.msk.msra.mxu0 %vm216_vm0, %v9641_v44  ;;  %8482 = vmatprep.mubr.msk.f32.mxu0 %vm8936_vm3, %v8935_v34  ;;  %v6816_v44 = vadd.f32 %v9791_v46, %v9748_v16 }
0x2583   :  { %8490 = vmatprep.subr.mxu0 %v8935_v34 }
0x2584   :  { %v6818_v12 = vadd.f32 %v6816_v44, %v9484_v1 }
0x2585   :  { %8483 = vmatmul.mubr.msk.f32.vlgmr.msra.gmra.mrb[74].mxu0 %vm216_vm0, %v9630_v41 }
0x2586   :  { %8491 = vmatpush3.msra.mxu0 %v9716_v6  ;;  %8492 = vmatprep.mubr.msk.f32.mxu0 %vm8936_vm3, %v8935_v34  ;;  %v6824_v14 = vsel %vm443_vm2, %v6818_v12, 0.0 }
0x2654   :  { %v6495_v51 = vpop.f32.mrb[72].mxu0 }
0x2655   :  { %v8474_v10 = vpop.f32.mrb[73].mxu0  ;;  %8478 = vmatmul.mubr.msk.f32.vlgmr.msra.gmra.mrb[74].mxu1 %vm216_vm0, %v6495_v51 }
0x2656   :  { %8486 = vmatpush3.msra.mxu1 %v9646_v45  ;;  %8487 = vmatprep.mubr.msk.f32.mxu1 %vm8936_vm3, %v8935_v34 }
0x2658   :  { %v6645_v41 = vpop.f32.mrb[74].mxu0 }
0x2659   :  { %v6649_v27 = vmul.f32 0.35355338, %v6645_v41  ;;  %v8484_v6 = vpop.f32.mrb[75].mxu0 }
0x265b   :  { %v6650_v21 = vsel %vm216_vm0, %v6649_v27, -inf }
0x265c   :  { %6651 = vmax.xlane.f32.xlu0 %v6650_v21 }
0x2660   :  { %6825 = vadd.xlane.f32.xlu0 %v6824_v14 }
0x26e9   :  { %v6652_v57 = vpop.xlane.xlu0 %6651 }
0x26ea   :  { %v6653_v52 = vsub.f32 %v6649_v27, %v6652_v57 }
0x26ec   :  { %v6654_v45 = vmul.f32 1.442695, %v6653_v52 }
0x26ed   :  { %v6826_v22 = vpop.xlane.xlu0 %6825 }
0x26ee   :  { %8900 = vpow2.f32 %v6654_v45  ;;  %v6830_v34 = vmul.f32 0.03125, %v6826_v22  ;;  %v7629_v45 = vld [vmem:[%s9437_s28 + $0x20] sm:$0xff]  ;;  %v7630_v22 = vld [vmem:[%s9437_s28 + $0x28] sm:$0xff] }
0x26f0   :  { %v6832_v9 = vsub.f32 %v6818_v12, %v6830_v34  ;;  %v8755_v34 = vpack.c.bf16 %v7630_v22, %v7629_v45 }
0x26f2   :  { %v6834_v20 = vmul.f32 %v6832_v9, %v6832_v9  ;;  %8756 = vmatprep.subr.bf16.mxu1 %v8755_v34 }
0x26f4   :  { %v6836_v15 = vsel %vm443_vm2, %v6834_v20, 0.0  ;;  %v7632_v20 = vld [vmem:[%s9437_s28 + $0x38] sm:$0xff] }
0x26f5   :  { %6837 = vadd.xlane.f32.xlu0 %v6836_v15 }
0x26f8   :  { %v8901_v2 = vpop.eup %8900 }
0x26f9   :  { %v6656_v28 = vsel %vm216_vm0, %v8901_v2, 0.0 }
0x26fa   :  { %6657 = vadd.xlane.f32.xlu1 %v6656_v28 }
0x2728   :  { %v6568_v1 = vpop.f32.mrb[74].mxu1 }
0x2729   :  { %v6572_v29 = vadd.f32 %v6568_v1, %v6335_v42  ;;  %v8479_v30 = vpop.f32.mrb[75].mxu1  ;;  %v7628_v42 = vld [vmem:[%s9419_s20 + $0x1] ss:$0 sm:$0xff] }
0x2782   :  { %v6838_v35 = vpop.xlane.xlu0 %6837 }
0x2783   :  { %v6842_v36 = vmul.f32 0.03125, %v6838_v35 }
0x2785   :  { %v6844_v3 = vadd.f32 1e-05, %v6842_v36 }
0x2787   :  { %8902 = vrsqrt.f32 %v6844_v3  ;;  %v6658_v18 = vpop.xlane.xlu1 %6657  ;;  %v7637_v3 = vld [vmem:[%s9447_s3 + $0x20] sm:$0xff] }
0x2788   :  { %8904 = vrcp.f32 %v6658_v18  ;;  %v7638_v18 = vld [vmem:[%s9447_s3 + $0x28] sm:$0xff] }
0x2791   :  { %v8903_v33 = vpop.eup %8902 }
0x2792   :  { %v8905_v23 = vpop.eup %8904  ;;  %v6848_v11 = vmul.f32 %v8903_v33, %v6832_v9  ;;  %v7631_v9 = vld [vmem:[%s9437_s28 + $0x30] sm:$0xff]  ;;  %v8763_v33 = vpack.c.bf16 %v7638_v18, %v7637_v3 }
0x2793   :  { %v6660_v17 = vmul.f32 %v8905_v23, %v8901_v2  ;;  %v8759_v15 = vpack.c.bf16 %v7632_v20, %v7631_v9  ;;  %v7640_v23 = vld [vmem:[%s9447_s3 + $0x38] sm:$0xff] }
0x2794   :  { %v6856_v19 = vmul.f32 %v7623_v37, %v6848_v11  ;;  %8764 = vmatprep.subr.bf16.mxu0 %v8763_v33 }
0x2795   :  { %8488 = vmatmul.mubr.msk.f32.vlgmr.msra.gmra.mrb[76].mxu1 %vm216_vm0, %v6660_v17  ;;  %v7120_v17 = vld [vmem:[%s9839_s13] sm:$0xff] }
0x2796   :  { %v9807_v16 = vadd.f32 %v7624_v43, %v6856_v19  ;;  %8758 = vmatpush3.bf16.msra.mxu1 %v8755_v34 }
0x2797   :  { %8760 = vmatprep.subr.bf16.mxu1 %v8759_v15 }
0x2798   :  { %v6870_v48 = vsel %vm443_vm2, %v9807_v16, 0.0 }
0x2799   :  { %6871 = vadd.xlane.f32.xlu0 %v6870_v48  ;;  %v7634_v48 = vld [vmem:[%s9460_s9 + $0x1] ss:$0 sm:$0xff] }
0x279a   :  { %8762 = vmatpush3.bf16.msra.mxu1 %v8759_v15 }
0x2826   :  { %v6872_v32 = vpop.xlane.xlu0 %6871 }
0x2827   :  { %v6876_v13 = vmul.f32 0.03125, %v6872_v32 }
0x2829   :  { %v6878_v50 = vsub.f32 %v9807_v16, %v6876_v13 }
0x282b   :  { %v6880_v53 = vmul.f32 %v6878_v50, %v6878_v50 }
0x282d   :  { %v6882_v54 = vsel %vm443_vm2, %v6880_v53, 0.0 }
0x282e   :  { %6883 = vadd.xlane.f32.xlu0 %v6882_v54 }
0x2868   :  { %v6730_v55 = vpop.f32.mrb[76].mxu1 }
0x2869   :  { %v8489_v56 = vpop.f32.mrb[77].mxu1  ;;  %8493 = vmatmul.mubr.msk.f32.vlgmr.msra.gmra.mrb[76].mxu0 %vm216_vm0, %v6730_v55 }
0x286a   :  { %8766 = vmatpush3.bf16.msra.mxu0 %v8763_v33 }
0x28bb   :  { %v6884_v40 = vpop.xlane.xlu0 %6883 }
0x28bc   :  { %v6888_v7 = vmul.f32 0.03125, %v6884_v40 }
0x28be   :  { %v6890_v39 = vadd.f32 1e-05, %v6888_v7 }
0x28c0   :  { %8906 = vrsqrt.f32 %v6890_v39 }
0x28ca   :  { %v8907_v38 = vpop.eup %8906 }
0x28cb   :  { %v6894_v24 = vmul.f32 %v8907_v38, %v6878_v50 }
0x28cd   :  { %v6902_v58 = vmul.f32 %v7627_v26, %v6894_v24 }
0x28cf   :  { %v6910_v25 = vadd.f32 %v7628_v42, %v6902_v58 }
0x28d1   :  { %8503 = vmatprep.mubr.msk.f32.mxu1 %vm443_vm2, %v6910_v25 }
0x293c   :  { %v6803_v59 = vpop.f32.mrb[76].mxu0 }
0x293d   :  { %v6807_v8 = vadd.f32 %v6803_v59, %v6572_v29  ;;  %v8494_v5 = vpop.f32.mrb[77].mxu0 }
0x293f   :  { %v6817_v60 = vadd.f32 %v9791_v46, %v6807_v8 }
0x2941   :  { %v6819_v62 = vadd.f32 %v6817_v60, %v9487_v4 }
0x2943   :  { %v6827_v61 = vsel %vm443_vm2, %v6819_v62, 0.0 }
0x2944   :  { %6828 = vadd.xlane.f32.xlu1 %v6827_v61 }
0x29d1   :  { %v6829_v47 = vpop.xlane.xlu1 %6828 }
0x29d2   :  { %v6831_v63 = vmul.f32 0.03125, %v6829_v47  ;;  %v7122_v47 = vld [vmem:[%s9839_s13 + $0x10] sm:$0xff] }
0x29d4   :  { %v6833_v0 = vsub.f32 %v6819_v62, %v6831_v63  ;;  %v7123_v63 = vld [vmem:[%s9839_s13 + $0x18] sm:$0xff] }
0x29d6   :  { %v6835_v31 = vmul.f32 %v6833_v0, %v6833_v0 }
0x29d8   :  { %v6839_v49 = vsel %vm443_vm2, %v6835_v31, 0.0  ;;  %v7642_v31 = vld [vmem:[%s9476_s16 + $0x1] ss:$0 sm:$0xff] }
0x29d9   :  { %6840 = vadd.xlane.f32.xlu1 %v6839_v49 }
0x2a66   :  { %v6841_v51 = vpop.xlane.xlu1 %6840 }
0x2a67   :  { %v6843_v10 = vmul.f32 0.03125, %v6841_v51 }
0x2a69   :  { %v6845_v44 = vadd.f32 1e-05, %v6843_v10 }
0x2a6b   :  { %8908 = vrsqrt.f32 %v6845_v44 }
0x2a75   :  { %v8909_v41 = vpop.eup %8908 }
0x2a76   :  { %v6849_v46 = vmul.f32 %v8909_v41, %v6833_v0  ;;  %v8775_v0 = vpack.c.bf16 %v7123_v63, %v7122_v47 }
0x2a78   :  { %v6857_v4 = vmul.f32 %v7623_v37, %v6849_v46  ;;  %v7639_v37 = vld [vmem:[%s9447_s3 + $0x30] sm:$0xff] }
0x2a79   :  { %v8767_v11 = vpack.c.bf16 %v7640_v23, %v7639_v37 }
0x2a7a   :  { %v9821_v27 = vadd.f32 %v7624_v43, %v6857_v4  ;;  %v7121_v43 = vld [vmem:[%s9839_s13 + $0x8] sm:$0xff]  ;;  %v7214_v4 = vld [vmem:[%s7342_s1] sm:$0xff] }
0x2a7b   :  { %8768 = vmatprep.subr.bf16.mxu0 %v8767_v11  ;;  %v8771_v19 = vpack.c.bf16 %v7121_v43, %v7120_v17 }
0x2a7c   :  { %v6873_v6 = vsel %vm443_vm2, %v9821_v27, 0.0  ;;  %8770 = vmatpush3.bf16.msra.mxu0 %v8767_v11 }
0x2a7d   :  { %6874 = vadd.xlane.f32.xlu1 %v6873_v6  ;;  %8772 = vmatprep.subr.bf16.mxu1 %v8771_v19  ;;  %v7215_v6 = vld [vmem:[%s7342_s1 + $0x8] sm:$0xff] }
0x2b0a   :  { %v6875_v21 = vpop.xlane.xlu1 %6874 }
0x2b0b   :  { %v6877_v12 = vmul.f32 0.03125, %v6875_v21  ;;  %v8779_v21 = vpack.c.bf16 %v7215_v6, %v7214_v4 }
0x2b0d   :  { %v6879_v14 = vsub.f32 %v9821_v27, %v6877_v12  ;;  %8780 = vmatprep.subr.bf16.mxu0 %v8779_v21 }
0x2b0f   :  { %v6881_v57 = vmul.f32 %v6879_v14, %v6879_v14 }
0x2b11   :  { %v6885_v52 = vsel %vm443_vm2, %v6881_v57, 0.0 }
0x2b12   :  { %6886 = vadd.xlane.f32.xlu1 %v6885_v52 }
0x2b9f   :  { %v6887_v2 = vpop.xlane.xlu1 %6886 }
0x2ba0   :  { %v6889_v28 = vmul.f32 0.03125, %v6887_v2 }
0x2ba2   :  { %v6891_v1 = vadd.f32 1e-05, %v6889_v28 }
0x2ba4   :  { %8910 = vrsqrt.f32 %v6891_v1 }
0x2bae   :  { %v8911_v29 = vpop.eup %8910 }
0x2baf   :  { %v6895_v30 = vmul.f32 %v8911_v29, %v6879_v14 }
0x2bb1   :  { %v6903_v35 = vmul.f32 %v7627_v26, %v6895_v30 }
0x2bb3   :  { %v6911_v36 = vadd.f32 %v7628_v42, %v6903_v35 }
0x2bb5   :  { %8504 = vmatmul.mubr.msk.f32.vlgmr.msra.gmra.mrb[78].mxu1 %vm443_vm2, %v6911_v36 }
0x2bb6   :  { %8774 = vmatpush3.bf16.msra.mxu1 %v8771_v19 }
0x2bb7   :  { %8776 = vmatprep.subr.bf16.mxu1 %v8775_v0 }
0x2bba   :  { %8778 = vmatpush3.bf16.msra.mxu1 %v8775_v0 }
0x2c88   :  { %v8505_v32 = vpop.f32.mrb[78].mxu1 }
0x2c89   :  { %v7003_v13 = vadd.f32 %v8505_v32, %v7634_v48  ;;  %v6997_v50 = vpop.f32.mrb[79].mxu1 }
0x2c8a   :  { %v6998_v53 = vadd.f32 %v7634_v48, %v6997_v50 }
0x2c8b   :  { %v7007_v54 = vmul.f32 %v7003_v13, %v7003_v13 }
0x2c8c   :  { %v7006_v55 = vmul.f32 %v6998_v53, %v6998_v53 }
0x2c8d   :  { %v7009_v56 = vmul.f32 %v7007_v54, %v7003_v13 }
0x2c8e   :  { %v7008_v40 = vmul.f32 %v7006_v55, %v6998_v53 }
0x2c8f   :  { %v7011_v7 = vmul.f32 0.044715, %v7009_v56 }
0x2c90   :  { %v7010_v39 = vmul.f32 0.044715, %v7008_v40 }
0x2c91   :  { %v7013_v38 = vadd.f32 %v7011_v7, %v7003_v13 }
0x2c92   :  { %v7012_v26 = vadd.f32 %v7010_v39, %v6998_v53 }
0x2c93   :  { %v7015_v24 = vmul.f32 0.7978846, %v7013_v38 }
0x2c94   :  { %v7014_v42 = vmul.f32 0.7978846, %v7012_v26 }
0x2c95   :  { %8912 = vtanh.f32 %v7015_v24 }
0x2c96   :  { %8914 = vtanh.f32 %v7014_v42 }
0x2c9f   :  { %v8913_v58 = vpop.eup %8912 }
0x2ca0   :  { %v8915_v25 = vpop.eup %8914  ;;  %v7019_v59 = vadd.f32 1.0, %v8913_v58 }
0x2ca1   :  { %v7018_v8 = vadd.f32 1.0, %v8915_v25 }
0x2ca2   :  { %v7021_v5 = vmul.f32 0.5, %v7019_v59 }
0x2ca3   :  { %v7020_v60 = vmul.f32 0.5, %v7018_v8 }
0x2ca4   :  { %v7023_v61 = vmul.f32 %v7021_v5, %v7003_v13 }
0x2ca5   :  { %v7022_v62 = vmul.f32 %v7020_v60, %v6998_v53 }
0x2ca7   :  { %8514 = vmatprep.mubr.msk.f32.mxu0 %vm443_vm2, %v7022_v62 }
0x2ca8   :  { %8515 = vmatmul.mubr.msk.f32.vlgmr.msra.gmra.mrb[78].mxu0 %vm443_vm2, %v7023_v61 }
0x2ca9   :  { %8782 = vmatpush3.bf16.msra.mxu0 %v8779_v21 }
0x2d7b   :  { %v8516_v49 = vpop.f32.mrb[78].mxu0 }
0x2d7c   :  { %v7115_v51 = vadd.f32 %v8516_v49, %v7642_v31  ;;  %v7109_v10 = vpop.f32.mrb[79].mxu0 }
0x2d7d   :  { %v7110_v44 = vadd.f32 %v7642_v31, %v7109_v10 }
0x2d7e   :  { %v7119_v46 = vadd.f32 %v7115_v51, %v9821_v27  ;;  %v7645_v27 = vld [vmem:[%s7341_s24] ss:$0 sm:$0xff] }
0x2d7f   :  { %v7118_v41 = vadd.f32 %v7110_v44, %v9807_v16  ;;  %v74_v16 = vstv %s7343_s18 }
0x2d80   :  { %75 = vst [vmem:[#allocation2] sm:$0x1] %v74_v16 }
0x2d81   :  { %8525 = vmatprep.mubr.msk.f32.mxu1 %vm443_vm2, %v7118_v41 }
0x2d82   :  { %8526 = vmatmul.mubr.msk.f32.vlgmr.msra.gmra.mrb[80].mxu1 %vm443_vm2, %v7119_v46 }
0x2d87   :  { %v7648_v34 = vld [vmem:[#allocation2] ss:$0 sm:$0xff] }
0x2e55   :  { %v8527_v12 = vpop.f32.mrb[80].mxu1 }
0x2e56   :  { %v7209_v14 = vadd.f32 %v8527_v12, %v7645_v27  ;;  %v7203_v57 = vpop.f32.mrb[81].mxu1 }
0x2e57   :  { %v7204_v52 = vadd.f32 %v7645_v27, %v7203_v57 }
0x2e58   :  { %v7213_v22 = vmax.f32 %v7209_v14, 0.0 }
0x2e59   :  { %v7212_v45 = vmax.f32 %v7204_v52, 0.0 }
0x2e5b   :  { %8532 = vmatprep.mubr.msk.f32.mxu0 %vm429_vm1, %v7212_v45 }
0x2e5c   :  { %8533 = vmatmul.mubr.msk.f32.vlgmr.msra.gmra.mrb[80].mxu0 %vm429_vm1, %v7213_v22 }
0x2f2f   :  { %v8534_v9 = vpop.f32.mrb[80].mxu0 }
0x2f30   :  { %v7301_v20 = vadd.f32 %v8534_v9, %v7648_v34  ;;  %v7295_v15 = vpop.f32.mrb[81].mxu0 }
0x2f31   :  { %v7296_v2 = vadd.f32 %v7648_v34, %v7295_v15 }
0x2f32   :  { %7306 = vst.msk [vmem:[%s7344_s30 + $0x8] sm:$0xff] %vm7304_vm4, %v7301_v20 }
0x2f33   :  { %7305 = vst.msk [vmem:[%s7344_s30] sm:$0xff] %vm7304_vm4, %v7296_v2 }

</bundles_post_ra>
